<compile_context>
chip_gen: v7x
topology: tpu7x:2x2x1
jax: 0.10.0
libtpu: 0.0.40
codegen_flags: <defaults>
</compile_context>

<pallas_src>
import jax
import jax.numpy as jnp
from jax import lax
from jax.experimental import pallas as pl
from jax.experimental.pallas import tpu as pltpu


def _round_up(x, m):
    return (x + m - 1) // m * m


def _bf16(x):
    return x.astype(jnp.bfloat16)


def _tpu_flavor():
    """Best-effort trace-time generation probe (v7x: 2 TensorCores, 64 MiB VMEM)."""
    try:
        kind = jax.devices()[0].device_kind.lower()
    except Exception:
        kind = ""
    is_v7 = "7" in kind
    return {"num_tc": 2 if is_v7 else 1,
            "vmem_limit": (48 if is_v7 else 64) * 1024 * 1024}


def _batch_blocking(B, num_tc):
    """Pick padded batch + batch block for the GRU grid.

    Single-TC chips: one big block (grid=1) -> maximal MXU rows per recurrent
    matmul and no repeated W_hh DMA / repeated T-loops.  2-TC chips: split into
    `num_tc` blocks so the "parallel" grid axis uses both cores.
    """
    if num_tc > 1 and B > 8:
        block_b = _round_up(pl.cdiv(B, num_tc), 8)
        return num_tc * block_b, block_b
    Bp = _round_up(max(B, 8), 8)
    return Bp, Bp


# ---------------------------------------------------------------------------
# Pallas kernel 1: GRU over a length-masked (packed) batch.
#   ctx  : (T, Bb, D)  bf16 -- attention context (time-major)
#   wih  : (D, 3D)     bf16 -- input weights  (gate order r, z, n)
#   whh  : (D, 3D)     bf16 -- recurrent weights
#   gib  : (1, 3D)     f32  -- folded bias b_ih + [b_hh_r, b_hh_z, 0]
#   bhn  : (1, D)      f32  -- hidden bias of the n-gate (cannot be folded)
#   h0   : (Bb, D)     f32  -- initial hidden
#   lens : (Bb, 1)     i32  -- per-example valid lengths
# Outputs: out (T, Bb, D) bf16 (zeros past each length), hN (Bb, D) f32.
# Scratch: gi (T, Bb, 3D) f32 -- hoisted input projection, never hits HBM.
# ---------------------------------------------------------------------------
def _gru_kernel(ctx_ref, wih_ref, whh_ref, gib_ref, bhn_ref, h0_ref, len_ref,
                out_ref, hN_ref, gi_ref):
    T, Bb, D = ctx_ref.shape

    wih = wih_ref[...]                                     # (D, 3D) bf16
    whh = whh_ref[...]                                     # (D, 3D) bf16
    # loop-invariant broadcasts hoisted out of the recurrence
    gib = jnp.broadcast_to(gib_ref[...], (Bb, 3 * D))      # f32
    bhn = jnp.broadcast_to(bhn_ref[...], (Bb, D))          # f32
    lens = jnp.broadcast_to(len_ref[...], (Bb, D))         # i32

    # ---- hoisted input projection: all timesteps, outside the recurrence ----
    def proj(t, carry):
        gi_ref[t] = jnp.dot(ctx_ref[t], wih,
                            preferred_element_type=jnp.float32) + gib
        return carry

    lax.fori_loop(0, T, proj, 0, unroll=True if T <= 32 else 8)

    # ---- serial GRU recurrence (only h @ W_hh remains per step) --------------
    def body(t, h):
        gi = gi_ref[t]                                                   # (Bb, 3D) f32
        gh = jnp.dot(h.astype(jnp.bfloat16), whh,
                     preferred_element_type=jnp.float32)                 # (Bb, 3D) f32
        r = jax.nn.sigmoid(gi[:, 0:D] + gh[:, 0:D])
        z = jax.nn.sigmoid(gi[:, D:2 * D] + gh[:, D:2 * D])
        n = jnp.tanh(gi[:, 2 * D:] + r * (gh[:, 2 * D:] + bhn))
        h_new = (1.0 - z) * n + z * h
        valid = t < lens                                                 # (Bb, D) bool
        # packed-sequence semantics: padded steps emit 0 and do not update h
        out_ref[t] = jnp.where(valid, h_new, 0.0).astype(out_ref.dtype)
        return jnp.where(valid, h_new, h)

    h_last = lax.fori_loop(0, T, body, h0_ref[...],
                           unroll=True if T <= 32 else 4)
    hN_ref[...] = h_last.astype(hN_ref.dtype)


def _gru_pallas(ctx_tbd, wih, whh, gi_bias, bhn, h0, lens, block_b, vmem_limit):
    T, Bp, D = ctx_tbd.shape
    threeD = 3 * D
    nb = Bp // block_b
    cost = pl.CostEstimate(
        flops=4 * T * Bp * D * threeD,                 # input proj + recurrent matmuls
        transcendentals=3 * T * Bp * D,                # 2x sigmoid + tanh per element
        bytes_accessed=(T * Bp * D * 2                 # ctx in (bf16)
                        + nb * 2 * D * threeD * 2      # weights per batch block (bf16)
                        + T * Bp * D * 2               # sequence out (bf16)
                        + 2 * Bp * D * 4))             # h0 in + hN out (f32)
    return pl.pallas_call(
        _gru_kernel,
        out_shape=(jax.ShapeDtypeStruct((T, Bp, D), jnp.bfloat16),
                   jax.ShapeDtypeStruct((Bp, D), jnp.float32)),
        grid=(nb,),
        in_specs=[
            pl.BlockSpec((T, block_b, D), lambda b: (0, b, 0)),   # context (bf16)
            pl.BlockSpec((D, threeD), lambda b: (0, 0)),          # W_ih
            pl.BlockSpec((D, threeD), lambda b: (0, 0)),          # W_hh
            pl.BlockSpec((1, threeD), lambda b: (0, 0)),          # folded gate bias
            pl.BlockSpec((1, D), lambda b: (0, 0)),               # b_hn
            pl.BlockSpec((block_b, D), lambda b: (b, 0)),         # h0
            pl.BlockSpec((block_b, 1), lambda b: (b, 0)),         # lengths
        ],
        out_specs=(
            pl.BlockSpec((T, block_b, D), lambda b: (0, b, 0)),
            pl.BlockSpec((block_b, D), lambda b: (b, 0)),
        ),
        scratch_shapes=[pltpu.VMEM((T, block_b, threeD), jnp.float32)],
        compiler_params=pltpu.CompilerParams(
            dimension_semantics=("parallel",),
            vmem_limit_bytes=vmem_limit),
        cost_estimate=cost,
    )(ctx_tbd, wih, whh, gi_bias, bhn, h0, lens)


# ---------------------------------------------------------------------------
# Pallas kernel 2: output Linear (decoderLinear), tiled over vocab (lane) blocks.
# ---------------------------------------------------------------------------
def _linear_kernel(x_ref, w_ref, b_ref, o_ref):
    acc = jnp.dot(x_ref[...], w_ref[...], preferred_element_type=jnp.float32)
    o_ref[...] = (acc + b_ref[...]).astype(o_ref.dtype)


def _pick_vocab_tile(Vp):
    # Prefer wide (>=256) lane tiles for the 256-wide MXU on v6e/v7x, but keep
    # the grid >= 2 blocks when possible so the "parallel" axis can use both
    # v7x TensorCores.
    for tn in (512, 256, 128):
        if Vp % tn == 0 and Vp // tn >= 2:
            return tn
    for tn in (512, 256, 128):
        if Vp % tn == 0:
            return tn
    return 128


def _linear_pallas(x2d_bf16, w_bf16, bias, vmem_limit):
    M, D = x2d_bf16.shape
    Vp = w_bf16.shape[1]
    tn = _pick_vocab_tile(Vp)
    cost = pl.CostEstimate(
        flops=2 * M * D * Vp, transcendentals=0,
        bytes_accessed=M * D * 2 + D * Vp * 2 + Vp * 4 + M * Vp * 4)
    return pl.pallas_call(
        _linear_kernel,
        out_shape=jax.ShapeDtypeStruct((M, Vp), jnp.float32),
        grid=(Vp // tn,),
        in_specs=[
            pl.BlockSpec((M, D), lambda j: (0, 0)),
            pl.BlockSpec((D, tn), lambda j: (0, j)),
            pl.BlockSpec((1, tn), lambda j: (0, j)),
        ],
        out_specs=pl.BlockSpec((M, tn), lambda j: (0, j)),
        compiler_params=pltpu.CompilerParams(
            dimension_semantics=("parallel",),
            vmem_limit_bytes=vmem_limit),
        cost_estimate=cost,
    )(x2d_bf16, w_bf16, bias)


# ---------------------------------------------------------------------------
# Attention: the PyTorch Decoder receives `attention` as an injected module.
# TODO(synk): exact injected attention module is external to this spec; a Luong
# "general" attention (score = embed @ (enc_out @ Wa)^T, softmax, weighted sum)
# is used as the stand-in, in plain JAX (glue, not the kernel focus).
# ---------------------------------------------------------------------------
def _attention(params, enc_out, dec_embed):
    proj = jnp.einsum("bsd,de->bse", enc_out, params["w_att"])    # (B, Te, D)
    scores = jnp.einsum("btd,bsd->bts", dec_embed, proj)          # (B, Tc, Te)
    attn = jax.nn.softmax(scores, axis=-1)
    return jnp.einsum("bts,bsd->btd", attn, enc_out)              # (B, Tc, D)


# ---------------------------------------------------------------------------
# Jitted core: embedding gather, attention, Pallas GRU (in-kernel hoisted input
# projection), Pallas Linear over the full padded T (all static shapes).
# ---------------------------------------------------------------------------
@jax.jit
def _decoder_core(params, cn_data, lens, enc_out, h0):
    B, Tc = cn_data.shape
    D = params["w_hh"].shape[0]
    flavor = _tpu_flavor()

    # 1) embedding lookup; nn.Dropout(0.2) is identity in eval mode
    # TODO(synk): training-mode dropout mask not implemented (eval semantics only).
    embed = params["embedding"][cn_data]                               # (B, Tc, D)

    # 2) attention (injected module stand-in)
    context = _attention(params, enc_out, embed)                       # (B, Tc, D)

    # 3) batch blocking + bf16 time-major context for the kernel
    Bp, block_b = _batch_blocking(B, flavor["num_tc"])
    ctx_tbd = jnp.transpose(context.astype(jnp.bfloat16), (1, 0, 2))   # (Tc, B, D) bf16
    if Bp != B:
        ctx_tbd = jnp.pad(ctx_tbd, ((0, 0), (0, Bp - B), (0, 0)))

    gi_bias = params["b_ih"] + jnp.concatenate(
        [params["b_hh"][:, :2 * D], jnp.zeros((1, D), jnp.float32)], axis=1)
    b_hn = params["b_hh"][:, 2 * D:]

    h0_p = h0.astype(jnp.float32)
    lens_p = lens.reshape(B, 1).astype(jnp.int32)
    if Bp != B:
        h0_p = jnp.pad(h0_p, ((0, Bp - B), (0, 0)))
        lens_p = jnp.pad(lens_p, ((0, Bp - B), (0, 0)))

    # 4) Pallas GRU recurrence (packed semantics via length masking); gi stays in VMEM
    out_tbd, h_final = _gru_pallas(
        ctx_tbd, _bf16(params["w_ih"]), _bf16(params["w_hh"]),
        gi_bias, b_hn, h0_p, lens_p, block_b, flavor["vmem_limit"])
    out2d = jnp.transpose(out_tbd[:, :B, :], (1, 0, 2)).reshape(B * Tc, D)  # bf16
    h_final = h_final[:B]

    # 5) Pallas output Linear over all (static) B*Tc rows; vocab padded to 128
    vocab = params["w_lin"].shape[1]
    Vp = _round_up(vocab, 128)
    w_lin, b_lin = params["w_lin"], params["b_lin"]
    if Vp != vocab:
        w_lin = jnp.pad(w_lin, ((0, 0), (0, Vp - vocab)))
        b_lin = jnp.pad(b_lin, ((0, 0), (0, Vp - vocab)))
    logits = _linear_pallas(out2d, _bf16(w_lin), b_lin, flavor["vmem_limit"])
    logits = logits[:, :vocab].reshape(B, Tc, vocab)
    return logits, h_final


def decoder_forward(params, cn_data, cn_length, enc_output, hidden):
    """Mirrors Decoder.forward(cnData, cnLength, output, hidden)."""
    lens = jnp.asarray(cn_length, dtype=jnp.int32)
    logits_full, h_final = _decoder_core(params, cn_data, lens, enc_output, hidden[0])
    B, Tc, V = logits_full.shape
    # pad_packed_sequence trims to max(cnLength); kernels always see static Tc,
    # only this final slice uses the per-call Python max (no kernel retrace).
    t_out = int(max(cn_length))
    output = logits_full[:, :t_out, :].reshape(-1, V)              # (B*t_out, V)
    return output, h_final[None, :, :]                             # hidden: (1, B, D)


# ---------------------------------------------------------------------------
# Deterministic parameter init (PyTorch-shaped, stored transposed for x @ W)
# ---------------------------------------------------------------------------
def init_params(key, vocab_size, hidden_size):
    D = 2 * hidden_size
    ks = jax.random.split(key, 8)
    bound = 1.0 / jnp.sqrt(D)

    def u(k, shape):
        return jax.random.uniform(k, shape, jnp.float32, -bound, bound)

    return {
        "embedding": jax.random.normal(ks[0], (vocab_size, D), jnp.float32),
        "w_att": u(ks[1], (D, D)),                 # attention (injected module) weight
        "w_ih": u(ks[2], (D, 3 * D)),              # gate order r, z, n
        "w_hh": u(ks[3], (D, 3 * D)),
        "b_ih": u(ks[4], (1, 3 * D)),
        "b_hh": u(ks[5], (1, 3 * D)),
        "w_lin": u(ks[6], (D, vocab_size)),
        "b_lin": u(ks[7], (1, vocab_size)),
    }


# ---------------------------------------------------------------------------
# Pure-JAX reference (same math / same bf16 matmul casts) for a sanity check
# ---------------------------------------------------------------------------
def _reference_decoder(params, cn_data, cn_length, enc_out, hidden):
    B, Tc = cn_data.shape
    D = params["w_hh"].shape[0]
    V = params["w_lin"].shape[1]
    lens = jnp.asarray(cn_length, jnp.int32).reshape(B, 1)

    def mm(a, b):
        return jnp.dot(_bf16(a), _bf16(b), preferred_element_type=jnp.float32)

    embed = params["embedding"][cn_data]
    context = _attention(params, enc_out, embed)
    x_tbd = jnp.transpose(context, (1, 0, 2))

    def step(h, t):
        x_t = x_tbd[t]
        gi = mm(x_t, params["w_ih"]) + params["b_ih"]
        gh = mm(h, params["w_hh"]) + params["b_hh"]
        r = jax.nn.sigmoid(gi[:, :D] + gh[:, :D])
        z = jax.nn.sigmoid(gi[:, D:2 * D] + gh[:, D:2 * D])
        n = jnp.tanh(gi[:, 2 * D:] + r * gh[:, 2 * D:])
        h_new = (1.0 - z) * n + z * h
        valid = t < lens
        return jnp.where(valid, h_new, h), jnp.where(valid, h_new, 0.0)

    h_last, out_tbd = lax.scan(step, hidden[0].astype(jnp.float32), jnp.arange(Tc))
    out_btd = jnp.transpose(out_tbd, (1, 0, 2))
    logits = mm(out_btd.reshape(B * Tc, D), params["w_lin"]) + params["b_lin"]
    t_out = int(max(cn_length))
    logits = logits.reshape(B, Tc, V)[:, :t_out, :].reshape(-1, V)
    return logits, h_last[None]


if __name__ == "__main__":
    HIDDEN = 64                    # GRU width D = 2*HIDDEN = 128 -> lane-aligned
    CN_VOCAB = 512                 # multiple of 128 (generic padding path exists)
    B, T_CN, T_EN = 8, 12, 10
    D = 2 * HIDDEN
    cn_length = [12, 10, 12, 7, 9, 12, 5, 11]

    key = jax.random.PRNGKey(0)
    pkey, k1, k2, k3 = jax.random.split(key, 4)
    params = init_params(pkey, CN_VOCAB, HIDDEN)

    cn_data = jax.random.randint(k1, (B, T_CN), 0, CN_VOCAB, dtype=jnp.int32)
    tmask = jnp.arange(T_CN)[None, :] < jnp.asarray(cn_length)[:, None]
    cn_data = jnp.where(tmask, cn_data, 0)

    enc_output = 0.5 * jax.random.normal(k2, (B, T_EN, D), jnp.float32)   # encoder outputs
    hidden0 = jnp.tanh(jax.random.normal(k3, (1, B, D), jnp.float32))     # initial decoder hidden

    output, hidden = decoder_forward(params, cn_data, cn_length, enc_output, hidden0)
    output = jax.block_until_ready(output)
    hidden = jax.block_until_ready(hidden)

    t_out = max(cn_length)
    assert output.shape == (B * t_out, CN_VOCAB), output.shape
    assert hidden.shape == (1, B, D), hidden.shape

    ref_out, ref_hidden = _reference_decoder(params, cn_data, cn_length, enc_output, hidden0)
    # tolerance accounts for bf16 MXU inputs / fp reassociation of folded biases
    assert jnp.allclose(output, ref_out, atol=2e-2, rtol=2e-2), (
        float(jnp.max(jnp.abs(output - ref_out))))
    assert jnp.allclose(hidden, ref_hidden, atol=2e-2, rtol=2e-2), (
        float(jnp.max(jnp.abs(hidden - ref_hidden))))

    print("KERNEL_OK")
</pallas_src>

<mosaic_0001>
module attributes {stable_mosaic.version = 11 : i64} {
  func.func @_linear_kernel(%arg0: i32, %arg1: memref<96x128xbf16, #tpu.memory_space<vmem>>, %arg2: memref<128x256xbf16, #tpu.memory_space<vmem>>, %arg3: memref<1x256xf32, #tpu.memory_space<vmem>>, %arg4: memref<96x256xf32, #tpu.memory_space<vmem>>) attributes {dimension_semantics = [#tpu.dimension_semantics<parallel>], iteration_bounds = array<i64: 2>, scalar_prefetch = 0 : i64, scratch_operands = 0 : i64, tpu.core_type = #tpu.core_type<tc>, window_params = [{pipeline_mode = #tpu.pipeline_mode<synchronous>, transform_indices = @transform_0, window_bounds = array<i64: 96, 128>}, {transform_indices = @transform_1, window_bounds = array<i64: 128, 256>}, {transform_indices = @transform_2, window_bounds = array<i64: 1, 256>}, {transform_indices = @transform_3, window_bounds = array<i64: 96, 256>}]} {
    %c0 = arith.constant 0 : index
    %c0_0 = arith.constant 0 : index
    %0 = vector.load %arg1[%c0, %c0_0] : memref<96x128xbf16, #tpu.memory_space<vmem>>, vector<96x128xbf16>
    %c0_1 = arith.constant 0 : index
    %c0_2 = arith.constant 0 : index
    %1 = vector.load %arg2[%c0_1, %c0_2] : memref<128x256xbf16, #tpu.memory_space<vmem>>, vector<128x256xbf16>
    %cst = arith.constant dense<0.000000e+00> : vector<96x256xf32>
    %2 = tpu.matmul %0, %1, %cst {dimension_numbers = #tpu.dot_dimension_numbers<[1], [0], [0], [1], [0, 0, 1, 1], [], []>} : vector<96x128xbf16>, vector<128x256xbf16>, vector<96x256xf32> -> vector<96x256xf32>
    %c0_3 = arith.constant 0 : index
    %c0_4 = arith.constant 0 : index
    %3 = vector.load %arg3[%c0_3, %c0_4] : memref<1x256xf32, #tpu.memory_space<vmem>>, vector<1x256xf32>
    %4 = vector.broadcast %3 : vector<1x256xf32> to vector<96x256xf32>
    %5 = arith.addf %2, %4 : vector<96x256xf32>
    %c0_5 = arith.constant 0 : index
    %c0_6 = arith.constant 0 : index
    %6 = vector.load %arg4[%c0_5, %c0_6] : memref<96x256xf32, #tpu.memory_space<vmem>>, vector<96x256xf32>
    tpu.vector_store %arg4[%c0_5, %c0_6], %5 {strides = array<i32>} : memref<96x256xf32, #tpu.memory_space<vmem>>, vector<96x256xf32>,
    return
  }
  func.func @transform_0(%arg0: i32) -> (i32, i32) {
    %c0_i32 = arith.constant 0 : i32
    %c0_i32_0 = arith.constant 0 : i32
    %c0_i32_1 = arith.constant 0 : i32
    return %c0_i32, %c0_i32_0 : i32, i32
  }
  func.func @transform_1(%arg0: i32) -> (i32, i32) {
    %c0_i32 = arith.constant 0 : i32
    %c0_i32_0 = arith.constant 0 : i32
    return %c0_i32, %arg0 : i32, i32
  }
  func.func @transform_2(%arg0: i32) -> (i32, i32) {
    %c0_i32 = arith.constant 0 : i32
    %c0_i32_0 = arith.constant 0 : i32
    return %c0_i32, %arg0 : i32, i32
  }
  func.func @transform_3(%arg0: i32) -> (i32, i32) {
    %c0_i32 = arith.constant 0 : i32
    %c0_i32_0 = arith.constant 0 : i32
    return %c0_i32, %arg0 : i32, i32
  }
}

module attributes {stable_mosaic.version = 11 : i64} {
  func.func @_gru_kernel(%arg0: i32, %arg1: memref<12x8x128xbf16, #tpu.memory_space<vmem>>, %arg2: memref<128x384xbf16, #tpu.memory_space<vmem>>, %arg3: memref<128x384xbf16, #tpu.memory_space<vmem>>, %arg4: memref<1x384xf32, #tpu.memory_space<vmem>>, %arg5: memref<1x128xf32, #tpu.memory_space<vmem>>, %arg6: memref<8x128xf32, #tpu.memory_space<vmem>>, %arg7: memref<8x1xi32, #tpu.memory_space<vmem>>, %arg8: memref<12x8x128xbf16, #tpu.memory_space<vmem>>, %arg9: memref<8x128xf32, #tpu.memory_space<vmem>>, %arg10: memref<12x8x384xf32, #tpu.memory_space<vmem>>) attributes {dimension_semantics = [#tpu.dimension_semantics<parallel>], iteration_bounds = array<i64: 1>, scalar_prefetch = 0 : i64, scratch_operands = 1 : i64, tpu.core_type = #tpu.core_type<tc>, window_params = [{transform_indices = @transform_0, window_bounds = array<i64: 12, 8, 128>}, {pipeline_mode = #tpu.pipeline_mode<synchronous>, transform_indices = @transform_1, window_bounds = array<i64: 128, 384>}, {pipeline_mode = #tpu.pipeline_mode<synchronous>, transform_indices = @transform_2, window_bounds = array<i64: 128, 384>}, {pipeline_mode = #tpu.pipeline_mode<synchronous>, transform_indices = @transform_3, window_bounds = array<i64: 1, 384>}, {pipeline_mode = #tpu.pipeline_mode<synchronous>, transform_indices = @transform_4, window_bounds = array<i64: 1, 128>}, {transform_indices = @transform_5, window_bounds = array<i64: 8, 128>}, {transform_indices = @transform_6, window_bounds = array<i64: 8, 1>}, {transform_indices = @transform_7, window_bounds = array<i64: 12, 8, 128>}, {transform_indices = @transform_8, window_bounds = array<i64: 8, 128>}]} {
    %c0 = arith.constant 0 : index
    %c0_0 = arith.constant 0 : index
    %0 = vector.load %arg2[%c0, %c0_0] : memref<128x384xbf16, #tpu.memory_space<vmem>>, vector<128x384xbf16>
    %c0_1 = arith.constant 0 : index
    %c0_2 = arith.constant 0 : index
    %1 = vector.load %arg3[%c0_1, %c0_2] : memref<128x384xbf16, #tpu.memory_space<vmem>>, vector<128x384xbf16>
    %c0_3 = arith.constant 0 : index
    %c0_4 = arith.constant 0 : index
    %2 = vector.load %arg4[%c0_3, %c0_4] : memref<1x384xf32, #tpu.memory_space<vmem>>, vector<1x384xf32>
    %3 = vector.shape_cast %2 : vector<1x384xf32> to vector<1x384xf32>
    %4 = vector.broadcast %3 : vector<1x384xf32> to vector<8x384xf32>
    %c0_5 = arith.constant 0 : index
    %c0_6 = arith.constant 0 : index
    %5 = vector.load %arg5[%c0_5, %c0_6] : memref<1x128xf32, #tpu.memory_space<vmem>>, vector<1x128xf32>
    %6 = vector.shape_cast %5 : vector<1x128xf32> to vector<1x128xf32>
    %7 = vector.broadcast %6 : vector<1x128xf32> to vector<8x128xf32>
    %c0_7 = arith.constant 0 : index
    %c0_8 = arith.constant 0 : index
    %8 = vector.load %arg7[%c0_7, %c0_8] : memref<8x1xi32, #tpu.memory_space<vmem>>, vector<8x1xi32>
    %9 = vector.shape_cast %8 : vector<8x1xi32> to vector<8x1xi32>
    %10 = vector.broadcast %9 : vector<8x1xi32> to vector<8x128xi32>
    %c0_i32 = arith.constant 0 : i32
    %11 = arith.index_cast %c0_i32 : i32 to index
    %c0_9 = arith.constant 0 : index
    %c0_10 = arith.constant 0 : index
    %12 = vector.load %arg1[%11, %c0_9, %c0_10] : memref<12x8x128xbf16, #tpu.memory_space<vmem>>, vector<1x8x128xbf16>
    %13 = vector.shape_cast %12 : vector<1x8x128xbf16> to vector<8x128xbf16>
    %cst = arith.constant dense<0.000000e+00> : vector<8x384xf32>
    %14 = tpu.matmul %13, %0, %cst {dimension_numbers = #tpu.dot_dimension_numbers<[1], [0], [0], [1], [0, 0, 1, 1], [], []>} : vector<8x128xbf16>, vector<128x384xbf16>, vector<8x384xf32> -> vector<8x384xf32>
    %15 = arith.addf %14, %4 : vector<8x384xf32>
    %16 = arith.index_cast %c0_i32 : i32 to index
    %c0_11 = arith.constant 0 : index
    %c0_12 = arith.constant 0 : index
    %17 = vector.load %arg10[%16, %c0_11, %c0_12] : memref<12x8x384xf32, #tpu.memory_space<vmem>>, vector<1x8x384xf32>
    %18 = vector.shape_cast %17 : vector<1x8x384xf32> to vector<8x384xf32>
    %19 = vector.shape_cast %15 : vector<8x384xf32> to vector<1x8x384xf32>
    tpu.vector_store %arg10[%16, %c0_11, %c0_12], %19 {strides = array<i32>} : memref<12x8x384xf32, #tpu.memory_space<vmem>>, vector<1x8x384xf32>,
    %c1_i32 = arith.constant 1 : i32
    %20 = arith.index_cast %c1_i32 : i32 to index
    %c0_13 = arith.constant 0 : index
    %c0_14 = arith.constant 0 : index
    %21 = vector.load %arg1[%20, %c0_13, %c0_14] : memref<12x8x128xbf16, #tpu.memory_space<vmem>>, vector<1x8x128xbf16>
    %22 = vector.shape_cast %21 : vector<1x8x128xbf16> to vector<8x128xbf16>
    %cst_15 = arith.constant dense<0.000000e+00> : vector<8x384xf32>
    %23 = tpu.matmul %22, %0, %cst_15 {dimension_numbers = #tpu.dot_dimension_numbers<[1], [0], [0], [1], [0, 0, 1, 1], [], []>} : vector<8x128xbf16>, vector<128x384xbf16>, vector<8x384xf32> -> vector<8x384xf32>
    %24 = arith.addf %23, %4 : vector<8x384xf32>
    %25 = arith.index_cast %c1_i32 : i32 to index
    %c0_16 = arith.constant 0 : index
    %c0_17 = arith.constant 0 : index
    %26 = vector.load %arg10[%25, %c0_16, %c0_17] : memref<12x8x384xf32, #tpu.memory_space<vmem>>, vector<1x8x384xf32>
    %27 = vector.shape_cast %26 : vector<1x8x384xf32> to vector<8x384xf32>
    %28 = vector.shape_cast %24 : vector<8x384xf32> to vector<1x8x384xf32>
    tpu.vector_store %arg10[%25, %c0_16, %c0_17], %28 {strides = array<i32>} : memref<12x8x384xf32, #tpu.memory_space<vmem>>, vector<1x8x384xf32>,
    %c2_i32 = arith.constant 2 : i32
    %29 = arith.index_cast %c2_i32 : i32 to index
    %c0_18 = arith.constant 0 : index
    %c0_19 = arith.constant 0 : index
    %30 = vector.load %arg1[%29, %c0_18, %c0_19] : memref<12x8x128xbf16, #tpu.memory_space<vmem>>, vector<1x8x128xbf16>
    %31 = vector.shape_cast %30 : vector<1x8x128xbf16> to vector<8x128xbf16>
    %cst_20 = arith.constant dense<0.000000e+00> : vector<8x384xf32>
    %32 = tpu.matmul %31, %0, %cst_20 {dimension_numbers = #tpu.dot_dimension_numbers<[1], [0], [0], [1], [0, 0, 1, 1], [], []>} : vector<8x128xbf16>, vector<128x384xbf16>, vector<8x384xf32> -> vector<8x384xf32>
    %33 = arith.addf %32, %4 : vector<8x384xf32>
    %34 = arith.index_cast %c2_i32 : i32 to index
    %c0_21 = arith.constant 0 : index
    %c0_22 = arith.constant 0 : index
    %35 = vector.load %arg10[%34, %c0_21, %c0_22] : memref<12x8x384xf32, #tpu.memory_space<vmem>>, vector<1x8x384xf32>
    %36 = vector.shape_cast %35 : vector<1x8x384xf32> to vector<8x384xf32>
    %37 = vector.shape_cast %33 : vector<8x384xf32> to vector<1x8x384xf32>
    tpu.vector_store %arg10[%34, %c0_21, %c0_22], %37 {strides = array<i32>} : memref<12x8x384xf32, #tpu.memory_space<vmem>>, vector<1x8x384xf32>,
    %c3_i32 = arith.constant 3 : i32
    %38 = arith.index_cast %c3_i32 : i32 to index
    %c0_23 = arith.constant 0 : index
    %c0_24 = arith.constant 0 : index
    %39 = vector.load %arg1[%38, %c0_23, %c0_24] : memref<12x8x128xbf16, #tpu.memory_space<vmem>>, vector<1x8x128xbf16>
    %40 = vector.shape_cast %39 : vector<1x8x128xbf16> to vector<8x128xbf16>
    %cst_25 = arith.constant dense<0.000000e+00> : vector<8x384xf32>
    %41 = tpu.matmul %40, %0, %cst_25 {dimension_numbers = #tpu.dot_dimension_numbers<[1], [0], [0], [1], [0, 0, 1, 1], [], []>} : vector<8x128xbf16>, vector<128x384xbf16>, vector<8x384xf32> -> vector<8x384xf32>
    %42 = arith.addf %41, %4 : vector<8x384xf32>
    %43 = arith.index_cast %c3_i32 : i32 to index
    %c0_26 = arith.constant 0 : index
    %c0_27 = arith.constant 0 : index
    %44 = vector.load %arg10[%43, %c0_26, %c0_27] : memref<12x8x384xf32, #tpu.memory_space<vmem>>, vector<1x8x384xf32>
    %45 = vector.shape_cast %44 : vector<1x8x384xf32> to vector<8x384xf32>
    %46 = vector.shape_cast %42 : vector<8x384xf32> to vector<1x8x384xf32>
    tpu.vector_store %arg10[%43, %c0_26, %c0_27], %46 {strides = array<i32>} : memref<12x8x384xf32, #tpu.memory_space<vmem>>, vector<1x8x384xf32>,
    %c4_i32 = arith.constant 4 : i32
    %47 = arith.index_cast %c4_i32 : i32 to index
    %c0_28 = arith.constant 0 : index
    %c0_29 = arith.constant 0 : index
    %48 = vector.load %arg1[%47, %c0_28, %c0_29] : memref<12x8x128xbf16, #tpu.memory_space<vmem>>, vector<1x8x128xbf16>
    %49 = vector.shape_cast %48 : vector<1x8x128xbf16> to vector<8x128xbf16>
    %cst_30 = arith.constant dense<0.000000e+00> : vector<8x384xf32>
    %50 = tpu.matmul %49, %0, %cst_30 {dimension_numbers = #tpu.dot_dimension_numbers<[1], [0], [0], [1], [0, 0, 1, 1], [], []>} : vector<8x128xbf16>, vector<128x384xbf16>, vector<8x384xf32> -> vector<8x384xf32>
    %51 = arith.addf %50, %4 : vector<8x384xf32>
    %52 = arith.index_cast %c4_i32 : i32 to index
    %c0_31 = arith.constant 0 : index
    %c0_32 = arith.constant 0 : index
    %53 = vector.load %arg10[%52, %c0_31, %c0_32] : memref<12x8x384xf32, #tpu.memory_space<vmem>>, vector<1x8x384xf32>
    %54 = vector.shape_cast %53 : vector<1x8x384xf32> to vector<8x384xf32>
    %55 = vector.shape_cast %51 : vector<8x384xf32> to vector<1x8x384xf32>
    tpu.vector_store %arg10[%52, %c0_31, %c0_32], %55 {strides = array<i32>} : memref<12x8x384xf32, #tpu.memory_space<vmem>>, vector<1x8x384xf32>,
    %c5_i32 = arith.constant 5 : i32
    %56 = arith.index_cast %c5_i32 : i32 to index
    %c0_33 = arith.constant 0 : index
    %c0_34 = arith.constant 0 : index
    %57 = vector.load %arg1[%56, %c0_33, %c0_34] : memref<12x8x128xbf16, #tpu.memory_space<vmem>>, vector<1x8x128xbf16>
    %58 = vector.shape_cast %57 : vector<1x8x128xbf16> to vector<8x128xbf16>
    %cst_35 = arith.constant dense<0.000000e+00> : vector<8x384xf32>
    %59 = tpu.matmul %58, %0, %cst_35 {dimension_numbers = #tpu.dot_dimension_numbers<[1], [0], [0], [1], [0, 0, 1, 1], [], []>} : vector<8x128xbf16>, vector<128x384xbf16>, vector<8x384xf32> -> vector<8x384xf32>
    %60 = arith.addf %59, %4 : vector<8x384xf32>
    %61 = arith.index_cast %c5_i32 : i32 to index
    %c0_36 = arith.constant 0 : index
    %c0_37 = arith.constant 0 : index
    %62 = vector.load %arg10[%61, %c0_36, %c0_37] : memref<12x8x384xf32, #tpu.memory_space<vmem>>, vector<1x8x384xf32>
    %63 = vector.shape_cast %62 : vector<1x8x384xf32> to vector<8x384xf32>
    %64 = vector.shape_cast %60 : vector<8x384xf32> to vector<1x8x384xf32>
    tpu.vector_store %arg10[%61, %c0_36, %c0_37], %64 {strides = array<i32>} : memref<12x8x384xf32, #tpu.memory_space<vmem>>, vector<1x8x384xf32>,
    %c6_i32 = arith.constant 6 : i32
    %65 = arith.index_cast %c6_i32 : i32 to index
    %c0_38 = arith.constant 0 : index
    %c0_39 = arith.constant 0 : index
    %66 = vector.load %arg1[%65, %c0_38, %c0_39] : memref<12x8x128xbf16, #tpu.memory_space<vmem>>, vector<1x8x128xbf16>
    %67 = vector.shape_cast %66 : vector<1x8x128xbf16> to vector<8x128xbf16>
    %cst_40 = arith.constant dense<0.000000e+00> : vector<8x384xf32>
    %68 = tpu.matmul %67, %0, %cst_40 {dimension_numbers = #tpu.dot_dimension_numbers<[1], [0], [0], [1], [0, 0, 1, 1], [], []>} : vector<8x128xbf16>, vector<128x384xbf16>, vector<8x384xf32> -> vector<8x384xf32>
    %69 = arith.addf %68, %4 : vector<8x384xf32>
    %70 = arith.index_cast %c6_i32 : i32 to index
    %c0_41 = arith.constant 0 : index
    %c0_42 = arith.constant 0 : index
    %71 = vector.load %arg10[%70, %c0_41, %c0_42] : memref<12x8x384xf32, #tpu.memory_space<vmem>>, vector<1x8x384xf32>
    %72 = vector.shape_cast %71 : vector<1x8x384xf32> to vector<8x384xf32>
    %73 = vector.shape_cast %69 : vector<8x384xf32> to vector<1x8x384xf32>
    tpu.vector_store %arg10[%70, %c0_41, %c0_42], %73 {strides = array<i32>} : memref<12x8x384xf32, #tpu.memory_space<vmem>>, vector<1x8x384xf32>,
    %c7_i32 = arith.constant 7 : i32
    %74 = arith.index_cast %c7_i32 : i32 to index
    %c0_43 = arith.constant 0 : index
    %c0_44 = arith.constant 0 : index
    %75 = vector.load %arg1[%74, %c0_43, %c0_44] : memref<12x8x128xbf16, #tpu.memory_space<vmem>>, vector<1x8x128xbf16>
    %76 = vector.shape_cast %75 : vector<1x8x128xbf16> to vector<8x128xbf16>
    %cst_45 = arith.constant dense<0.000000e+00> : vector<8x384xf32>
    %77 = tpu.matmul %76, %0, %cst_45 {dimension_numbers = #tpu.dot_dimension_numbers<[1], [0], [0], [1], [0, 0, 1, 1], [], []>} : vector<8x128xbf16>, vector<128x384xbf16>, vector<8x384xf32> -> vector<8x384xf32>
    %78 = arith.addf %77, %4 : vector<8x384xf32>
    %79 = arith.index_cast %c7_i32 : i32 to index
    %c0_46 = arith.constant 0 : index
    %c0_47 = arith.constant 0 : index
    %80 = vector.load %arg10[%79, %c0_46, %c0_47] : memref<12x8x384xf32, #tpu.memory_space<vmem>>, vector<1x8x384xf32>
    %81 = vector.shape_cast %80 : vector<1x8x384xf32> to vector<8x384xf32>
    %82 = vector.shape_cast %78 : vector<8x384xf32> to vector<1x8x384xf32>
    tpu.vector_store %arg10[%79, %c0_46, %c0_47], %82 {strides = array<i32>} : memref<12x8x384xf32, #tpu.memory_space<vmem>>, vector<1x8x384xf32>,
    %c8_i32 = arith.constant 8 : i32
    %83 = arith.index_cast %c8_i32 : i32 to index
    %c0_48 = arith.constant 0 : index
    %c0_49 = arith.constant 0 : index
    %84 = vector.load %arg1[%83, %c0_48, %c0_49] : memref<12x8x128xbf16, #tpu.memory_space<vmem>>, vector<1x8x128xbf16>
    %85 = vector.shape_cast %84 : vector<1x8x128xbf16> to vector<8x128xbf16>
    %cst_50 = arith.constant dense<0.000000e+00> : vector<8x384xf32>
    %86 = tpu.matmul %85, %0, %cst_50 {dimension_numbers = #tpu.dot_dimension_numbers<[1], [0], [0], [1], [0, 0, 1, 1], [], []>} : vector<8x128xbf16>, vector<128x384xbf16>, vector<8x384xf32> -> vector<8x384xf32>
    %87 = arith.addf %86, %4 : vector<8x384xf32>
    %88 = arith.index_cast %c8_i32 : i32 to index
    %c0_51 = arith.constant 0 : index
    %c0_52 = arith.constant 0 : index
    %89 = vector.load %arg10[%88, %c0_51, %c0_52] : memref<12x8x384xf32, #tpu.memory_space<vmem>>, vector<1x8x384xf32>
    %90 = vector.shape_cast %89 : vector<1x8x384xf32> to vector<8x384xf32>
    %91 = vector.shape_cast %87 : vector<8x384xf32> to vector<1x8x384xf32>
    tpu.vector_store %arg10[%88, %c0_51, %c0_52], %91 {strides = array<i32>} : memref<12x8x384xf32, #tpu.memory_space<vmem>>, vector<1x8x384xf32>,
    %c9_i32 = arith.constant 9 : i32
    %92 = arith.index_cast %c9_i32 : i32 to index
    %c0_53 = arith.constant 0 : index
    %c0_54 = arith.constant 0 : index
    %93 = vector.load %arg1[%92, %c0_53, %c0_54] : memref<12x8x128xbf16, #tpu.memory_space<vmem>>, vector<1x8x128xbf16>
    %94 = vector.shape_cast %93 : vector<1x8x128xbf16> to vector<8x128xbf16>
    %cst_55 = arith.constant dense<0.000000e+00> : vector<8x384xf32>
    %95 = tpu.matmul %94, %0, %cst_55 {dimension_numbers = #tpu.dot_dimension_numbers<[1], [0], [0], [1], [0, 0, 1, 1], [], []>} : vector<8x128xbf16>, vector<128x384xbf16>, vector<8x384xf32> -> vector<8x384xf32>
    %96 = arith.addf %95, %4 : vector<8x384xf32>
    %97 = arith.index_cast %c9_i32 : i32 to index
    %c0_56 = arith.constant 0 : index
    %c0_57 = arith.constant 0 : index
    %98 = vector.load %arg10[%97, %c0_56, %c0_57] : memref<12x8x384xf32, #tpu.memory_space<vmem>>, vector<1x8x384xf32>
    %99 = vector.shape_cast %98 : vector<1x8x384xf32> to vector<8x384xf32>
    %100 = vector.shape_cast %96 : vector<8x384xf32> to vector<1x8x384xf32>
    tpu.vector_store %arg10[%97, %c0_56, %c0_57], %100 {strides = array<i32>} : memref<12x8x384xf32, #tpu.memory_space<vmem>>, vector<1x8x384xf32>,
    %c10_i32 = arith.constant 10 : i32
    %101 = arith.index_cast %c10_i32 : i32 to index
    %c0_58 = arith.constant 0 : index
    %c0_59 = arith.constant 0 : index
    %102 = vector.load %arg1[%101, %c0_58, %c0_59] : memref<12x8x128xbf16, #tpu.memory_space<vmem>>, vector<1x8x128xbf16>
    %103 = vector.shape_cast %102 : vector<1x8x128xbf16> to vector<8x128xbf16>
    %cst_60 = arith.constant dense<0.000000e+00> : vector<8x384xf32>
    %104 = tpu.matmul %103, %0, %cst_60 {dimension_numbers = #tpu.dot_dimension_numbers<[1], [0], [0], [1], [0, 0, 1, 1], [], []>} : vector<8x128xbf16>, vector<128x384xbf16>, vector<8x384xf32> -> vector<8x384xf32>
    %105 = arith.addf %104, %4 : vector<8x384xf32>
    %106 = arith.index_cast %c10_i32 : i32 to index
    %c0_61 = arith.constant 0 : index
    %c0_62 = arith.constant 0 : index
    %107 = vector.load %arg10[%106, %c0_61, %c0_62] : memref<12x8x384xf32, #tpu.memory_space<vmem>>, vector<1x8x384xf32>
    %108 = vector.shape_cast %107 : vector<1x8x384xf32> to vector<8x384xf32>
    %109 = vector.shape_cast %105 : vector<8x384xf32> to vector<1x8x384xf32>
    tpu.vector_store %arg10[%106, %c0_61, %c0_62], %109 {strides = array<i32>} : memref<12x8x384xf32, #tpu.memory_space<vmem>>, vector<1x8x384xf32>,
    %c11_i32 = arith.constant 11 : i32
    %110 = arith.index_cast %c11_i32 : i32 to index
    %c0_63 = arith.constant 0 : index
    %c0_64 = arith.constant 0 : index
    %111 = vector.load %arg1[%110, %c0_63, %c0_64] : memref<12x8x128xbf16, #tpu.memory_space<vmem>>, vector<1x8x128xbf16>
    %112 = vector.shape_cast %111 : vector<1x8x128xbf16> to vector<8x128xbf16>
    %cst_65 = arith.constant dense<0.000000e+00> : vector<8x384xf32>
    %113 = tpu.matmul %112, %0, %cst_65 {dimension_numbers = #tpu.dot_dimension_numbers<[1], [0], [0], [1], [0, 0, 1, 1], [], []>} : vector<8x128xbf16>, vector<128x384xbf16>, vector<8x384xf32> -> vector<8x384xf32>
    %114 = arith.addf %113, %4 : vector<8x384xf32>
    %115 = arith.index_cast %c11_i32 : i32 to index
    %c0_66 = arith.constant 0 : index
    %c0_67 = arith.constant 0 : index
    %116 = vector.load %arg10[%115, %c0_66, %c0_67] : memref<12x8x384xf32, #tpu.memory_space<vmem>>, vector<1x8x384xf32>
    %117 = vector.shape_cast %116 : vector<1x8x384xf32> to vector<8x384xf32>
    %118 = vector.shape_cast %114 : vector<8x384xf32> to vector<1x8x384xf32>
    tpu.vector_store %arg10[%115, %c0_66, %c0_67], %118 {strides = array<i32>} : memref<12x8x384xf32, #tpu.memory_space<vmem>>, vector<1x8x384xf32>,
    %c12_i32 = arith.constant 12 : i32
    %c0_68 = arith.constant 0 : index
    %c0_69 = arith.constant 0 : index
    %119 = vector.load %arg6[%c0_68, %c0_69] : memref<8x128xf32, #tpu.memory_space<vmem>>, vector<8x128xf32>
    %c0_i32_70 = arith.constant 0 : i32
    %120 = arith.index_cast %c0_i32_70 : i32 to index
    %c0_71 = arith.constant 0 : index
    %c0_72 = arith.constant 0 : index
    %121 = vector.load %arg10[%120, %c0_71, %c0_72] : memref<12x8x384xf32, #tpu.memory_space<vmem>>, vector<1x8x384xf32>
    %122 = vector.shape_cast %121 : vector<1x8x384xf32> to vector<8x384xf32>
    %123 = arith.truncf %119 : vector<8x128xf32> to vector<8x128xbf16>
    %cst_73 = arith.constant dense<0.000000e+00> : vector<8x384xf32>
    %124 = tpu.matmul %123, %1, %cst_73 {dimension_numbers = #tpu.dot_dimension_numbers<[1], [0], [0], [1], [0, 0, 1, 1], [], []>} : vector<8x128xbf16>, vector<128x384xbf16>, vector<8x384xf32> -> vector<8x384xf32>
    %125 = vector.extract_strided_slice %122 {offsets = [0, 0], sizes = [8, 128], strides = [1, 1]} : vector<8x384xf32> to vector<8x128xf32>
    %126 = vector.extract_strided_slice %124 {offsets = [0, 0], sizes = [8, 128], strides = [1, 1]} : vector<8x384xf32> to vector<8x128xf32>
    %127 = arith.addf %125, %126 : vector<8x128xf32>
    %128 = arith.negf %127 : vector<8x128xf32>
    %129 = math.exp %128 : vector<8x128xf32>
    %cst_74 = arith.constant 1.000000e+00 : f32
    %130 = vector.broadcast %cst_74 : f32 to vector<8x128xf32>
    %131 = arith.addf %130, %129 : vector<8x128xf32>
    %132 = arith.divf %130, %131 : vector<8x128xf32>
    %133 = vector.extract_strided_slice %122 {offsets = [0, 128], sizes = [8, 128], strides = [1, 1]} : vector<8x384xf32> to vector<8x128xf32>
    %134 = vector.extract_strided_slice %124 {offsets = [0, 128], sizes = [8, 128], strides = [1, 1]} : vector<8x384xf32> to vector<8x128xf32>
    %135 = arith.addf %133, %134 : vector<8x128xf32>
    %136 = arith.negf %135 : vector<8x128xf32>
    %137 = math.exp %136 : vector<8x128xf32>
    %cst_75 = arith.constant 1.000000e+00 : f32
    %138 = vector.broadcast %cst_75 : f32 to vector<8x128xf32>
    %139 = arith.addf %138, %137 : vector<8x128xf32>
    %140 = arith.divf %138, %139 : vector<8x128xf32>
    %141 = vector.extract_strided_slice %122 {offsets = [0, 256], sizes = [8, 128], strides = [1, 1]} : vector<8x384xf32> to vector<8x128xf32>
    %142 = vector.extract_strided_slice %124 {offsets = [0, 256], sizes = [8, 128], strides = [1, 1]} : vector<8x384xf32> to vector<8x128xf32>
    %143 = arith.addf %142, %7 : vector<8x128xf32>
    %144 = arith.mulf %132, %143 : vector<8x128xf32>
    %145 = arith.addf %141, %144 : vector<8x128xf32>
    %146 = math.tanh %145 : vector<8x128xf32>
    %cst_76 = arith.constant 1.000000e+00 : f32
    %147 = vector.broadcast %cst_76 : f32 to vector<8x128xf32>
    %148 = arith.subf %147, %140 : vector<8x128xf32>
    %149 = arith.mulf %148, %146 : vector<8x128xf32>
    %150 = arith.mulf %140, %119 : vector<8x128xf32>
    %151 = arith.addf %149, %150 : vector<8x128xf32>
    %152 = vector.broadcast %c0_i32_70 : i32 to vector<8x128xi32>
    %153 = arith.cmpi slt, %152, %10 : vector<8x128xi32>
    %cst_77 = arith.constant 0.000000e+00 : f32
    %154 = vector.broadcast %cst_77 : f32 to vector<8x128xf32>
    %155 = arith.select %153, %151, %154 : vector<8x128xi1>, vector<8x128xf32>
    %156 = arith.truncf %155 : vector<8x128xf32> to vector<8x128xbf16>
    %157 = arith.index_cast %c0_i32_70 : i32 to index
    %c0_78 = arith.constant 0 : index
    %c0_79 = arith.constant 0 : index
    %158 = vector.load %arg8[%157, %c0_78, %c0_79] : memref<12x8x128xbf16, #tpu.memory_space<vmem>>, vector<1x8x128xbf16>
    %159 = vector.shape_cast %158 : vector<1x8x128xbf16> to vector<8x128xbf16>
    %160 = vector.shape_cast %156 : vector<8x128xbf16> to vector<1x8x128xbf16>
    tpu.vector_store %arg8[%157, %c0_78, %c0_79], %160 {strides = array<i32>} : memref<12x8x128xbf16, #tpu.memory_space<vmem>>, vector<1x8x128xbf16>,
    %161 = arith.select %153, %151, %119 : vector<8x128xi1>, vector<8x128xf32>
    %c1_i32_80 = arith.constant 1 : i32
    %162 = arith.index_cast %c1_i32_80 : i32 to index
    %c0_81 = arith.constant 0 : index
    %c0_82 = arith.constant 0 : index
    %163 = vector.load %arg10[%162, %c0_81, %c0_82] : memref<12x8x384xf32, #tpu.memory_space<vmem>>, vector<1x8x384xf32>
    %164 = vector.shape_cast %163 : vector<1x8x384xf32> to vector<8x384xf32>
    %165 = arith.truncf %161 : vector<8x128xf32> to vector<8x128xbf16>
    %cst_83 = arith.constant dense<0.000000e+00> : vector<8x384xf32>
    %166 = tpu.matmul %165, %1, %cst_83 {dimension_numbers = #tpu.dot_dimension_numbers<[1], [0], [0], [1], [0, 0, 1, 1], [], []>} : vector<8x128xbf16>, vector<128x384xbf16>, vector<8x384xf32> -> vector<8x384xf32>
    %167 = vector.extract_strided_slice %164 {offsets = [0, 0], sizes = [8, 128], strides = [1, 1]} : vector<8x384xf32> to vector<8x128xf32>
    %168 = vector.extract_strided_slice %166 {offsets = [0, 0], sizes = [8, 128], strides = [1, 1]} : vector<8x384xf32> to vector<8x128xf32>
    %169 = arith.addf %167, %168 : vector<8x128xf32>
    %170 = arith.negf %169 : vector<8x128xf32>
    %171 = math.exp %170 : vector<8x128xf32>
    %cst_84 = arith.constant 1.000000e+00 : f32
    %172 = vector.broadcast %cst_84 : f32 to vector<8x128xf32>
    %173 = arith.addf %172, %171 : vector<8x128xf32>
    %174 = arith.divf %172, %173 : vector<8x128xf32>
    %175 = vector.extract_strided_slice %164 {offsets = [0, 128], sizes = [8, 128], strides = [1, 1]} : vector<8x384xf32> to vector<8x128xf32>
    %176 = vector.extract_strided_slice %166 {offsets = [0, 128], sizes = [8, 128], strides = [1, 1]} : vector<8x384xf32> to vector<8x128xf32>
    %177 = arith.addf %175, %176 : vector<8x128xf32>
    %178 = arith.negf %177 : vector<8x128xf32>
    %179 = math.exp %178 : vector<8x128xf32>
    %cst_85 = arith.constant 1.000000e+00 : f32
    %180 = vector.broadcast %cst_85 : f32 to vector<8x128xf32>
    %181 = arith.addf %180, %179 : vector<8x128xf32>
    %182 = arith.divf %180, %181 : vector<8x128xf32>
    %183 = vector.extract_strided_slice %164 {offsets = [0, 256], sizes = [8, 128], strides = [1, 1]} : vector<8x384xf32> to vector<8x128xf32>
    %184 = vector.extract_strided_slice %166 {offsets = [0, 256], sizes = [8, 128], strides = [1, 1]} : vector<8x384xf32> to vector<8x128xf32>
    %185 = arith.addf %184, %7 : vector<8x128xf32>
    %186 = arith.mulf %174, %185 : vector<8x128xf32>
    %187 = arith.addf %183, %186 : vector<8x128xf32>
    %188 = math.tanh %187 : vector<8x128xf32>
    %cst_86 = arith.constant 1.000000e+00 : f32
    %189 = vector.broadcast %cst_86 : f32 to vector<8x128xf32>
    %190 = arith.subf %189, %182 : vector<8x128xf32>
    %191 = arith.mulf %190, %188 : vector<8x128xf32>
    %192 = arith.mulf %182, %161 : vector<8x128xf32>
    %193 = arith.addf %191, %192 : vector<8x128xf32>
    %194 = vector.broadcast %c1_i32_80 : i32 to vector<8x128xi32>
    %195 = arith.cmpi slt, %194, %10 : vector<8x128xi32>
    %cst_87 = arith.constant 0.000000e+00 : f32
    %196 = vector.broadcast %cst_87 : f32 to vector<8x128xf32>
    %197 = arith.select %195, %193, %196 : vector<8x128xi1>, vector<8x128xf32>
    %198 = arith.truncf %197 : vector<8x128xf32> to vector<8x128xbf16>
    %199 = arith.index_cast %c1_i32_80 : i32 to index
    %c0_88 = arith.constant 0 : index
    %c0_89 = arith.constant 0 : index
    %200 = vector.load %arg8[%199, %c0_88, %c0_89] : memref<12x8x128xbf16, #tpu.memory_space<vmem>>, vector<1x8x128xbf16>
    %201 = vector.shape_cast %200 : vector<1x8x128xbf16> to vector<8x128xbf16>
    %202 = vector.shape_cast %198 : vector<8x128xbf16> to vector<1x8x128xbf16>
    tpu.vector_store %arg8[%199, %c0_88, %c0_89], %202 {strides = array<i32>} : memref<12x8x128xbf16, #tpu.memory_space<vmem>>, vector<1x8x128xbf16>,
    %203 = arith.select %195, %193, %161 : vector<8x128xi1>, vector<8x128xf32>
    %c2_i32_90 = arith.constant 2 : i32
    %204 = arith.index_cast %c2_i32_90 : i32 to index
    %c0_91 = arith.constant 0 : index
    %c0_92 = arith.constant 0 : index
    %205 = vector.load %arg10[%204, %c0_91, %c0_92] : memref<12x8x384xf32, #tpu.memory_space<vmem>>, vector<1x8x384xf32>
    %206 = vector.shape_cast %205 : vector<1x8x384xf32> to vector<8x384xf32>
    %207 = arith.truncf %203 : vector<8x128xf32> to vector<8x128xbf16>
    %cst_93 = arith.constant dense<0.000000e+00> : vector<8x384xf32>
    %208 = tpu.matmul %207, %1, %cst_93 {dimension_numbers = #tpu.dot_dimension_numbers<[1], [0], [0], [1], [0, 0, 1, 1], [], []>} : vector<8x128xbf16>, vector<128x384xbf16>, vector<8x384xf32> -> vector<8x384xf32>
    %209 = vector.extract_strided_slice %206 {offsets = [0, 0], sizes = [8, 128], strides = [1, 1]} : vector<8x384xf32> to vector<8x128xf32>
    %210 = vector.extract_strided_slice %208 {offsets = [0, 0], sizes = [8, 128], strides = [1, 1]} : vector<8x384xf32> to vector<8x128xf32>
    %211 = arith.addf %209, %210 : vector<8x128xf32>
    %212 = arith.negf %211 : vector<8x128xf32>
    %213 = math.exp %212 : vector<8x128xf32>
    %cst_94 = arith.constant 1.000000e+00 : f32
    %214 = vector.broadcast %cst_94 : f32 to vector<8x128xf32>
    %215 = arith.addf %214, %213 : vector<8x128xf32>
    %216 = arith.divf %214, %215 : vector<8x128xf32>
    %217 = vector.extract_strided_slice %206 {offsets = [0, 128], sizes = [8, 128], strides = [1, 1]} : vector<8x384xf32> to vector<8x128xf32>
    %218 = vector.extract_strided_slice %208 {offsets = [0, 128], sizes = [8, 128], strides = [1, 1]} : vector<8x384xf32> to vector<8x128xf32>
    %219 = arith.addf %217, %218 : vector<8x128xf32>
    %220 = arith.negf %219 : vector<8x128xf32>
    %221 = math.exp %220 : vector<8x128xf32>
    %cst_95 = arith.constant 1.000000e+00 : f32
    %222 = vector.broadcast %cst_95 : f32 to vector<8x128xf32>
    %223 = arith.addf %222, %221 : vector<8x128xf32>
    %224 = arith.divf %222, %223 : vector<8x128xf32>
    %225 = vector.extract_strided_slice %206 {offsets = [0, 256], sizes = [8, 128], strides = [1, 1]} : vector<8x384xf32> to vector<8x128xf32>
    %226 = vector.extract_strided_slice %208 {offsets = [0, 256], sizes = [8, 128], strides = [1, 1]} : vector<8x384xf32> to vector<8x128xf32>
    %227 = arith.addf %226, %7 : vector<8x128xf32>
    %228 = arith.mulf %216, %227 : vector<8x128xf32>
    %229 = arith.addf %225, %228 : vector<8x128xf32>
    %230 = math.tanh %229 : vector<8x128xf32>
    %cst_96 = arith.constant 1.000000e+00 : f32
    %231 = vector.broadcast %cst_96 : f32 to vector<8x128xf32>
    %232 = arith.subf %231, %224 : vector<8x128xf32>
    %233 = arith.mulf %232, %230 : vector<8x128xf32>
    %234 = arith.mulf %224, %203 : vector<8x128xf32>
    %235 = arith.addf %233, %234 : vector<8x128xf32>
    %236 = vector.broadcast %c2_i32_90 : i32 to vector<8x128xi32>
    %237 = arith.cmpi slt, %236, %10 : vector<8x128xi32>
    %cst_97 = arith.constant 0.000000e+00 : f32
    %238 = vector.broadcast %cst_97 : f32 to vector<8x128xf32>
    %239 = arith.select %237, %235, %238 : vector<8x128xi1>, vector<8x128xf32>
    %240 = arith.truncf %239 : vector<8x128xf32> to vector<8x128xbf16>
    %241 = arith.index_cast %c2_i32_90 : i32 to index
    %c0_98 = arith.constant 0 : index
    %c0_99 = arith.constant 0 : index
    %242 = vector.load %arg8[%241, %c0_98, %c0_99] : memref<12x8x128xbf16, #tpu.memory_space<vmem>>, vector<1x8x128xbf16>
    %243 = vector.shape_cast %242 : vector<1x8x128xbf16> to vector<8x128xbf16>
    %244 = vector.shape_cast %240 : vector<8x128xbf16> to vector<1x8x128xbf16>
    tpu.vector_store %arg8[%241, %c0_98, %c0_99], %244 {strides = array<i32>} : memref<12x8x128xbf16, #tpu.memory_space<vmem>>, vector<1x8x128xbf16>,
    %245 = arith.select %237, %235, %203 : vector<8x128xi1>, vector<8x128xf32>
    %c3_i32_100 = arith.constant 3 : i32
    %246 = arith.index_cast %c3_i32_100 : i32 to index
    %c0_101 = arith.constant 0 : index
    %c0_102 = arith.constant 0 : index
    %247 = vector.load %arg10[%246, %c0_101, %c0_102] : memref<12x8x384xf32, #tpu.memory_space<vmem>>, vector<1x8x384xf32>
    %248 = vector.shape_cast %247 : vector<1x8x384xf32> to vector<8x384xf32>
    %249 = arith.truncf %245 : vector<8x128xf32> to vector<8x128xbf16>
    %cst_103 = arith.constant dense<0.000000e+00> : vector<8x384xf32>
    %250 = tpu.matmul %249, %1, %cst_103 {dimension_numbers = #tpu.dot_dimension_numbers<[1], [0], [0], [1], [0, 0, 1, 1], [], []>} : vector<8x128xbf16>, vector<128x384xbf16>, vector<8x384xf32> -> vector<8x384xf32>
    %251 = vector.extract_strided_slice %248 {offsets = [0, 0], sizes = [8, 128], strides = [1, 1]} : vector<8x384xf32> to vector<8x128xf32>
    %252 = vector.extract_strided_slice %250 {offsets = [0, 0], sizes = [8, 128], strides = [1, 1]} : vector<8x384xf32> to vector<8x128xf32>
    %253 = arith.addf %251, %252 : vector<8x128xf32>
    %254 = arith.negf %253 : vector<8x128xf32>
    %255 = math.exp %254 : vector<8x128xf32>
    %cst_104 = arith.constant 1.000000e+00 : f32
    %256 = vector.broadcast %cst_104 : f32 to vector<8x128xf32>
    %257 = arith.addf %256, %255 : vector<8x128xf32>
    %258 = arith.divf %256, %257 : vector<8x128xf32>
    %259 = vector.extract_strided_slice %248 {offsets = [0, 128], sizes = [8, 128], strides = [1, 1]} : vector<8x384xf32> to vector<8x128xf32>
    %260 = vector.extract_strided_slice %250 {offsets = [0, 128], sizes = [8, 128], strides = [1, 1]} : vector<8x384xf32> to vector<8x128xf32>
    %261 = arith.addf %259, %260 : vector<8x128xf32>
    %262 = arith.negf %261 : vector<8x128xf32>
    %263 = math.exp %262 : vector<8x128xf32>
    %cst_105 = arith.constant 1.000000e+00 : f32
    %264 = vector.broadcast %cst_105 : f32 to vector<8x128xf32>
    %265 = arith.addf %264, %263 : vector<8x128xf32>
    %266 = arith.divf %264, %265 : vector<8x128xf32>
    %267 = vector.extract_strided_slice %248 {offsets = [0, 256], sizes = [8, 128], strides = [1, 1]} : vector<8x384xf32> to vector<8x128xf32>
    %268 = vector.extract_strided_slice %250 {offsets = [0, 256], sizes = [8, 128], strides = [1, 1]} : vector<8x384xf32> to vector<8x128xf32>
    %269 = arith.addf %268, %7 : vector<8x128xf32>
    %270 = arith.mulf %258, %269 : vector<8x128xf32>
    %271 = arith.addf %267, %270 : vector<8x128xf32>
    %272 = math.tanh %271 : vector<8x128xf32>
    %cst_106 = arith.constant 1.000000e+00 : f32
    %273 = vector.broadcast %cst_106 : f32 to vector<8x128xf32>
    %274 = arith.subf %273, %266 : vector<8x128xf32>
    %275 = arith.mulf %274, %272 : vector<8x128xf32>
    %276 = arith.mulf %266, %245 : vector<8x128xf32>
    %277 = arith.addf %275, %276 : vector<8x128xf32>
    %278 = vector.broadcast %c3_i32_100 : i32 to vector<8x128xi32>
    %279 = arith.cmpi slt, %278, %10 : vector<8x128xi32>
    %cst_107 = arith.constant 0.000000e+00 : f32
    %280 = vector.broadcast %cst_107 : f32 to vector<8x128xf32>
    %281 = arith.select %279, %277, %280 : vector<8x128xi1>, vector<8x128xf32>
    %282 = arith.truncf %281 : vector<8x128xf32> to vector<8x128xbf16>
    %283 = arith.index_cast %c3_i32_100 : i32 to index
    %c0_108 = arith.constant 0 : index
    %c0_109 = arith.constant 0 : index
    %284 = vector.load %arg8[%283, %c0_108, %c0_109] : memref<12x8x128xbf16, #tpu.memory_space<vmem>>, vector<1x8x128xbf16>
    %285 = vector.shape_cast %284 : vector<1x8x128xbf16> to vector<8x128xbf16>
    %286 = vector.shape_cast %282 : vector<8x128xbf16> to vector<1x8x128xbf16>
    tpu.vector_store %arg8[%283, %c0_108, %c0_109], %286 {strides = array<i32>} : memref<12x8x128xbf16, #tpu.memory_space<vmem>>, vector<1x8x128xbf16>,
    %287 = arith.select %279, %277, %245 : vector<8x128xi1>, vector<8x128xf32>
    %c4_i32_110 = arith.constant 4 : i32
    %288 = arith.index_cast %c4_i32_110 : i32 to index
    %c0_111 = arith.constant 0 : index
    %c0_112 = arith.constant 0 : index
    %289 = vector.load %arg10[%288, %c0_111, %c0_112] : memref<12x8x384xf32, #tpu.memory_space<vmem>>, vector<1x8x384xf32>
    %290 = vector.shape_cast %289 : vector<1x8x384xf32> to vector<8x384xf32>
    %291 = arith.truncf %287 : vector<8x128xf32> to vector<8x128xbf16>
    %cst_113 = arith.constant dense<0.000000e+00> : vector<8x384xf32>
    %292 = tpu.matmul %291, %1, %cst_113 {dimension_numbers = #tpu.dot_dimension_numbers<[1], [0], [0], [1], [0, 0, 1, 1], [], []>} : vector<8x128xbf16>, vector<128x384xbf16>, vector<8x384xf32> -> vector<8x384xf32>
    %293 = vector.extract_strided_slice %290 {offsets = [0, 0], sizes = [8, 128], strides = [1, 1]} : vector<8x384xf32> to vector<8x128xf32>
    %294 = vector.extract_strided_slice %292 {offsets = [0, 0], sizes = [8, 128], strides = [1, 1]} : vector<8x384xf32> to vector<8x128xf32>
    %295 = arith.addf %293, %294 : vector<8x128xf32>
    %296 = arith.negf %295 : vector<8x128xf32>
    %297 = math.exp %296 : vector<8x128xf32>
    %cst_114 = arith.constant 1.000000e+00 : f32
    %298 = vector.broadcast %cst_114 : f32 to vector<8x128xf32>
    %299 = arith.addf %298, %297 : vector<8x128xf32>
    %300 = arith.divf %298, %299 : vector<8x128xf32>
    %301 = vector.extract_strided_slice %290 {offsets = [0, 128], sizes = [8, 128], strides = [1, 1]} : vector<8x384xf32> to vector<8x128xf32>
    %302 = vector.extract_strided_slice %292 {offsets = [0, 128], sizes = [8, 128], strides = [1, 1]} : vector<8x384xf32> to vector<8x128xf32>
    %303 = arith.addf %301, %302 : vector<8x128xf32>
    %304 = arith.negf %303 : vector<8x128xf32>
    %305 = math.exp %304 : vector<8x128xf32>
    %cst_115 = arith.constant 1.000000e+00 : f32
    %306 = vector.broadcast %cst_115 : f32 to vector<8x128xf32>
    %307 = arith.addf %306, %305 : vector<8x128xf32>
    %308 = arith.divf %306, %307 : vector<8x128xf32>
    %309 = vector.extract_strided_slice %290 {offsets = [0, 256], sizes = [8, 128], strides = [1, 1]} : vector<8x384xf32> to vector<8x128xf32>
    %310 = vector.extract_strided_slice %292 {offsets = [0, 256], sizes = [8, 128], strides = [1, 1]} : vector<8x384xf32> to vector<8x128xf32>
    %311 = arith.addf %310, %7 : vector<8x128xf32>
    %312 = arith.mulf %300, %311 : vector<8x128xf32>
    %313 = arith.addf %309, %312 : vector<8x128xf32>
    %314 = math.tanh %313 : vector<8x128xf32>
    %cst_116 = arith.constant 1.000000e+00 : f32
    %315 = vector.broadcast %cst_116 : f32 to vector<8x128xf32>
    %316 = arith.subf %315, %308 : vector<8x128xf32>
    %317 = arith.mulf %316, %314 : vector<8x128xf32>
    %318 = arith.mulf %308, %287 : vector<8x128xf32>
    %319 = arith.addf %317, %318 : vector<8x128xf32>
    %320 = vector.broadcast %c4_i32_110 : i32 to vector<8x128xi32>
    %321 = arith.cmpi slt, %320, %10 : vector<8x128xi32>
    %cst_117 = arith.constant 0.000000e+00 : f32
    %322 = vector.broadcast %cst_117 : f32 to vector<8x128xf32>
    %323 = arith.select %321, %319, %322 : vector<8x128xi1>, vector<8x128xf32>
    %324 = arith.truncf %323 : vector<8x128xf32> to vector<8x128xbf16>
    %325 = arith.index_cast %c4_i32_110 : i32 to index
    %c0_118 = arith.constant 0 : index
    %c0_119 = arith.constant 0 : index
    %326 = vector.load %arg8[%325, %c0_118, %c0_119] : memref<12x8x128xbf16, #tpu.memory_space<vmem>>, vector<1x8x128xbf16>
    %327 = vector.shape_cast %326 : vector<1x8x128xbf16> to vector<8x128xbf16>
    %328 = vector.shape_cast %324 : vector<8x128xbf16> to vector<1x8x128xbf16>
    tpu.vector_store %arg8[%325, %c0_118, %c0_119], %328 {strides = array<i32>} : memref<12x8x128xbf16, #tpu.memory_space<vmem>>, vector<1x8x128xbf16>,
    %329 = arith.select %321, %319, %287 : vector<8x128xi1>, vector<8x128xf32>
    %c5_i32_120 = arith.constant 5 : i32
    %330 = arith.index_cast %c5_i32_120 : i32 to index
    %c0_121 = arith.constant 0 : index
    %c0_122 = arith.constant 0 : index
    %331 = vector.load %arg10[%330, %c0_121, %c0_122] : memref<12x8x384xf32, #tpu.memory_space<vmem>>, vector<1x8x384xf32>
    %332 = vector.shape_cast %331 : vector<1x8x384xf32> to vector<8x384xf32>
    %333 = arith.truncf %329 : vector<8x128xf32> to vector<8x128xbf16>
    %cst_123 = arith.constant dense<0.000000e+00> : vector<8x384xf32>
    %334 = tpu.matmul %333, %1, %cst_123 {dimension_numbers = #tpu.dot_dimension_numbers<[1], [0], [0], [1], [0, 0, 1, 1], [], []>} : vector<8x128xbf16>, vector<128x384xbf16>, vector<8x384xf32> -> vector<8x384xf32>
    %335 = vector.extract_strided_slice %332 {offsets = [0, 0], sizes = [8, 128], strides = [1, 1]} : vector<8x384xf32> to vector<8x128xf32>
    %336 = vector.extract_strided_slice %334 {offsets = [0, 0], sizes = [8, 128], strides = [1, 1]} : vector<8x384xf32> to vector<8x128xf32>
    %337 = arith.addf %335, %336 : vector<8x128xf32>
    %338 = arith.negf %337 : vector<8x128xf32>
    %339 = math.exp %338 : vector<8x128xf32>
    %cst_124 = arith.constant 1.000000e+00 : f32
    %340 = vector.broadcast %cst_124 : f32 to vector<8x128xf32>
    %341 = arith.addf %340, %339 : vector<8x128xf32>
    %342 = arith.divf %340, %341 : vector<8x128xf32>
    %343 = vector.extract_strided_slice %332 {offsets = [0, 128], sizes = [8, 128], strides = [1, 1]} : vector<8x384xf32> to vector<8x128xf32>
    %344 = vector.extract_strided_slice %334 {offsets = [0, 128], sizes = [8, 128], strides = [1, 1]} : vector<8x384xf32> to vector<8x128xf32>
    %345 = arith.addf %343, %344 : vector<8x128xf32>
    %346 = arith.negf %345 : vector<8x128xf32>
    %347 = math.exp %346 : vector<8x128xf32>
    %cst_125 = arith.constant 1.000000e+00 : f32
    %348 = vector.broadcast %cst_125 : f32 to vector<8x128xf32>
    %349 = arith.addf %348, %347 : vector<8x128xf32>
    %350 = arith.divf %348, %349 : vector<8x128xf32>
    %351 = vector.extract_strided_slice %332 {offsets = [0, 256], sizes = [8, 128], strides = [1, 1]} : vector<8x384xf32> to vector<8x128xf32>
    %352 = vector.extract_strided_slice %334 {offsets = [0, 256], sizes = [8, 128], strides = [1, 1]} : vector<8x384xf32> to vector<8x128xf32>
    %353 = arith.addf %352, %7 : vector<8x128xf32>
    %354 = arith.mulf %342, %353 : vector<8x128xf32>
    %355 = arith.addf %351, %354 : vector<8x128xf32>
    %356 = math.tanh %355 : vector<8x128xf32>
    %cst_126 = arith.constant 1.000000e+00 : f32
    %357 = vector.broadcast %cst_126 : f32 to vector<8x128xf32>
    %358 = arith.subf %357, %350 : vector<8x128xf32>
    %359 = arith.mulf %358, %356 : vector<8x128xf32>
    %360 = arith.mulf %350, %329 : vector<8x128xf32>
    %361 = arith.addf %359, %360 : vector<8x128xf32>
    %362 = vector.broadcast %c5_i32_120 : i32 to vector<8x128xi32>
    %363 = arith.cmpi slt, %362, %10 : vector<8x128xi32>
    %cst_127 = arith.constant 0.000000e+00 : f32
    %364 = vector.broadcast %cst_127 : f32 to vector<8x128xf32>
    %365 = arith.select %363, %361, %364 : vector<8x128xi1>, vector<8x128xf32>
    %366 = arith.truncf %365 : vector<8x128xf32> to vector<8x128xbf16>
    %367 = arith.index_cast %c5_i32_120 : i32 to index
    %c0_128 = arith.constant 0 : index
    %c0_129 = arith.constant 0 : index
    %368 = vector.load %arg8[%367, %c0_128, %c0_129] : memref<12x8x128xbf16, #tpu.memory_space<vmem>>, vector<1x8x128xbf16>
    %369 = vector.shape_cast %368 : vector<1x8x128xbf16> to vector<8x128xbf16>
    %370 = vector.shape_cast %366 : vector<8x128xbf16> to vector<1x8x128xbf16>
    tpu.vector_store %arg8[%367, %c0_128, %c0_129], %370 {strides = array<i32>} : memref<12x8x128xbf16, #tpu.memory_space<vmem>>, vector<1x8x128xbf16>,
    %371 = arith.select %363, %361, %329 : vector<8x128xi1>, vector<8x128xf32>
    %c6_i32_130 = arith.constant 6 : i32
    %372 = arith.index_cast %c6_i32_130 : i32 to index
    %c0_131 = arith.constant 0 : index
    %c0_132 = arith.constant 0 : index
    %373 = vector.load %arg10[%372, %c0_131, %c0_132] : memref<12x8x384xf32, #tpu.memory_space<vmem>>, vector<1x8x384xf32>
    %374 = vector.shape_cast %373 : vector<1x8x384xf32> to vector<8x384xf32>
    %375 = arith.truncf %371 : vector<8x128xf32> to vector<8x128xbf16>
    %cst_133 = arith.constant dense<0.000000e+00> : vector<8x384xf32>
    %376 = tpu.matmul %375, %1, %cst_133 {dimension_numbers = #tpu.dot_dimension_numbers<[1], [0], [0], [1], [0, 0, 1, 1], [], []>} : vector<8x128xbf16>, vector<128x384xbf16>, vector<8x384xf32> -> vector<8x384xf32>
    %377 = vector.extract_strided_slice %374 {offsets = [0, 0], sizes = [8, 128], strides = [1, 1]} : vector<8x384xf32> to vector<8x128xf32>
    %378 = vector.extract_strided_slice %376 {offsets = [0, 0], sizes = [8, 128], strides = [1, 1]} : vector<8x384xf32> to vector<8x128xf32>
    %379 = arith.addf %377, %378 : vector<8x128xf32>
    %380 = arith.negf %379 : vector<8x128xf32>
    %381 = math.exp %380 : vector<8x128xf32>
    %cst_134 = arith.constant 1.000000e+00 : f32
    %382 = vector.broadcast %cst_134 : f32 to vector<8x128xf32>
    %383 = arith.addf %382, %381 : vector<8x128xf32>
    %384 = arith.divf %382, %383 : vector<8x128xf32>
    %385 = vector.extract_strided_slice %374 {offsets = [0, 128], sizes = [8, 128], strides = [1, 1]} : vector<8x384xf32> to vector<8x128xf32>
    %386 = vector.extract_strided_slice %376 {offsets = [0, 128], sizes = [8, 128], strides = [1, 1]} : vector<8x384xf32> to vector<8x128xf32>
    %387 = arith.addf %385, %386 : vector<8x128xf32>
    %388 = arith.negf %387 : vector<8x128xf32>
    %389 = math.exp %388 : vector<8x128xf32>
    %cst_135 = arith.constant 1.000000e+00 : f32
    %390 = vector.broadcast %cst_135 : f32 to vector<8x128xf32>
    %391 = arith.addf %390, %389 : vector<8x128xf32>
    %392 = arith.divf %390, %391 : vector<8x128xf32>
    %393 = vector.extract_strided_slice %374 {offsets = [0, 256], sizes = [8, 128], strides = [1, 1]} : vector<8x384xf32> to vector<8x128xf32>
    %394 = vector.extract_strided_slice %376 {offsets = [0, 256], sizes = [8, 128], strides = [1, 1]} : vector<8x384xf32> to vector<8x128xf32>
    %395 = arith.addf %394, %7 : vector<8x128xf32>
    %396 = arith.mulf %384, %395 : vector<8x128xf32>
    %397 = arith.addf %393, %396 : vector<8x128xf32>
    %398 = math.tanh %397 : vector<8x128xf32>
    %cst_136 = arith.constant 1.000000e+00 : f32
    %399 = vector.broadcast %cst_136 : f32 to vector<8x128xf32>
    %400 = arith.subf %399, %392 : vector<8x128xf32>
    %401 = arith.mulf %400, %398 : vector<8x128xf32>
    %402 = arith.mulf %392, %371 : vector<8x128xf32>
    %403 = arith.addf %401, %402 : vector<8x128xf32>
    %404 = vector.broadcast %c6_i32_130 : i32 to vector<8x128xi32>
    %405 = arith.cmpi slt, %404, %10 : vector<8x128xi32>
    %cst_137 = arith.constant 0.000000e+00 : f32
    %406 = vector.broadcast %cst_137 : f32 to vector<8x128xf32>
    %407 = arith.select %405, %403, %406 : vector<8x128xi1>, vector<8x128xf32>
    %408 = arith.truncf %407 : vector<8x128xf32> to vector<8x128xbf16>
    %409 = arith.index_cast %c6_i32_130 : i32 to index
    %c0_138 = arith.constant 0 : index
    %c0_139 = arith.constant 0 : index
    %410 = vector.load %arg8[%409, %c0_138, %c0_139] : memref<12x8x128xbf16, #tpu.memory_space<vmem>>, vector<1x8x128xbf16>
    %411 = vector.shape_cast %410 : vector<1x8x128xbf16> to vector<8x128xbf16>
    %412 = vector.shape_cast %408 : vector<8x128xbf16> to vector<1x8x128xbf16>
    tpu.vector_store %arg8[%409, %c0_138, %c0_139], %412 {strides = array<i32>} : memref<12x8x128xbf16, #tpu.memory_space<vmem>>, vector<1x8x128xbf16>,
    %413 = arith.select %405, %403, %371 : vector<8x128xi1>, vector<8x128xf32>
    %c7_i32_140 = arith.constant 7 : i32
    %414 = arith.index_cast %c7_i32_140 : i32 to index
    %c0_141 = arith.constant 0 : index
    %c0_142 = arith.constant 0 : index
    %415 = vector.load %arg10[%414, %c0_141, %c0_142] : memref<12x8x384xf32, #tpu.memory_space<vmem>>, vector<1x8x384xf32>
    %416 = vector.shape_cast %415 : vector<1x8x384xf32> to vector<8x384xf32>
    %417 = arith.truncf %413 : vector<8x128xf32> to vector<8x128xbf16>
    %cst_143 = arith.constant dense<0.000000e+00> : vector<8x384xf32>
    %418 = tpu.matmul %417, %1, %cst_143 {dimension_numbers = #tpu.dot_dimension_numbers<[1], [0], [0], [1], [0, 0, 1, 1], [], []>} : vector<8x128xbf16>, vector<128x384xbf16>, vector<8x384xf32> -> vector<8x384xf32>
    %419 = vector.extract_strided_slice %416 {offsets = [0, 0], sizes = [8, 128], strides = [1, 1]} : vector<8x384xf32> to vector<8x128xf32>
    %420 = vector.extract_strided_slice %418 {offsets = [0, 0], sizes = [8, 128], strides = [1, 1]} : vector<8x384xf32> to vector<8x128xf32>
    %421 = arith.addf %419, %420 : vector<8x128xf32>
    %422 = arith.negf %421 : vector<8x128xf32>
    %423 = math.exp %422 : vector<8x128xf32>
    %cst_144 = arith.constant 1.000000e+00 : f32
    %424 = vector.broadcast %cst_144 : f32 to vector<8x128xf32>
    %425 = arith.addf %424, %423 : vector<8x128xf32>
    %426 = arith.divf %424, %425 : vector<8x128xf32>
    %427 = vector.extract_strided_slice %416 {offsets = [0, 128], sizes = [8, 128], strides = [1, 1]} : vector<8x384xf32> to vector<8x128xf32>
    %428 = vector.extract_strided_slice %418 {offsets = [0, 128], sizes = [8, 128], strides = [1, 1]} : vector<8x384xf32> to vector<8x128xf32>
    %429 = arith.addf %427, %428 : vector<8x128xf32>
    %430 = arith.negf %429 : vector<8x128xf32>
    %431 = math.exp %430 : vector<8x128xf32>
    %cst_145 = arith.constant 1.000000e+00 : f32
    %432 = vector.broadcast %cst_145 : f32 to vector<8x128xf32>
    %433 = arith.addf %432, %431 : vector<8x128xf32>
    %434 = arith.divf %432, %433 : vector<8x128xf32>
    %435 = vector.extract_strided_slice %416 {offsets = [0, 256], sizes = [8, 128], strides = [1, 1]} : vector<8x384xf32> to vector<8x128xf32>
    %436 = vector.extract_strided_slice %418 {offsets = [0, 256], sizes = [8, 128], strides = [1, 1]} : vector<8x384xf32> to vector<8x128xf32>
    %437 = arith.addf %436, %7 : vector<8x128xf32>
    %438 = arith.mulf %426, %437 : vector<8x128xf32>
    %439 = arith.addf %435, %438 : vector<8x128xf32>
    %440 = math.tanh %439 : vector<8x128xf32>
    %cst_146 = arith.constant 1.000000e+00 : f32
    %441 = vector.broadcast %cst_146 : f32 to vector<8x128xf32>
    %442 = arith.subf %441, %434 : vector<8x128xf32>
    %443 = arith.mulf %442, %440 : vector<8x128xf32>
    %444 = arith.mulf %434, %413 : vector<8x128xf32>
    %445 = arith.addf %443, %444 : vector<8x128xf32>
    %446 = vector.broadcast %c7_i32_140 : i32 to vector<8x128xi32>
    %447 = arith.cmpi slt, %446, %10 : vector<8x128xi32>
    %cst_147 = arith.constant 0.000000e+00 : f32
    %448 = vector.broadcast %cst_147 : f32 to vector<8x128xf32>
    %449 = arith.select %447, %445, %448 : vector<8x128xi1>, vector<8x128xf32>
    %450 = arith.truncf %449 : vector<8x128xf32> to vector<8x128xbf16>
    %451 = arith.index_cast %c7_i32_140 : i32 to index
    %c0_148 = arith.constant 0 : index
    %c0_149 = arith.constant 0 : index
    %452 = vector.load %arg8[%451, %c0_148, %c0_149] : memref<12x8x128xbf16, #tpu.memory_space<vmem>>, vector<1x8x128xbf16>
    %453 = vector.shape_cast %452 : vector<1x8x128xbf16> to vector<8x128xbf16>
    %454 = vector.shape_cast %450 : vector<8x128xbf16> to vector<1x8x128xbf16>
    tpu.vector_store %arg8[%451, %c0_148, %c0_149], %454 {strides = array<i32>} : memref<12x8x128xbf16, #tpu.memory_space<vmem>>, vector<1x8x128xbf16>,
    %455 = arith.select %447, %445, %413 : vector<8x128xi1>, vector<8x128xf32>
    %c8_i32_150 = arith.constant 8 : i32
    %456 = arith.index_cast %c8_i32_150 : i32 to index
    %c0_151 = arith.constant 0 : index
    %c0_152 = arith.constant 0 : index
    %457 = vector.load %arg10[%456, %c0_151, %c0_152] : memref<12x8x384xf32, #tpu.memory_space<vmem>>, vector<1x8x384xf32>
    %458 = vector.shape_cast %457 : vector<1x8x384xf32> to vector<8x384xf32>
    %459 = arith.truncf %455 : vector<8x128xf32> to vector<8x128xbf16>
    %cst_153 = arith.constant dense<0.000000e+00> : vector<8x384xf32>
    %460 = tpu.matmul %459, %1, %cst_153 {dimension_numbers = #tpu.dot_dimension_numbers<[1], [0], [0], [1], [0, 0, 1, 1], [], []>} : vector<8x128xbf16>, vector<128x384xbf16>, vector<8x384xf32> -> vector<8x384xf32>
    %461 = vector.extract_strided_slice %458 {offsets = [0, 0], sizes = [8, 128], strides = [1, 1]} : vector<8x384xf32> to vector<8x128xf32>
    %462 = vector.extract_strided_slice %460 {offsets = [0, 0], sizes = [8, 128], strides = [1, 1]} : vector<8x384xf32> to vector<8x128xf32>
    %463 = arith.addf %461, %462 : vector<8x128xf32>
    %464 = arith.negf %463 : vector<8x128xf32>
    %465 = math.exp %464 : vector<8x128xf32>
    %cst_154 = arith.constant 1.000000e+00 : f32
    %466 = vector.broadcast %cst_154 : f32 to vector<8x128xf32>
    %467 = arith.addf %466, %465 : vector<8x128xf32>
    %468 = arith.divf %466, %467 : vector<8x128xf32>
    %469 = vector.extract_strided_slice %458 {offsets = [0, 128], sizes = [8, 128], strides = [1, 1]} : vector<8x384xf32> to vector<8x128xf32>
    %470 = vector.extract_strided_slice %460 {offsets = [0, 128], sizes = [8, 128], strides = [1, 1]} : vector<8x384xf32> to vector<8x128xf32>
    %471 = arith.addf %469, %470 : vector<8x128xf32>
    %472 = arith.negf %471 : vector<8x128xf32>
    %473 = math.exp %472 : vector<8x128xf32>
    %cst_155 = arith.constant 1.000000e+00 : f32
    %474 = vector.broadcast %cst_155 : f32 to vector<8x128xf32>
    %475 = arith.addf %474, %473 : vector<8x128xf32>
    %476 = arith.divf %474, %475 : vector<8x128xf32>
    %477 = vector.extract_strided_slice %458 {offsets = [0, 256], sizes = [8, 128], strides = [1, 1]} : vector<8x384xf32> to vector<8x128xf32>
    %478 = vector.extract_strided_slice %460 {offsets = [0, 256], sizes = [8, 128], strides = [1, 1]} : vector<8x384xf32> to vector<8x128xf32>
    %479 = arith.addf %478, %7 : vector<8x128xf32>
    %480 = arith.mulf %468, %479 : vector<8x128xf32>
    %481 = arith.addf %477, %480 : vector<8x128xf32>
    %482 = math.tanh %481 : vector<8x128xf32>
    %cst_156 = arith.constant 1.000000e+00 : f32
    %483 = vector.broadcast %cst_156 : f32 to vector<8x128xf32>
    %484 = arith.subf %483, %476 : vector<8x128xf32>
    %485 = arith.mulf %484, %482 : vector<8x128xf32>
    %486 = arith.mulf %476, %455 : vector<8x128xf32>
    %487 = arith.addf %485, %486 : vector<8x128xf32>
    %488 = vector.broadcast %c8_i32_150 : i32 to vector<8x128xi32>
    %489 = arith.cmpi slt, %488, %10 : vector<8x128xi32>
    %cst_157 = arith.constant 0.000000e+00 : f32
    %490 = vector.broadcast %cst_157 : f32 to vector<8x128xf32>
    %491 = arith.select %489, %487, %490 : vector<8x128xi1>, vector<8x128xf32>
    %492 = arith.truncf %491 : vector<8x128xf32> to vector<8x128xbf16>
    %493 = arith.index_cast %c8_i32_150 : i32 to index
    %c0_158 = arith.constant 0 : index
    %c0_159 = arith.constant 0 : index
    %494 = vector.load %arg8[%493, %c0_158, %c0_159] : memref<12x8x128xbf16, #tpu.memory_space<vmem>>, vector<1x8x128xbf16>
    %495 = vector.shape_cast %494 : vector<1x8x128xbf16> to vector<8x128xbf16>
    %496 = vector.shape_cast %492 : vector<8x128xbf16> to vector<1x8x128xbf16>
    tpu.vector_store %arg8[%493, %c0_158, %c0_159], %496 {strides = array<i32>} : memref<12x8x128xbf16, #tpu.memory_space<vmem>>, vector<1x8x128xbf16>,
    %497 = arith.select %489, %487, %455 : vector<8x128xi1>, vector<8x128xf32>
    %c9_i32_160 = arith.constant 9 : i32
    %498 = arith.index_cast %c9_i32_160 : i32 to index
    %c0_161 = arith.constant 0 : index
    %c0_162 = arith.constant 0 : index
    %499 = vector.load %arg10[%498, %c0_161, %c0_162] : memref<12x8x384xf32, #tpu.memory_space<vmem>>, vector<1x8x384xf32>
    %500 = vector.shape_cast %499 : vector<1x8x384xf32> to vector<8x384xf32>
    %501 = arith.truncf %497 : vector<8x128xf32> to vector<8x128xbf16>
    %cst_163 = arith.constant dense<0.000000e+00> : vector<8x384xf32>
    %502 = tpu.matmul %501, %1, %cst_163 {dimension_numbers = #tpu.dot_dimension_numbers<[1], [0], [0], [1], [0, 0, 1, 1], [], []>} : vector<8x128xbf16>, vector<128x384xbf16>, vector<8x384xf32> -> vector<8x384xf32>
    %503 = vector.extract_strided_slice %500 {offsets = [0, 0], sizes = [8, 128], strides = [1, 1]} : vector<8x384xf32> to vector<8x128xf32>
    %504 = vector.extract_strided_slice %502 {offsets = [0, 0], sizes = [8, 128], strides = [1, 1]} : vector<8x384xf32> to vector<8x128xf32>
    %505 = arith.addf %503, %504 : vector<8x128xf32>
    %506 = arith.negf %505 : vector<8x128xf32>
    %507 = math.exp %506 : vector<8x128xf32>
    %cst_164 = arith.constant 1.000000e+00 : f32
    %508 = vector.broadcast %cst_164 : f32 to vector<8x128xf32>
    %509 = arith.addf %508, %507 : vector<8x128xf32>
    %510 = arith.divf %508, %509 : vector<8x128xf32>
    %511 = vector.extract_strided_slice %500 {offsets = [0, 128], sizes = [8, 128], strides = [1, 1]} : vector<8x384xf32> to vector<8x128xf32>
    %512 = vector.extract_strided_slice %502 {offsets = [0, 128], sizes = [8, 128], strides = [1, 1]} : vector<8x384xf32> to vector<8x128xf32>
    %513 = arith.addf %511, %512 : vector<8x128xf32>
    %514 = arith.negf %513 : vector<8x128xf32>
    %515 = math.exp %514 : vector<8x128xf32>
    %cst_165 = arith.constant 1.000000e+00 : f32
    %516 = vector.broadcast %cst_165 : f32 to vector<8x128xf32>
    %517 = arith.addf %516, %515 : vector<8x128xf32>
    %518 = arith.divf %516, %517 : vector<8x128xf32>
    %519 = vector.extract_strided_slice %500 {offsets = [0, 256], sizes = [8, 128], strides = [1, 1]} : vector<8x384xf32> to vector<8x128xf32>
    %520 = vector.extract_strided_slice %502 {offsets = [0, 256], sizes = [8, 128], strides = [1, 1]} : vector<8x384xf32> to vector<8x128xf32>
    %521 = arith.addf %520, %7 : vector<8x128xf32>
    %522 = arith.mulf %510, %521 : vector<8x128xf32>
    %523 = arith.addf %519, %522 : vector<8x128xf32>
    %524 = math.tanh %523 : vector<8x128xf32>
    %cst_166 = arith.constant 1.000000e+00 : f32
    %525 = vector.broadcast %cst_166 : f32 to vector<8x128xf32>
    %526 = arith.subf %525, %518 : vector<8x128xf32>
    %527 = arith.mulf %526, %524 : vector<8x128xf32>
    %528 = arith.mulf %518, %497 : vector<8x128xf32>
    %529 = arith.addf %527, %528 : vector<8x128xf32>
    %530 = vector.broadcast %c9_i32_160 : i32 to vector<8x128xi32>
    %531 = arith.cmpi slt, %530, %10 : vector<8x128xi32>
    %cst_167 = arith.constant 0.000000e+00 : f32
    %532 = vector.broadcast %cst_167 : f32 to vector<8x128xf32>
    %533 = arith.select %531, %529, %532 : vector<8x128xi1>, vector<8x128xf32>
    %534 = arith.truncf %533 : vector<8x128xf32> to vector<8x128xbf16>
    %535 = arith.index_cast %c9_i32_160 : i32 to index
    %c0_168 = arith.constant 0 : index
    %c0_169 = arith.constant 0 : index
    %536 = vector.load %arg8[%535, %c0_168, %c0_169] : memref<12x8x128xbf16, #tpu.memory_space<vmem>>, vector<1x8x128xbf16>
    %537 = vector.shape_cast %536 : vector<1x8x128xbf16> to vector<8x128xbf16>
    %538 = vector.shape_cast %534 : vector<8x128xbf16> to vector<1x8x128xbf16>
    tpu.vector_store %arg8[%535, %c0_168, %c0_169], %538 {strides = array<i32>} : memref<12x8x128xbf16, #tpu.memory_space<vmem>>, vector<1x8x128xbf16>,
    %539 = arith.select %531, %529, %497 : vector<8x128xi1>, vector<8x128xf32>
    %c10_i32_170 = arith.constant 10 : i32
    %540 = arith.index_cast %c10_i32_170 : i32 to index
    %c0_171 = arith.constant 0 : index
    %c0_172 = arith.constant 0 : index
    %541 = vector.load %arg10[%540, %c0_171, %c0_172] : memref<12x8x384xf32, #tpu.memory_space<vmem>>, vector<1x8x384xf32>
    %542 = vector.shape_cast %541 : vector<1x8x384xf32> to vector<8x384xf32>
    %543 = arith.truncf %539 : vector<8x128xf32> to vector<8x128xbf16>
    %cst_173 = arith.constant dense<0.000000e+00> : vector<8x384xf32>
    %544 = tpu.matmul %543, %1, %cst_173 {dimension_numbers = #tpu.dot_dimension_numbers<[1], [0], [0], [1], [0, 0, 1, 1], [], []>} : vector<8x128xbf16>, vector<128x384xbf16>, vector<8x384xf32> -> vector<8x384xf32>
    %545 = vector.extract_strided_slice %542 {offsets = [0, 0], sizes = [8, 128], strides = [1, 1]} : vector<8x384xf32> to vector<8x128xf32>
    %546 = vector.extract_strided_slice %544 {offsets = [0, 0], sizes = [8, 128], strides = [1, 1]} : vector<8x384xf32> to vector<8x128xf32>
    %547 = arith.addf %545, %546 : vector<8x128xf32>
    %548 = arith.negf %547 : vector<8x128xf32>
    %549 = math.exp %548 : vector<8x128xf32>
    %cst_174 = arith.constant 1.000000e+00 : f32
    %550 = vector.broadcast %cst_174 : f32 to vector<8x128xf32>
    %551 = arith.addf %550, %549 : vector<8x128xf32>
    %552 = arith.divf %550, %551 : vector<8x128xf32>
    %553 = vector.extract_strided_slice %542 {offsets = [0, 128], sizes = [8, 128], strides = [1, 1]} : vector<8x384xf32> to vector<8x128xf32>
    %554 = vector.extract_strided_slice %544 {offsets = [0, 128], sizes = [8, 128], strides = [1, 1]} : vector<8x384xf32> to vector<8x128xf32>
    %555 = arith.addf %553, %554 : vector<8x128xf32>
    %556 = arith.negf %555 : vector<8x128xf32>
    %557 = math.exp %556 : vector<8x128xf32>
    %cst_175 = arith.constant 1.000000e+00 : f32
    %558 = vector.broadcast %cst_175 : f32 to vector<8x128xf32>
    %559 = arith.addf %558, %557 : vector<8x128xf32>
    %560 = arith.divf %558, %559 : vector<8x128xf32>
    %561 = vector.extract_strided_slice %542 {offsets = [0, 256], sizes = [8, 128], strides = [1, 1]} : vector<8x384xf32> to vector<8x128xf32>
    %562 = vector.extract_strided_slice %544 {offsets = [0, 256], sizes = [8, 128], strides = [1, 1]} : vector<8x384xf32> to vector<8x128xf32>
    %563 = arith.addf %562, %7 : vector<8x128xf32>
    %564 = arith.mulf %552, %563 : vector<8x128xf32>
    %565 = arith.addf %561, %564 : vector<8x128xf32>
    %566 = math.tanh %565 : vector<8x128xf32>
    %cst_176 = arith.constant 1.000000e+00 : f32
    %567 = vector.broadcast %cst_176 : f32 to vector<8x128xf32>
    %568 = arith.subf %567, %560 : vector<8x128xf32>
    %569 = arith.mulf %568, %566 : vector<8x128xf32>
    %570 = arith.mulf %560, %539 : vector<8x128xf32>
    %571 = arith.addf %569, %570 : vector<8x128xf32>
    %572 = vector.broadcast %c10_i32_170 : i32 to vector<8x128xi32>
    %573 = arith.cmpi slt, %572, %10 : vector<8x128xi32>
    %cst_177 = arith.constant 0.000000e+00 : f32
    %574 = vector.broadcast %cst_177 : f32 to vector<8x128xf32>
    %575 = arith.select %573, %571, %574 : vector<8x128xi1>, vector<8x128xf32>
    %576 = arith.truncf %575 : vector<8x128xf32> to vector<8x128xbf16>
    %577 = arith.index_cast %c10_i32_170 : i32 to index
    %c0_178 = arith.constant 0 : index
    %c0_179 = arith.constant 0 : index
    %578 = vector.load %arg8[%577, %c0_178, %c0_179] : memref<12x8x128xbf16, #tpu.memory_space<vmem>>, vector<1x8x128xbf16>
    %579 = vector.shape_cast %578 : vector<1x8x128xbf16> to vector<8x128xbf16>
    %580 = vector.shape_cast %576 : vector<8x128xbf16> to vector<1x8x128xbf16>
    tpu.vector_store %arg8[%577, %c0_178, %c0_179], %580 {strides = array<i32>} : memref<12x8x128xbf16, #tpu.memory_space<vmem>>, vector<1x8x128xbf16>,
    %581 = arith.select %573, %571, %539 : vector<8x128xi1>, vector<8x128xf32>
    %c11_i32_180 = arith.constant 11 : i32
    %582 = arith.index_cast %c11_i32_180 : i32 to index
    %c0_181 = arith.constant 0 : index
    %c0_182 = arith.constant 0 : index
    %583 = vector.load %arg10[%582, %c0_181, %c0_182] : memref<12x8x384xf32, #tpu.memory_space<vmem>>, vector<1x8x384xf32>
    %584 = vector.shape_cast %583 : vector<1x8x384xf32> to vector<8x384xf32>
    %585 = arith.truncf %581 : vector<8x128xf32> to vector<8x128xbf16>
    %cst_183 = arith.constant dense<0.000000e+00> : vector<8x384xf32>
    %586 = tpu.matmul %585, %1, %cst_183 {dimension_numbers = #tpu.dot_dimension_numbers<[1], [0], [0], [1], [0, 0, 1, 1], [], []>} : vector<8x128xbf16>, vector<128x384xbf16>, vector<8x384xf32> -> vector<8x384xf32>
    %587 = vector.extract_strided_slice %584 {offsets = [0, 0], sizes = [8, 128], strides = [1, 1]} : vector<8x384xf32> to vector<8x128xf32>
    %588 = vector.extract_strided_slice %586 {offsets = [0, 0], sizes = [8, 128], strides = [1, 1]} : vector<8x384xf32> to vector<8x128xf32>
    %589 = arith.addf %587, %588 : vector<8x128xf32>
    %590 = arith.negf %589 : vector<8x128xf32>
    %591 = math.exp %590 : vector<8x128xf32>
    %cst_184 = arith.constant 1.000000e+00 : f32
    %592 = vector.broadcast %cst_184 : f32 to vector<8x128xf32>
    %593 = arith.addf %592, %591 : vector<8x128xf32>
    %594 = arith.divf %592, %593 : vector<8x128xf32>
    %595 = vector.extract_strided_slice %584 {offsets = [0, 128], sizes = [8, 128], strides = [1, 1]} : vector<8x384xf32> to vector<8x128xf32>
    %596 = vector.extract_strided_slice %586 {offsets = [0, 128], sizes = [8, 128], strides = [1, 1]} : vector<8x384xf32> to vector<8x128xf32>
    %597 = arith.addf %595, %596 : vector<8x128xf32>
    %598 = arith.negf %597 : vector<8x128xf32>
    %599 = math.exp %598 : vector<8x128xf32>
    %cst_185 = arith.constant 1.000000e+00 : f32
    %600 = vector.broadcast %cst_185 : f32 to vector<8x128xf32>
    %601 = arith.addf %600, %599 : vector<8x128xf32>
    %602 = arith.divf %600, %601 : vector<8x128xf32>
    %603 = vector.extract_strided_slice %584 {offsets = [0, 256], sizes = [8, 128], strides = [1, 1]} : vector<8x384xf32> to vector<8x128xf32>
    %604 = vector.extract_strided_slice %586 {offsets = [0, 256], sizes = [8, 128], strides = [1, 1]} : vector<8x384xf32> to vector<8x128xf32>
    %605 = arith.addf %604, %7 : vector<8x128xf32>
    %606 = arith.mulf %594, %605 : vector<8x128xf32>
    %607 = arith.addf %603, %606 : vector<8x128xf32>
    %608 = math.tanh %607 : vector<8x128xf32>
    %cst_186 = arith.constant 1.000000e+00 : f32
    %609 = vector.broadcast %cst_186 : f32 to vector<8x128xf32>
    %610 = arith.subf %609, %602 : vector<8x128xf32>
    %611 = arith.mulf %610, %608 : vector<8x128xf32>
    %612 = arith.mulf %602, %581 : vector<8x128xf32>
    %613 = arith.addf %611, %612 : vector<8x128xf32>
    %614 = vector.broadcast %c11_i32_180 : i32 to vector<8x128xi32>
    %615 = arith.cmpi slt, %614, %10 : vector<8x128xi32>
    %cst_187 = arith.constant 0.000000e+00 : f32
    %616 = vector.broadcast %cst_187 : f32 to vector<8x128xf32>
    %617 = arith.select %615, %613, %616 : vector<8x128xi1>, vector<8x128xf32>
    %618 = arith.truncf %617 : vector<8x128xf32> to vector<8x128xbf16>
    %619 = arith.index_cast %c11_i32_180 : i32 to index
    %c0_188 = arith.constant 0 : index
    %c0_189 = arith.constant 0 : index
    %620 = vector.load %arg8[%619, %c0_188, %c0_189] : memref<12x8x128xbf16, #tpu.memory_space<vmem>>, vector<1x8x128xbf16>
    %621 = vector.shape_cast %620 : vector<1x8x128xbf16> to vector<8x128xbf16>
    %622 = vector.shape_cast %618 : vector<8x128xbf16> to vector<1x8x128xbf16>
    tpu.vector_store %arg8[%619, %c0_188, %c0_189], %622 {strides = array<i32>} : memref<12x8x128xbf16, #tpu.memory_space<vmem>>, vector<1x8x128xbf16>,
    %623 = arith.select %615, %613, %581 : vector<8x128xi1>, vector<8x128xf32>
    %c12_i32_190 = arith.constant 12 : i32
    %c0_191 = arith.constant 0 : index
    %c0_192 = arith.constant 0 : index
    %624 = vector.load %arg9[%c0_191, %c0_192] : memref<8x128xf32, #tpu.memory_space<vmem>>, vector<8x128xf32>
    tpu.vector_store %arg9[%c0_191, %c0_192], %623 {strides = array<i32>} : memref<8x128xf32, #tpu.memory_space<vmem>>, vector<8x128xf32>,
    return
  }
  func.func @transform_0(%arg0: i32) -> (i32, i32, i32) {
    %c0_i32 = arith.constant 0 : i32
    %c0_i32_0 = arith.constant 0 : i32
    %c0_i32_1 = arith.constant 0 : i32
    return %c0_i32, %arg0, %c0_i32_0 : i32, i32, i32
  }
  func.func @transform_1(%arg0: i32) -> (i32, i32) {
    %c0_i32 = arith.constant 0 : i32
    %c0_i32_0 = arith.constant 0 : i32
    %c0_i32_1 = arith.constant 0 : i32
    return %c0_i32, %c0_i32_0 : i32, i32
  }
  func.func @transform_2(%arg0: i32) -> (i32, i32) {
    %c0_i32 = arith.constant 0 : i32
    %c0_i32_0 = arith.constant 0 : i32
    %c0_i32_1 = arith.constant 0 : i32
    return %c0_i32, %c0_i32_0 : i32, i32
  }
  func.func @transform_3(%arg0: i32) -> (i32, i32) {
    %c0_i32 = arith.constant 0 : i32
    %c0_i32_0 = arith.constant 0 : i32
    %c0_i32_1 = arith.constant 0 : i32
    return %c0_i32, %c0_i32_0 : i32, i32
  }
  func.func @transform_4(%arg0: i32) -> (i32, i32) {
    %c0_i32 = arith.constant 0 : i32
    %c0_i32_0 = arith.constant 0 : i32
    %c0_i32_1 = arith.constant 0 : i32
    return %c0_i32, %c0_i32_0 : i32, i32
  }
  func.func @transform_5(%arg0: i32) -> (i32, i32) {
    %c0_i32 = arith.constant 0 : i32
    %c0_i32_0 = arith.constant 0 : i32
    return %arg0, %c0_i32 : i32, i32
  }
  func.func @transform_6(%arg0: i32) -> (i32, i32) {
    %c0_i32 = arith.constant 0 : i32
    %c0_i32_0 = arith.constant 0 : i32
    return %arg0, %c0_i32 : i32, i32
  }
  func.func @transform_7(%arg0: i32) -> (i32, i32, i32) {
    %c0_i32 = arith.constant 0 : i32
    %c0_i32_0 = arith.constant 0 : i32
    %c0_i32_1 = arith.constant 0 : i32
    return %c0_i32, %arg0, %c0_i32_0 : i32, i32, i32
  }
  func.func @transform_8(%arg0: i32) -> (i32, i32) {
    %c0_i32 = arith.constant 0 : i32
    %c0_i32_0 = arith.constant 0 : i32
    return %arg0, %c0_i32 : i32, i32
  }
}

</mosaic_0001>

<bundles_post_ra>
// kernel: _decoder_core.3
= control target key start
LH: loop header
LB: loop body
LE: loop exit
PB: predicated region body
PF: predicated region fallthrough
CT: control target
= control target key end

     0   :  { %8 = vsyncpa [#allocation3], 0  ;;  %s1306_s0 = inlined_call_operand.hbm [shape: bf16[96,128], index: 0, kind: input, shape index: {}]   ;;  %s1307_s1 = inlined_call_operand.hbm [shape: bf16[128,512], index: 1, kind: input, shape index: {}]   ;;  %s1308_s2 = inlined_call_operand.hbm [shape: f32[1,512], index: 2, kind: input, shape index: {}]   ;;  %s1309_s3 = inlined_call_operand.hbm [shape: f32[96,512], index: 3, kind: output, shape index: {}]  }
   0x1   :  { %9 = vsyncpa [#allocation6], 0 }
   0x2   :  { %11 = vsyncpa [#allocation6 + $0x1], 0 }
   0x3   :  { %12 = vsyncpa [#allocation4], 0 }
   0x4   :  { %14 = vsyncpa [#allocation4 + $0x1], 0  ;;  %s989_s12 = smov 0   ;;  %s991_s13 = smov 0  }
   0x5   :  { %s993_s14 = smov 0   ;;  %s995_s15 = smov 0  }
   0x6 LB: > { %s1010_s16 = sadd.s32 1, %s954_s15   ;;  %s48_s17 = sadd.s32 1, %s950_s14  ;;  %s954_s15 = sphi %s995_s15, %s1336_s15   ;;  %s950_s14 = sphi %s993_s14, %s1335_s14   ;;  %s946_s13 = sphi %s991_s13, %s1334_s13   ;;  %s942_s12 = sphi %s989_s12, %s1333_s12  }
   0x7   : > { %s45_s18 = ssub.s32 %s954_s15, %s1010_s16  ;;  %p55_p0 = scmp.ne.s32.totalorder %s950_s14, %s946_s13 }
   0x8   : > { %p46_p1 = scmp.eq.s32.totalorder %s45_s18, 0  ;;  %p56_p2 = scmp.eq.s32.totalorder %s954_s15, 0 }
   0x9   : > { %p721_p4 = scmp.lt.s32.totalorder %s954_s15, 2  ;;  %s150_s20 = sand.u32 1, %s954_s15  }
   0xa   : > { %s1021_s19 = scalar_select %p46_p1, %s950_s14, %s48_s17  }
   0xb   : > { %p57_p5 = por %p56_p2, %p55_p0  ;;  %s152_s21 = sand.u32 1, %s950_s14  }
   0xc   : > { %s639_s22 = sshll.u32 %s152_s21, 7  ;;  %s675_s23 = sshll.u32 %s954_s15, 7 }
   0xd   : > { %s1034_s26 = scalar_lea.hbm %s1307_s1, %s675_s23  ;;  %s154_s27 = scalar_lea.vmem [#allocation5], %s639_s22 }
   0xe   : > { %s161_s28 = sshll.u32 %s154_s27, 4  ;;  %p1036_p6 = pnand %p721_p4, %p57_p5  ;;  %s1040_s28 = int_to_ptr.vmem [resolvable:$true] %s161_s28 }
   0xf   : > { %s1042_s30 = scalar_lea.sflag [#allocation6], %s150_s20  ;;  %s796_s4 = scalar_lea.hbm %s1034_s26, 2048 }
  0x10   : > { %s1317_s29 = scalar_select %p1036_p6, 1, 0 }
  0x11   : > { %p797_p7 = scmp.ne.s32.totalorder %s1034_s26, %s796_s4  ;;  %p1311_p8 = pneg %p1036_p6 }
  0x12   : > { %s801_s7 = scalar_lea.hbm %s1307_s1, 4096  ;;  %p802_p11 = scmp.lt.u32.totalorder %s1034_s26, %s1307_s1 }
  0x13   : > { %p799_p9 = pnand %p1311_p8, %p797_p7  ;;  %p803_p12 = scmp.lt.u32.totalorder %s801_s7, %s796_s4 }
  0x14   : > { %p805_p1 = scmp.lt.u32.totalorder %s796_s4, %s1034_s26 }
  0x15   : > { %p800_p10 = pneg %p799_p9  ;;  %p804_p13 = por %p803_p12, %p802_p11 }
  0x17   : > { %p806_p2 = por %p805_p1, %p804_p13 }
  0x19   : > { %p807_p4 = pnand %p806_p2, %p800_p10 }
  0x1b   : > { %810 = shalt.err (!%p807_p4)
}
  0x1c   : > { %s811_s10 = scalar_lea.vmem %s1040_s28, 2048  ;;  %s956_s11 = smov [#allocation5]  }
  0x1d   : > { %p812_p5 = scmp.ne.s32.totalorder %s1040_s28, %s811_s10  ;;  %s816_s17 = sshll.u32 %s956_s11, 4  ;;  %s817_s17 = int_to_ptr.vmem [resolvable:$false] %s816_s17 }
  0x1e   : > { %s818_s18 = scalar_lea.vmem %s817_s17, 4096  ;;  %p819_p3 = scmp.lt.s32.totalorder %s1040_s28, %s817_s17 }
  0x1f   : > { %p814_p7 = pnand %p812_p5, %p1311_p8  ;;  %p820_p11 = scmp.lt.s32.totalorder %s818_s18, %s811_s10 }
  0x21   : > { %p815_p9 = pneg %p814_p7  ;;  %p821_p12 = por %p820_p11, %p819_p3 }
  0x23   : > { %p822_p13 = pnand %p821_p12, %p815_p9 }
  0x25   : > { %825 = shalt.err (!%p822_p13)
}
  0x26   : > { %s957_s20 = smov 256   ;;  %s958_s22 = smov 128  }
  0x27   : > { %s959_s23 = smov 8   ;;  %s1071_s24 = sadd.s32 4294967295, %s954_s15  }
  0x28   : > { %712 = dma.hbm_to_vmem [thread:$0]  (!%p1036_p6), %s1034_s26, 2048, %s1040_s28, %s1042_s30, %s957_s20, %s958_s22, %s959_s23  }
  0x29   : > { %s635_s25 = sadd.s32 4294967294, %s954_s15   ;;  %p61_p3 = scmp.ne.s32.totalorder %s946_s13, %s942_s12 }
  0x2a   : > { %p1310_p10 = scmp.eq.s32.totalorder %s1071_s24, 0  ;;  %p111_p1 = scmp.eq.s32.totalorder %s1071_s24, 1 }
  0x2b   : > { %p117_p2 = scmp.eq.s32.totalorder %s635_s25, 1  ;;  %p636_p4 = scmp.ge.s32.totalorder %s954_s15, 1 }
  0x2c   : > { %p1081_p5 = por %p1310_p10, %p61_p3  ;;  %p1088_p7 = por %p111_p1, %p55_p0 }
  0x2d   : > { %p1092_p9 = por %p117_p2, %p61_p3  ;;  %p124_p11 = scmp.lt.s32.totalorder %s954_s15, 3 }
  0x2e   : > { %s1318_s27 = scalar_select %p1081_p5, 1, 0 }
  0x2f   : > { %s1319_s26 = scalar_select %p1088_p7, 1, 0 }
  0x30   : > { %s1320_s28 = scalar_select %p1092_p9, 1, 0 }
  0x31   : > { %p1097_p12 = pnand %p636_p4, %p124_p11  ;;  %s960_s5 = smov [#allocation2]  }
  0x32   : > { %s136_s6 = sshll.u32 %s960_s5, 4  ;;  %s642_s7 = sshll.u32 %s152_s21, 1  ;;  %s1101_s6 = int_to_ptr.vmem [resolvable:$true] %s136_s6 }
  0x33   : > { %s1321_s4 = scalar_select %p1097_p12, 1, 0 }
  0x34   : > { %p705_p13 = pneg %p1097_p12  ;;  %s676_s8 = sshll.u32 %s954_s15, 5 }
  0x35   : > { %s1117_s17 = scalar_lea.hbm %s1308_s2, %s676_s8  ;;  %s175_s18 = scalar_lea.vmem [#allocation7], %s642_s7 }
  0x36   : > { %p1110_p0 = pnand %p705_p13, %p1310_p10  ;;  %s183_s20 = sshll.u32 %s175_s18, 4  ;;  %s1119_s20 = int_to_ptr.vmem [resolvable:$true] %s183_s20 }
  0x37   : > { %s826_s21 = scalar_lea.hbm %s1306_s0, 768 }
  0x38   : > { %p827_p3 = scmp.ne.s32.totalorder %s1306_s0, %s826_s21  ;;  %p828_p1 = pneg %p1110_p0 }
  0x39   : > { %p833_p11 = scmp.lt.u32.totalorder %s826_s21, %s1306_s0 }
  0x3a   : > { %p829_p2 = pnand %p828_p1, %p827_p3 }
  0x3c   : > { %p830_p4 = pneg %p829_p2 }
  0x3e   : > { %p835_p13 = pnand %p833_p11, %p830_p4 }
  0x40   : > { %838 = shalt.err (!%p835_p13)
}
  0x41   : > { %s839_s7 = scalar_lea.vmem %s1101_s6, 768  ;;  %p847_p7 = scmp.lt.s32.totalorder %s1101_s6, %s1101_s6 }
  0x42   : > { %p840_p10 = scmp.ne.s32.totalorder %s1101_s6, %s839_s7  ;;  %p848_p5 = scmp.lt.s32.totalorder %s839_s7, %s839_s7 }
  0x44   : > { %p842_p8 = pnand %p840_p10, %p828_p1  ;;  %p849_p12 = por %p848_p5, %p847_p7 }
  0x46   : > { %p843_p9 = pneg %p842_p8 }
  0x48   : > { %p850_p6 = pnand %p849_p12, %p843_p9 }
  0x4a   : > { %853 = shalt.err (!%p850_p6)
}
  0x4b   : > { %s961_s8 = smov 64   ;;  %s962_s18 = smov 4  }
  0x4c   : > { %708 = dma.hbm_to_vmem [thread:$0]  (!%p1110_p0), %s1306_s0, 768, %s1101_s6, [#allocation3], %s961_s8, %s961_s8, %s962_s18  }
  0x4d   : > { %s854_s21 = scalar_lea.hbm %s1117_s17, 32  ;;  %p1323_p10 = scmp.ne.s32.totalorder %s1317_s29, 0 }
  0x4e   : > { %p855_p8 = scmp.ne.s32.totalorder %s1117_s17, %s854_s21  ;;  %s859_s10 = scalar_lea.hbm %s1308_s2, 64 }
  0x4f   : > { %p1324_p5 = pneg %p1323_p10  ;;  %p860_p9 = scmp.lt.u32.totalorder %s1117_s17, %s1308_s2 }
  0x50   : > { %p861_p12 = scmp.lt.u32.totalorder %s859_s10, %s854_s21  ;;  %p863_p1 = scmp.lt.u32.totalorder %s854_s21, %s1117_s17 }
  0x51   : > { %p857_p7 = pnand %p855_p8, %p1324_p5 }
  0x52   : > { %p862_p3 = por %p861_p12, %p860_p9 }
  0x53   : > { %p858_p6 = pneg %p857_p7 }
  0x54   : > { %p864_p2 = por %p863_p1, %p862_p3 }
  0x56   : > { %p865_p4 = pnand %p864_p2, %p858_p6 }
  0x58   : > { %868 = shalt.err (!%p865_p4)
}
  0x59   : > { %s869_s6 = scalar_lea.vmem %s1119_s20, 32  ;;  %p1325_p11 = pmov %p1324_p5 }
  0x5a   : > { %p870_p0 = scmp.ne.s32.totalorder %s1119_s20, %s869_s6  ;;  %s963_s9 = smov [#allocation7]  }
  0x5b   : > { %s874_s8 = sshll.u32 %s963_s9, 4  ;;  %s875_s8 = int_to_ptr.vmem [resolvable:$false] %s874_s8 }
  0x5c   : > { %p872_p13 = pnand %p870_p0, %p1325_p11  ;;  %s876_s18 = scalar_lea.vmem %s875_s8, 64 }
  0x5d   : > { %p877_p5 = scmp.lt.s32.totalorder %s1119_s20, %s875_s8  ;;  %p878_p7 = scmp.lt.s32.totalorder %s876_s18, %s869_s6 }
  0x5e   : > { %p873_p8 = pneg %p872_p13 }
  0x5f   : > { %p879_p9 = por %p878_p7, %p877_p5 }
  0x61   : > { %p880_p12 = pnand %p879_p9, %p873_p8 }
  0x63   : > { %883 = shalt.err (!%p880_p12)
}
  0x64   : > { %715 = dma.hbm_to_vmem [thread:$0]  (!%p1323_p10), %s1117_s17, 32, %s1119_s20, %s1042_s30  }
  0x65   : > { %p1326_p6 = scmp.ne.s32.totalorder %s1321_s4, 0 }
  0x66   : > { %p1327_p3 = scmp.eq.s32.totalorder (!%p1326_p6), %s1071_s24, 0 }
  0x67   : > { %192 = sbr.rel (%p1326_p6) target bundleno = 399 (0x18f), region = 32 }
  0x6e   : > { %929 = dma.done.wait (%p1327_p3), [#allocation3], 768   ;;  %p1328_p1 = pmov %p1327_p3 }
  0x6f   : > { %s198_s22 = sand.u32 1, %s1071_s24   ;;  %s1174_s23 = sand.u32 1, %s946_s13  }
  0x70   : > { %931 = vsyncadd (%p1328_p1), [#allocation3], 4294966528  ;;  %s647_s29 = sshll.u32 %s1174_s23, 7  ;;  %s199_s21 = scalar_lea.sflag [#allocation6], %s198_s22 }
  0x71   : > { %s1177_s25 = scalar_lea.vmem [#allocation5], %s647_s29  ;;  %p1329_p10 = scmp.ne.s32.totalorder %s1318_s27, 0 }
  0x73   : > { %933 = dma.done.wait (%p1329_p10), %s199_s21, 2080  }
  0x74   : > { %935 = vsyncadd (%p1329_p10), %s199_s21, 4294965216  ;;  %v964_v0 = vmov 0   ;;  %v766_v1 = vld [vmem:[%s1177_s25 + $0x4] ss:$8 sps:$4 sm:$0xff]   ;;  %v768_v2 = vld [vmem:[%s1177_s25] ss:$8 sps:$4 sm:$0xff]   ;;  %v273_v23 = vlaneseq }
  0x75   : > { %431 = vmatprep.mubr.bf16.mxu0 %v964_v0  ;;  %461 = vmatprep.mubr.bf16.mxu1 %v964_v0  ;;  %v769_v3 = vld [vmem:[%s1177_s25 + $0x14] ss:$8 sps:$4 sm:$0xff]   ;;  %v771_v4 = vld [vmem:[%s1177_s25 + $0x10] ss:$8 sps:$4 sm:$0xff]   ;;  %v772_v5 = vld [vmem:[%s1177_s25 + $0x24] ss:$8 sps:$4 sm:$0xff]  }
  0x76   : > { %399 = vmatprep.subr.bf16.mxu0 %v766_v1  ;;  %678 = vmatprep.subr.bf16.mxu1 %v766_v1  ;;  %v774_v6 = vld [vmem:[%s1177_s25 + $0x20] ss:$8 sps:$4 sm:$0xff]   ;;  %v775_v7 = vld [vmem:[%s1177_s25 + $0x34] ss:$8 sps:$4 sm:$0xff]   ;;  %v777_v8 = vld [vmem:[%s1177_s25 + $0x30] ss:$8 sps:$4 sm:$0xff]  }
  0x77   : > { %400 = vmatpush1.bf16.msra.mxu0 %v768_v2  ;;  %686 = vmatpush1.bf16.msra.mxu1 %v768_v2  ;;  %v778_v9 = vld [vmem:[%s1177_s25 + $0x44] ss:$8 sps:$4 sm:$0xff]   ;;  %v780_v10 = vld [vmem:[%s1177_s25 + $0x40] ss:$8 sps:$4 sm:$0xff]   ;;  %v781_v11 = vld [vmem:[%s1177_s25 + $0x54] ss:$8 sps:$4 sm:$0xff]  }
  0x78   : > { %401 = vmatprep.subr.bf16.mxu0 %v769_v3  ;;  %679 = vmatprep.subr.bf16.mxu1 %v769_v3  ;;  %v783_v12 = vld [vmem:[%s1177_s25 + $0x50] ss:$8 sps:$4 sm:$0xff]   ;;  %v784_v13 = vld [vmem:[%s1177_s25 + $0x64] ss:$8 sps:$4 sm:$0xff]   ;;  %v786_v14 = vld [vmem:[%s1177_s25 + $0x60] ss:$8 sps:$4 sm:$0xff]  }
  0x79   : > { %v787_v15 = vld [vmem:[%s1177_s25 + $0x74] ss:$8 sps:$4 sm:$0xff]   ;;  %v789_v16 = vld [vmem:[%s1177_s25 + $0x70] ss:$8 sps:$4 sm:$0xff]   ;;  %v791_v18 = vld [vmem:[#allocation2 + $0x18] sm:$0xff]   ;;  %s648_s30 = sshll.u32 %s1174_s23, 1 }
  0x7a   : > { %v790_v17 = vld [vmem:[#allocation2] sm:$0xff]   ;;  %v792_v19 = vld [vmem:[#allocation2 + $0x8] sm:$0xff]   ;;  %v794_v21 = vld [vmem:[#allocation2 + $0x10] sm:$0xff]   ;;  %v274_v24 = vshrl.u32 %v273_v23, 7  ;;  %s211_s27 = scalar_lea.vmem [#allocation7], %s648_s30  ;;  %s694_s4 = smul.u32 192, %s1174_s23 }
  0x7b   : > { %402 = vmatpush1.bf16.msra.mxu0 %v771_v4  ;;  %687 = vmatpush1.bf16.msra.mxu1 %v771_v4  ;;  %v793_v20 = vld [vmem:[#allocation2 + $0x20] sm:$0xff]   ;;  %v795_v22 = vld [vmem:[#allocation2 + $0x28] sm:$0xff]   ;;  %v271_v26 = vld [vmem:[%s211_s27] sm:$0x3]  ;;  %s677_s20 = sshll.u32 %s1071_s24, 8  ;;  %s517_s7 = scalar_lea.sflag [#allocation4], %s1174_s23 }
  0x7c   : > { %403 = vmatprep.subr.bf16.mxu0 %v772_v5  ;;  %680 = vmatprep.subr.bf16.mxu1 %v772_v5  ;;  %v275_v25 = vsub.s32 0, %v274_v24  ;;  %v279_v27 = vsub.s32 1, %v274_v24  ;;  %s1209_s17 = scalar_lea.vmem [#allocation8], %s694_s4  ;;  %s1248_s11 = scalar_lea.hbm %s1309_s3, %s677_s20 }
  0x7d   : > { %s530_s5 = sshll.u32 %s1209_s17, 4  ;;  %p1330_p4 = scmp.ne.s32.totalorder %s1319_s26, 0  ;;  %s1254_s5 = int_to_ptr.vmem [resolvable:$true] %s530_s5 }
  0x7e   : > { %v1201_v28 = vrot.slane %v271_v26, %v275_v25  ;;  %v1203_v29 = vrot.slane %v271_v26, %v279_v27  ;;  %s884_s6 = scalar_lea.vmem %s1254_s5, 3072  ;;  %s965_s9 = smov [#allocation8]  }
  0x7f   : > { %404 = vmatpush1.bf16.msra.mxu0 %v774_v6  ;;  %688 = vmatpush1.bf16.msra.mxu1 %v774_v6  ;;  %p885_p2 = scmp.ne.s32.totalorder %s1254_s5, %s884_s6  ;;  %s888_s8 = sshll.u32 %s965_s9, 4  ;;  %s889_s8 = int_to_ptr.vmem [resolvable:$false] %s888_s8 }
  0x80   : > { %405 = vmatprep.subr.bf16.mxu0 %v775_v7  ;;  %681 = vmatprep.subr.bf16.mxu1 %v775_v7  ;;  %s890_s18 = scalar_lea.vmem %s889_s8, 6144  ;;  %p891_p13 = scmp.lt.s32.totalorder %s1254_s5, %s889_s8 }
  0x81   : > { %p886_p0 = pnand %p885_p2, %p1330_p4  ;;  %p892_p8 = scmp.lt.s32.totalorder %s890_s18, %s884_s6 }
  0x83   : > { %406 = vmatpush1.bf16.msra.mxu0 %v777_v8  ;;  %689 = vmatpush1.bf16.msra.mxu1 %v777_v8  ;;  %p887_p11 = pneg %p886_p0  ;;  %p893_p5 = por %p892_p8, %p891_p13 }
  0x84   : > { %407 = vmatprep.subr.bf16.mxu0 %v778_v9  ;;  %682 = vmatprep.subr.bf16.mxu1 %v778_v9 }
  0x85   : > { %p894_p7 = pnand %p893_p5, %p887_p11 }
  0x87   : > { %408 = vmatpush1.bf16.msra.mxu0 %v780_v10  ;;  %690 = vmatpush1.bf16.msra.mxu1 %v780_v10 }
  0x88   : > { %409 = vmatprep.subr.bf16.mxu0 %v781_v11  ;;  %683 = vmatprep.subr.bf16.mxu1 %v781_v11 }
  0x8b   : > { %410 = vmatpush1.bf16.msra.mxu0 %v783_v12  ;;  %691 = vmatpush1.bf16.msra.mxu1 %v783_v12 }
  0x8c   : > { %411 = vmatprep.subr.bf16.mxu0 %v784_v13  ;;  %684 = vmatprep.subr.bf16.mxu1 %v784_v13 }
  0x8f   : > { %412 = vmatpush1.bf16.msra.mxu0 %v786_v14  ;;  %692 = vmatpush1.bf16.msra.mxu1 %v786_v14 }
  0x90   : > { %413 = vmatprep.subr.bf16.mxu0 %v787_v15  ;;  %685 = vmatprep.subr.bf16.mxu1 %v787_v15 }
  0x93   : > { %414 = vmatpush1.bf16.msra.mxu0 %v789_v16  ;;  %693 = vmatpush1.bf16.msra.mxu1 %v789_v16 }
  0x96   : > { %432 = vmatmul.mubr.bf16.vlgmr.msra.gmra.mrb[0].mxu0 %v790_v17  ;;  %462 = vmatmul.mubr.bf16.vlgmr.msra.gmra.mrb[0].mxu1 %v791_v18 }
  0x97   : > { %441 = vmatprep.mubr.bf16.mxu0 %v964_v0  ;;  %471 = vmatprep.mubr.bf16.mxu1 %v964_v0 }
  0x9e   : > { %442 = vmatmul.mubr.bf16.gmra.mrb[4].mxu0 %v792_v19  ;;  %472 = vmatmul.mubr.bf16.gmra.mrb[4].mxu1 %v793_v20 }
  0x9f   : > { %451 = vmatprep.mubr.bf16.mxu0 %v964_v0  ;;  %481 = vmatprep.mubr.bf16.mxu1 %v964_v0 }
  0xa6   : > { %452 = vmatmul.mubr.bf16.gmra.mrb[8].mxu0 %v794_v21  ;;  %482 = vmatmul.mubr.bf16.gmra.mrb[8].mxu1 %v795_v22 }
 0x169   : > { %v433_v30 = vpop.f32.mrb[0].mxu0  ;;  %v463_v31 = vpop.f32.mrb[0].mxu1 }
 0x16a   : > { %v434_v32 = vadd.f32 %v433_v30, %v1201_v28  ;;  %v464_v33 = vadd.f32 %v463_v31, %v1201_v28  ;;  %v435_v34 = vpop.f32.mrb[1].mxu0  ;;  %v465_v35 = vpop.f32.mrb[1].mxu1 }
 0x16b   : > { %v436_v36 = vadd.f32 %v435_v34, %v1203_v29  ;;  %v466_v37 = vadd.f32 %v465_v35, %v1203_v29  ;;  %v437_v38 = vpop.f32.mrb[2].mxu0  ;;  %v467_v39 = vpop.f32.mrb[2].mxu1 }
 0x16c   : > { %492 = vst [vmem:[%s1209_s17] sm:$0xff] %v434_v32  ;;  %504 = vst [vmem:[%s1209_s17 + $0x60] sm:$0xff] %v464_v33  ;;  %v438_v40 = vadd.f32 %v437_v38, %v1201_v28  ;;  %v468_v41 = vadd.f32 %v467_v39, %v1201_v28  ;;  %v439_v42 = vpop.f32.mrb[3].mxu0  ;;  %v469_v43 = vpop.f32.mrb[3].mxu1 }
 0x16d   : > { %493 = vst [vmem:[%s1209_s17 + $0x8] sm:$0xff] %v436_v36  ;;  %505 = vst [vmem:[%s1209_s17 + $0x68] sm:$0xff] %v466_v37  ;;  %v440_v44 = vadd.f32 %v439_v42, %v1203_v29  ;;  %v470_v45 = vadd.f32 %v469_v43, %v1203_v29 }
 0x16e   : > { %494 = vst [vmem:[%s1209_s17 + $0x10] sm:$0xff] %v438_v40  ;;  %506 = vst [vmem:[%s1209_s17 + $0x70] sm:$0xff] %v468_v41 }
 0x16f   : > { %495 = vst [vmem:[%s1209_s17 + $0x18] sm:$0xff] %v440_v44  ;;  %507 = vst [vmem:[%s1209_s17 + $0x78] sm:$0xff] %v470_v45 }
 0x171   : > { %v443_v46 = vpop.f32.mrb[4].mxu0  ;;  %v473_v47 = vpop.f32.mrb[4].mxu1 }
 0x172   : > { %v444_v48 = vadd.f32 %v443_v46, %v1201_v28  ;;  %v474_v49 = vadd.f32 %v473_v47, %v1201_v28  ;;  %v445_v50 = vpop.f32.mrb[5].mxu0  ;;  %v475_v51 = vpop.f32.mrb[5].mxu1 }
 0x173   : > { %v446_v52 = vadd.f32 %v445_v50, %v1203_v29  ;;  %v476_v53 = vadd.f32 %v475_v51, %v1203_v29  ;;  %v447_v54 = vpop.f32.mrb[6].mxu0  ;;  %v477_v55 = vpop.f32.mrb[6].mxu1 }
 0x174   : > { %496 = vst [vmem:[%s1209_s17 + $0x20] sm:$0xff] %v444_v48  ;;  %508 = vst [vmem:[%s1209_s17 + $0x80] sm:$0xff] %v474_v49  ;;  %v448_v56 = vadd.f32 %v447_v54, %v1201_v28  ;;  %v478_v57 = vadd.f32 %v477_v55, %v1201_v28  ;;  %v449_v58 = vpop.f32.mrb[7].mxu0  ;;  %v479_v59 = vpop.f32.mrb[7].mxu1 }
 0x175   : > { %497 = vst [vmem:[%s1209_s17 + $0x28] sm:$0xff] %v446_v52  ;;  %509 = vst [vmem:[%s1209_s17 + $0x88] sm:$0xff] %v476_v53  ;;  %v450_v60 = vadd.f32 %v449_v58, %v1203_v29  ;;  %v480_v61 = vadd.f32 %v479_v59, %v1203_v29 }
 0x176   : > { %498 = vst [vmem:[%s1209_s17 + $0x30] sm:$0xff] %v448_v56  ;;  %510 = vst [vmem:[%s1209_s17 + $0x90] sm:$0xff] %v478_v57 }
 0x177   : > { %499 = vst [vmem:[%s1209_s17 + $0x38] sm:$0xff] %v450_v60  ;;  %511 = vst [vmem:[%s1209_s17 + $0x98] sm:$0xff] %v480_v61 }
 0x179   : > { %v453_v62 = vpop.f32.mrb[8].mxu0  ;;  %v483_v63 = vpop.f32.mrb[8].mxu1 }
 0x17a   : > { %v454_v0 = vadd.f32 %v453_v62, %v1201_v28  ;;  %v484_v1 = vadd.f32 %v483_v63, %v1201_v28  ;;  %v455_v2 = vpop.f32.mrb[9].mxu0  ;;  %v485_v3 = vpop.f32.mrb[9].mxu1 }
 0x17b   : > { %v456_v4 = vadd.f32 %v455_v2, %v1203_v29  ;;  %v486_v5 = vadd.f32 %v485_v3, %v1203_v29  ;;  %v457_v6 = vpop.f32.mrb[10].mxu0  ;;  %v487_v7 = vpop.f32.mrb[10].mxu1 }
 0x17c   : > { %500 = vst [vmem:[%s1209_s17 + $0x40] sm:$0xff] %v454_v0  ;;  %512 = vst [vmem:[%s1209_s17 + $0xa0] sm:$0xff] %v484_v1  ;;  %v458_v8 = vadd.f32 %v457_v6, %v1201_v28  ;;  %v488_v9 = vadd.f32 %v487_v7, %v1201_v28  ;;  %v459_v10 = vpop.f32.mrb[11].mxu0  ;;  %v489_v11 = vpop.f32.mrb[11].mxu1 }
 0x17d   : > { %501 = vst [vmem:[%s1209_s17 + $0x48] sm:$0xff] %v456_v4  ;;  %513 = vst [vmem:[%s1209_s17 + $0xa8] sm:$0xff] %v486_v5  ;;  %v460_v12 = vadd.f32 %v459_v10, %v1203_v29  ;;  %v490_v13 = vadd.f32 %v489_v11, %v1203_v29 }
 0x17e   : > { %502 = vst [vmem:[%s1209_s17 + $0x50] sm:$0xff] %v458_v8  ;;  %514 = vst [vmem:[%s1209_s17 + $0xb0] sm:$0xff] %v488_v9 }
 0x17f   : > { %503 = vst [vmem:[%s1209_s17 + $0x58] sm:$0xff] %v460_v12  ;;  %515 = vst [vmem:[%s1209_s17 + $0xb8] sm:$0xff] %v490_v13 }
 0x180   : > { %897 = shalt.err (!%p894_p7)
}
 0x181   : > { %s898_s22 = scalar_lea.hbm %s1248_s11, 3072  ;;  %s902_s25 = scalar_lea.hbm %s1309_s3, 6144 }
 0x182   : > { %p899_p9 = scmp.ne.s32.totalorder %s1248_s11, %s898_s22  ;;  %p903_p3 = scmp.lt.u32.totalorder %s1248_s11, %s1309_s3 }
 0x183   : > { %p904_p1 = scmp.lt.u32.totalorder %s902_s25, %s898_s22  ;;  %p906_p2 = scmp.lt.u32.totalorder %s898_s22, %s1248_s11 }
 0x184   : > { %p900_p12 = pnand %p899_p9, %p1330_p4 }
 0x185   : > { %p905_p10 = por %p904_p1, %p903_p3 }
 0x186   : > { %p901_p6 = pneg %p900_p12 }
 0x187   : > { %p907_p0 = por %p906_p2, %p905_p10 }
 0x189   : > { %p908_p11 = pnand %p907_p0, %p901_p6 }
 0x18b   : > { %911 = shalt.err (!%p908_p11)
}
 0x18c   : > { %s966_s4 = smov 256   ;;  %s967_s17 = smov 512  }
 0x18d   : > { %s968_s20 = smov 16  }
 0x18e   : > { %703 = dma.vmem_to_hbm [thread:$0]  (%p1330_p4), %s1254_s5, 3072, %s1248_s11, %s517_s7, %s966_s4, %s967_s17, %s968_s20  }
 0x18f PF: > { %s545_s24 = sand.u32 1, %s942_s12   ;;  %p1331_p13 = scmp.ne.s32.totalorder %s1320_s28, 0 }
 0x190   : > { %p1332_p8 = scmp.ge.s32.totalorder %s954_s15, 2  ;;  %s546_s10 = scalar_lea.sflag [#allocation4], %s545_s24 }
 0x192   : > { %p717_p5 = pnand %p1332_p8, %p1331_p13 }
 0x194   : > { %937 = dma.done.wait (!%p717_p5), %s546_s10, 3072  }
 0x195   : > { %939 = vsyncadd (!%p717_p5), %s546_s10, 4294964224  ;;  %p17_p7 = scmp.ge.s32.totalorder %s1010_s16, 4   ;;  %s1333_s12 = smov %s946_s13 }
 0x196   : > { %s1334_s13 = smov %s950_s14  ;;  %s1335_s14 = smov %s1021_s19 }
 0x197   : > { %s1336_s15 = smov %s1010_s16  ;;  %19 = sbr.rel (!%p17_p7) target bundleno = 6 (0x6), region = 93 }
 0x19e   :  { %551 = vsyncpa [#allocation3], 1 }
 0x19f   :  { %553 = vsyncpa [#allocation3 + $0x1], 1 }
 0x1a0   :  { %554 = vsyncpa [#allocation6], 1 }
 0x1a1   :  { %556 = vsyncpa [#allocation6 + $0x1], 1 }
 0x1a2   :  { %557 = vsyncpa [#allocation4], 1 }
 0x1a3   :  { %559 = vsyncpa [#allocation4 + $0x1], 1 }

// kernel: _decoder_core.2
= control target key start
LH: loop header
LB: loop body
LE: loop exit
PB: predicated region body
PF: predicated region fallthrough
CT: control target
= control target key end

     0   :  { %14 = vsyncpa [#allocation4], 0  ;;  %s5523_s0 = inlined_call_operand.hbm [shape: bf16[12,8,128], index: 0, kind: input, shape index: {}]   ;;  %s5524_s1 = inlined_call_operand.hbm [shape: bf16[128,384], index: 1, kind: input, shape index: {}]   ;;  %s5525_s2 = inlined_call_operand.hbm [shape: bf16[128,384], index: 2, kind: input, shape index: {}]   ;;  %s5526_s3 = inlined_call_operand.hbm [shape: f32[1,384], index: 3, kind: input, shape index: {}]   ;;  %s5527_s4 = inlined_call_operand.hbm [shape: f32[1,128], index: 4, kind: input, shape index: {}]   ;;  %s5528_s5 = inlined_call_operand.hbm [shape: f32[8,128], index: 5, kind: input, shape index: {}]   ;;  %s5529_s6 = inlined_call_operand.hbm [shape: s32[8,1], index: 6, kind: input, shape index: {}]   ;;  %s5530_s7 = inlined_call_operand.hbm [shape: bf16[12,8,128], index: 7, kind: output, shape index: {0}]   ;;  %s5531_s8 = inlined_call_operand.hbm [shape: f32[8,128], index: 8, kind: output, shape index: {1}]  }
   0x1   :  { %15 = vsyncpa [#allocation7], 0 }
   0x2   :  { %16 = vsyncpa [#allocation10], 0 }
   0x3   :  { %17 = vsyncpa [#allocation13], 0 }
   0x4   :  { %18 = vsyncpa [#allocation5], 0 }
   0x5   :  { %19 = vsyncpa [#allocation17], 0  ;;  %s4176_s27 = smov [#allocation6]   ;;  %s3966_s9 = scalar_lea.hbm %s5524_s1, 3072 }
   0x6   :  { %s37_s28 = sshll.u32 %s4176_s27, 4  ;;  %p3967_p0 = scmp.ne.s32.totalorder %s5524_s1, %s3966_s9  ;;  %s38_s28 = int_to_ptr.vmem [resolvable:$true] %s37_s28 }
   0x7   :  { %p3970_p1 = scmp.lt.u32.totalorder %s3966_s9, %s5524_s1 }
   0x9   :  { %p3972_p2 = pnand %p3970_p1, %p3967_p0 }
   0xb   :  { %3975 = shalt.err (!%p3972_p2)
}
   0xc   :  { %s3976_s14 = scalar_lea.vmem %s38_s28, 3072  ;;  %p3981_p4 = scmp.lt.s32.totalorder %s38_s28, %s38_s28 }
   0xd   :  { %p3977_p3 = scmp.ne.s32.totalorder %s38_s28, %s3976_s14  ;;  %p3982_p5 = scmp.lt.s32.totalorder %s3976_s14, %s3976_s14 }
   0xf   :  { %p3983_p6 = por %p3982_p5, %p3981_p4 }
  0x11   :  { %p3984_p7 = pnand %p3983_p6, %p3977_p3 }
  0x13   :  { %3987 = shalt.err (!%p3984_p7)
}
  0x14   :  { %s4177_s15 = smov 192   ;;  %s4178_s16 = smov 12  }
  0x15   :  { %43 = dma.hbm_to_vmem [thread:$0]  %s5524_s1, 3072, %s38_s28, [#allocation7], %s4177_s15, %s4177_s15, %s4178_s16  }
  0x16   :  { %s4179_s19 = smov [#allocation9]   ;;  %s4180_s21 = smov [#allocation12]  }
  0x17   :  { %s62_s20 = sshll.u32 %s4179_s19, 4  ;;  %s82_s22 = sshll.u32 %s4180_s21, 4  ;;  %s63_s20 = int_to_ptr.vmem [resolvable:$true] %s62_s20  ;;  %s83_s22 = int_to_ptr.vmem [resolvable:$true] %s82_s22 }
  0x18   :  { %s3988_s25 = scalar_lea.hbm %s5526_s3, 48 }
  0x19   :  { %p3989_p8 = scmp.ne.s32.totalorder %s5526_s3, %s3988_s25  ;;  %p3992_p9 = scmp.lt.u32.totalorder %s3988_s25, %s5526_s3 }
  0x1b   :  { %p3994_p10 = pnand %p3992_p9, %p3989_p8 }
  0x1d   :  { %3997 = shalt.err (!%p3994_p10)
}
  0x1e   :  { %s3998_s1 = scalar_lea.vmem %s63_s20, 48  ;;  %s4002_s28 = scalar_lea.vmem %s63_s20, 64 }
  0x1f   :  { %p3999_p11 = scmp.ne.s32.totalorder %s63_s20, %s3998_s1  ;;  %p4003_p12 = scmp.lt.s32.totalorder %s63_s20, %s63_s20 }
  0x20   :  { %p4004_p13 = scmp.lt.s32.totalorder %s4002_s28, %s3998_s1 }
  0x22   :  { %p4005_p0 = por %p4004_p13, %p4003_p12 }
  0x24   :  { %p4006_p1 = pnand %p4005_p0, %p3999_p11 }
  0x26   :  { %4009 = shalt.err (!%p4006_p1)
}
  0x27   :  { %65 = dma.hbm_to_vmem [thread:$0]  %s5526_s3, 48, %s63_s20, [#allocation10]  }
  0x28   :  { %s4010_s13 = scalar_lea.hbm %s5528_s5, 128 }
  0x29   :  { %p4011_p2 = scmp.ne.s32.totalorder %s5528_s5, %s4010_s13  ;;  %p4014_p3 = scmp.lt.u32.totalorder %s4010_s13, %s5528_s5 }
  0x2b   :  { %p4016_p4 = pnand %p4014_p3, %p4011_p2 }
  0x2d   :  { %4019 = shalt.err (!%p4016_p4)
}
  0x2e   :  { %s4020_s21 = scalar_lea.vmem %s83_s22, 128  ;;  %p4025_p6 = scmp.lt.s32.totalorder %s83_s22, %s83_s22 }
  0x2f   :  { %p4021_p5 = scmp.ne.s32.totalorder %s83_s22, %s4020_s21  ;;  %p4026_p7 = scmp.lt.s32.totalorder %s4020_s21, %s4020_s21 }
  0x31   :  { %p4027_p8 = por %p4026_p7, %p4025_p6 }
  0x33   :  { %p4028_p9 = pnand %p4027_p8, %p4021_p5 }
  0x35   :  { %4031 = shalt.err (!%p4028_p9)
}
  0x36   :  { %85 = dma.hbm_to_vmem [thread:$0]  %s5528_s5, 128, %s83_s22, [#allocation13]  }
  0x37   :  { %s4181_s23 = smov [#allocation3]   ;;  %s4032_s27 = scalar_lea.hbm %s5523_s0, 768 }
  0x38   :  { %s25_s24 = sshll.u32 %s4181_s23, 4  ;;  %p4033_p10 = scmp.ne.s32.totalorder %s5523_s0, %s4032_s27  ;;  %s26_s24 = int_to_ptr.vmem [resolvable:$true] %s25_s24 }
  0x39   :  { %p4036_p11 = scmp.lt.u32.totalorder %s4032_s27, %s5523_s0 }
  0x3b   :  { %p4038_p12 = pnand %p4036_p11, %p4033_p10 }
  0x3d   :  { %4041 = shalt.err (!%p4038_p12)
}
  0x3e   :  { %s4042_s9 = scalar_lea.vmem %s26_s24, 768  ;;  %p4047_p0 = scmp.lt.s32.totalorder %s26_s24, %s26_s24 }
  0x3f   :  { %p4043_p13 = scmp.ne.s32.totalorder %s26_s24, %s4042_s9  ;;  %p4048_p1 = scmp.lt.s32.totalorder %s4042_s9, %s4042_s9 }
  0x41   :  { %p4049_p2 = por %p4048_p1, %p4047_p0 }
  0x43   :  { %p4050_p3 = pnand %p4049_p2, %p4043_p13 }
  0x45   :  { %4053 = shalt.err (!%p4050_p3)
}
  0x46   :  { %s4182_s5 = smov 64   ;;  %s4183_s22 = smov 4  }
  0x47   :  { %31 = dma.hbm_to_vmem [thread:$0]  %s5523_s0, 768, %s26_s24, [#allocation4], %s4182_s5, %s4182_s5, %s4183_s22  }
  0x48   :  { %s4184_s12 = smov [#allocation8]   ;;  %s4185_s14 = smov [#allocation11]  }
  0x49   :  { %s49_s13 = sshll.u32 %s4184_s12, 4  ;;  %s72_s17 = sshll.u32 %s4185_s14, 4  ;;  %s50_s13 = int_to_ptr.vmem [resolvable:$true] %s49_s13  ;;  %s73_s17 = int_to_ptr.vmem [resolvable:$true] %s72_s17 }
  0x4a   :  { %s4054_s21 = scalar_lea.hbm %s5525_s2, 3072 }
  0x4b   :  { %p4055_p4 = scmp.ne.s32.totalorder %s5525_s2, %s4054_s21  ;;  %p4058_p5 = scmp.lt.u32.totalorder %s4054_s21, %s5525_s2 }
  0x4d   :  { %p4060_p6 = pnand %p4058_p5, %p4055_p4 }
  0x4f   :  { %4063 = shalt.err (!%p4060_p6)
}
  0x50   :  { %s4064_s0 = scalar_lea.vmem %s50_s13, 3072  ;;  %p4069_p8 = scmp.lt.s32.totalorder %s50_s13, %s50_s13 }
  0x51   :  { %p4065_p7 = scmp.ne.s32.totalorder %s50_s13, %s4064_s0  ;;  %p4070_p9 = scmp.lt.s32.totalorder %s4064_s0, %s4064_s0 }
  0x53   :  { %p4071_p10 = por %p4070_p9, %p4069_p8 }
  0x55   :  { %p4072_p11 = pnand %p4071_p10, %p4065_p7 }
  0x57   :  { %4075 = shalt.err (!%p4072_p11)
}
  0x58   :  { %55 = dma.hbm_to_vmem [thread:$0]  %s5525_s2, 3072, %s50_s13, [#allocation7], %s4177_s15, %s4177_s15, %s4178_s16  }
  0x59   :  { %s4076_s30 = scalar_lea.hbm %s5527_s4, 16 }
  0x5a   :  { %p4077_p12 = scmp.ne.s32.totalorder %s5527_s4, %s4076_s30  ;;  %p4080_p13 = scmp.lt.u32.totalorder %s4076_s30, %s5527_s4 }
  0x5c   :  { %p4082_p0 = pnand %p4080_p13, %p4077_p12 }
  0x5e   :  { %4085 = shalt.err (!%p4082_p0)
}
  0x5f   :  { %s4086_s11 = scalar_lea.vmem %s73_s17, 16  ;;  %s4090_s12 = scalar_lea.vmem %s73_s17, 32 }
  0x60   :  { %p4087_p1 = scmp.ne.s32.totalorder %s73_s17, %s4086_s11  ;;  %p4091_p2 = scmp.lt.s32.totalorder %s73_s17, %s73_s17 }
  0x61   :  { %p4092_p3 = scmp.lt.s32.totalorder %s4090_s12, %s4086_s11 }
  0x63   :  { %p4093_p4 = por %p4092_p3, %p4091_p2 }
  0x65   :  { %p4094_p5 = pnand %p4093_p4, %p4087_p1 }
  0x67   :  { %4097 = shalt.err (!%p4094_p5)
}
  0x68   :  { %75 = dma.hbm_to_vmem [thread:$0]  %s5527_s4, 16, %s73_s17, [#allocation10]  }
  0x69   :  { %s4186_s16 = smov [#allocation14]   ;;  %s4098_s19 = scalar_lea.hbm %s5529_s6, 128 }
  0x6a   :  { %s92_s13 = sshll.u32 %s4186_s16, 4  ;;  %p4099_p6 = scmp.ne.s32.totalorder %s5529_s6, %s4098_s19  ;;  %s93_s13 = int_to_ptr.vmem [resolvable:$true] %s92_s13 }
  0x6b   :  { %p4102_p7 = scmp.lt.u32.totalorder %s4098_s19, %s5529_s6 }
  0x6d   :  { %p4104_p8 = pnand %p4102_p7, %p4099_p6 }
  0x6f   :  { %4107 = shalt.err (!%p4104_p8)
}
  0x70   :  { %s4108_s25 = scalar_lea.vmem %s93_s13, 128  ;;  %p4113_p10 = scmp.lt.s32.totalorder %s93_s13, %s93_s13 }
  0x71   :  { %p4109_p9 = scmp.ne.s32.totalorder %s93_s13, %s4108_s25  ;;  %p4114_p11 = scmp.lt.s32.totalorder %s4108_s25, %s4108_s25 }
  0x73   :  { %p4115_p12 = por %p4114_p11, %p4113_p10 }
  0x75   :  { %p4116_p13 = pnand %p4115_p12, %p4109_p9 }
  0x77   :  { %4119 = shalt.err (!%p4116_p13)
}
  0x78   :  { %95 = dma.hbm_to_vmem [thread:$0]  %s5529_s6, 128, %s93_s13, [#allocation13]  }
  0x79   :  { %4164 = dma.done.wait [#allocation4], 768  }
  0x7a   :  { %4165 = vsyncadd [#allocation4], 4294966528 }
  0x7b   :  { %4166 = dma.done.wait [#allocation7], 6144  }
  0x7c   :  { %4167 = vsyncadd [#allocation7], 4294961152 }
  0x7d   :  { %4168 = dma.done.wait [#allocation10], 64  }
  0x7e   :  { %4169 = vsyncadd [#allocation10], 4294967232 }
  0x7f   :  { %4170 = dma.done.wait [#allocation13], 256  }
  0x80   :  { %4171 = vsyncadd [#allocation13], 4294967040  ;;  %v4187_v0 = vmov 0.0   ;;  %v4188_v1 = vmov 0   ;;  %vm4189_vm0 = vmmov 0   ;;  %v206_v61 = vld [vmem:[#allocation14] sm:$0xff] }
  0x81   :  { %3188 = vmatprep.subr.bf16.mxu1 %v4187_v0  ;;  %371 = vmatprep.mubr.bf16.mxu0 %v4188_v1  ;;  %v4335_v2 = vld [vmem:[#allocation6 + $0x4] ss:$12 sps:$4 sm:$0xff]   ;;  %v4337_v3 = vld [vmem:[#allocation6] ss:$12 sps:$4 sm:$0xff]   ;;  %v4340_v4 = vld [vmem:[#allocation6 + $0x1c] ss:$12 sps:$4 sm:$0xff]  }
  0x82   :  { %3204 = vmatprep.mubr.msk.bf16.mxu1 %vm4189_vm0, %v4187_v0  ;;  %3756 = vset.pattern.permute.xlu0 %v4188_v1  ;;  %v4343_v5 = vld [vmem:[#allocation6 + $0x18] ss:$12 sps:$4 sm:$0xff]   ;;  %v4346_v6 = vld [vmem:[#allocation6 + $0x34] ss:$12 sps:$4 sm:$0xff]   ;;  %v4349_v7 = vld [vmem:[#allocation6 + $0x30] ss:$12 sps:$4 sm:$0xff]  }
  0x83   :  { %339 = vmatprep.subr.bf16.mxu0 %v4335_v2  ;;  %v4352_v8 = vld [vmem:[#allocation6 + $0x4c] ss:$12 sps:$4 sm:$0xff]   ;;  %v4354_v9 = vld [vmem:[#allocation6 + $0x8] ss:$12 sps:$4 sm:$0xff]   ;;  %v4361_v11 = vld [vmem:[#allocation6 + $0x64] ss:$12 sps:$4 sm:$0xff]   ;;  %208 = vperm.xlu0 %3756, %v206_v61  }
  0x84   :  { %340 = vmatpush1.bf16.msra.mxu0 %v4337_v3  ;;  %v4357_v10 = vld [vmem:[#allocation6 + $0x48] ss:$12 sps:$4 sm:$0xff]   ;;  %3189 = vmatpush3.bf16.msra.mxu1 %v4354_v9  ;;  %v4364_v12 = vld [vmem:[#allocation6 + $0x20] ss:$12 sps:$4 sm:$0xff]   ;;  %v4370_v14 = vld [vmem:[#allocation6 + $0x38] ss:$12 sps:$4 sm:$0xff]  }
  0x85   :  { %341 = vmatprep.subr.bf16.mxu0 %v4340_v4  ;;  %3190 = vmatprep.subr.bf16.mxu1 %v4187_v0  ;;  %v4366_v13 = vld [vmem:[#allocation6 + $0x60] ss:$12 sps:$4 sm:$0xff]   ;;  %v4373_v15 = vld [vmem:[#allocation6 + $0x7c] ss:$12 sps:$4 sm:$0xff]   ;;  %v4377_v16 = vld [vmem:[#allocation6 + $0x78] ss:$12 sps:$4 sm:$0xff]  }
  0x86   :  { %v4379_v17 = vld [vmem:[#allocation6 + $0x94] ss:$12 sps:$4 sm:$0xff]   ;;  %v4382_v18 = vld [vmem:[#allocation6 + $0x50] ss:$12 sps:$4 sm:$0xff]   ;;  %v4390_v21 = vld [vmem:[#allocation6 + $0xac] ss:$12 sps:$4 sm:$0xff]  }
  0x87   :  { %v4386_v19 = vld [vmem:[#allocation6 + $0x90] ss:$12 sps:$4 sm:$0xff]   ;;  %v4388_v20 = vld [vmem:[#allocation6 + $0x68] ss:$12 sps:$4 sm:$0xff]   ;;  %v4398_v23 = vld [vmem:[#allocation6 + $0x80] ss:$12 sps:$4 sm:$0xff]  }
  0x88   :  { %342 = vmatpush1.bf16.msra.mxu0 %v4343_v5  ;;  %3191 = vmatpush3.bf16.msra.mxu1 %v4364_v12  ;;  %v4396_v22 = vld [vmem:[#allocation6 + $0xa8] ss:$12 sps:$4 sm:$0xff]   ;;  %v210_v24 = vld [vmem:[#allocation3] sm:$0xf]  ;;  %v4406_v25 = vld [vmem:[#allocation6 + $0x98] ss:$12 sps:$4 sm:$0xff]  }
  0x89   :  { %343 = vmatprep.subr.bf16.mxu0 %v4346_v6  ;;  %3192 = vmatprep.subr.bf16.mxu1 %v4187_v0  ;;  %v4412_v26 = vld [vmem:[#allocation6 + $0xb0] ss:$12 sps:$4 sm:$0xff]   ;;  %v424_v27 = vld [vmem:[#allocation3 + $0x4] sm:$0xf]  ;;  %v511_v28 = vld [vmem:[#allocation3 + $0x8] sm:$0xf] }
  0x8a   :  { %v598_v29 = vld [vmem:[#allocation3 + $0xc] sm:$0xf]  ;;  %v685_v30 = vld [vmem:[#allocation3 + $0x10] sm:$0xf]  ;;  %v772_v31 = vld [vmem:[#allocation3 + $0x14] sm:$0xf] }
  0x8b   :  { %v859_v32 = vld [vmem:[#allocation3 + $0x18] sm:$0xf]  ;;  %v946_v35 = vld [vmem:[#allocation3 + $0x1c] sm:$0xf]  ;;  %v1033_v40 = vld [vmem:[#allocation3 + $0x20] sm:$0xf] }
  0x8c   :  { %344 = vmatpush1.bf16.msra.mxu0 %v4349_v7  ;;  %3193 = vmatpush3.bf16.msra.mxu1 %v4370_v14  ;;  %v1120_v45 = vld [vmem:[#allocation3 + $0x24] sm:$0xf]  ;;  %v1207_v50 = vld [vmem:[#allocation3 + $0x28] sm:$0xf]  ;;  %v4800_v53 = vld [vmem:[#allocation8 + $0x4] ss:$12 sps:$4 sm:$0xff]  }
  0x8d   :  { %345 = vmatprep.subr.bf16.mxu0 %v4352_v8  ;;  %3194 = vmatprep.subr.bf16.mxu1 %v4187_v0  ;;  %v1294_v56 = vld [vmem:[#allocation3 + $0x2c] sm:$0xf]  ;;  %v4806_v57 = vld [vmem:[#allocation8] ss:$12 sps:$4 sm:$0xff]   ;;  %v4814_v62 = vld [vmem:[#allocation8 + $0x18] ss:$12 sps:$4 sm:$0xff]  }
  0x8e   :  { %v4810_v59 = vld [vmem:[#allocation8 + $0x1c] ss:$12 sps:$4 sm:$0xff]   ;;  %v4818_v63 = vld [vmem:[#allocation8 + $0x34] ss:$12 sps:$4 sm:$0xff]   ;;  %s4190_s6 = smov [#allocation16]   ;;  %s4191_s24 = smov [#allocation15]  }
  0x8f   :  { %s2883_s0 = sshll.u32 %s4190_s6, 4  ;;  %s2870_s26 = sshll.u32 %s4191_s24, 4  ;;  %s2884_s0 = int_to_ptr.vmem [resolvable:$true] %s2883_s0  ;;  %s5489_s26 = int_to_ptr.vmem [resolvable:$true] %s2870_s26 }
  0x90   :  { %346 = vmatpush1.bf16.msra.mxu0 %v4357_v10  ;;  %3195 = vmatpush3.bf16.msra.mxu1 %v4382_v18  ;;  %s4120_s27 = scalar_lea.vmem %s2884_s0, 128  ;;  %p4125_p1 = scmp.lt.s32.totalorder %s2884_s0, %s2884_s0 }
  0x91   :  { %347 = vmatprep.subr.bf16.mxu0 %v4361_v11  ;;  %3196 = vmatprep.subr.bf16.mxu1 %v4187_v0  ;;  %p4121_p0 = scmp.ne.s32.totalorder %s2884_s0, %s4120_s27  ;;  %p4126_p2 = scmp.lt.s32.totalorder %s4120_s27, %s4120_s27 }
  0x93   :  { %p4127_p3 = por %p4126_p2, %p4125_p1 }
  0x94   :  { %348 = vmatpush1.bf16.msra.mxu0 %v4366_v13  ;;  %3197 = vmatpush3.bf16.msra.mxu1 %v4388_v20 }
  0x95   :  { %349 = vmatprep.subr.bf16.mxu0 %v4373_v15  ;;  %3198 = vmatprep.subr.bf16.mxu1 %v4187_v0  ;;  %p4128_p4 = pnand %p4127_p3, %p4121_p0 }
  0x98   :  { %350 = vmatpush1.bf16.msra.mxu0 %v4377_v16  ;;  %3199 = vmatpush3.bf16.msra.mxu1 %v4398_v23 }
  0x99   :  { %351 = vmatprep.subr.bf16.mxu0 %v4379_v17  ;;  %3200 = vmatprep.subr.bf16.mxu1 %v4187_v0 }
  0x9c   :  { %352 = vmatpush1.bf16.msra.mxu0 %v4386_v19  ;;  %3201 = vmatpush3.bf16.msra.mxu1 %v4406_v25 }
  0x9d   :  { %353 = vmatprep.subr.bf16.mxu0 %v4390_v21  ;;  %3202 = vmatprep.subr.bf16.mxu1 %v4187_v0 }
  0xa0   :  { %354 = vmatpush1.bf16.msra.mxu0 %v4396_v22  ;;  %3203 = vmatpush3.bf16.msra.mxu1 %v4412_v26 }
  0xa1   :  { %425 = vmatprep.subr.bf16.mxu0 %v4335_v2  ;;  %3208 = vmatprep.subr.bf16.mxu1 %v4187_v0 }
  0xa3   :  { %372 = vmatmul.mubr.bf16.vlgmr.msra.gmra.mrb[0].mxu0 %v210_v24  ;;  %3205 = vmatmul.mubr.bf16.vlgmr.msra.gmra.mrb[0].mxu1 %v210_v24  ;;  %v4890_v24 = vld [vmem:[#allocation8 + $0x98] ss:$12 sps:$4 sm:$0xff]  }
  0xa4   :  { %426 = vmatpush1.bf16.msra.mxu0 %v4337_v3  ;;  %457 = vmatprep.mubr.bf16.mxu0 %v4188_v1 }
  0xa5   :  { %427 = vmatprep.subr.bf16.mxu0 %v4340_v4  ;;  %3209 = vmatpush3.bf16.msra.mxu1 %v4354_v9 }
  0xa6   :  { %3210 = vmatprep.subr.bf16.mxu1 %v4187_v0  ;;  %3224 = vmatprep.mubr.msk.bf16.mxu1 %vm4189_vm0, %v4187_v0 }
  0xa8   :  { %428 = vmatpush1.bf16.msra.mxu0 %v4343_v5 }
  0xa9   :  { %429 = vmatprep.subr.bf16.mxu0 %v4346_v6  ;;  %3211 = vmatpush3.bf16.msra.mxu1 %v4364_v12 }
  0xaa   :  { %3212 = vmatprep.subr.bf16.mxu1 %v4187_v0 }
  0xac   :  { %430 = vmatpush1.bf16.msra.mxu0 %v4349_v7 }
  0xad   :  { %431 = vmatprep.subr.bf16.mxu0 %v4352_v8  ;;  %3213 = vmatpush3.bf16.msra.mxu1 %v4370_v14 }
  0xae   :  { %3214 = vmatprep.subr.bf16.mxu1 %v4187_v0 }
  0xb0   :  { %432 = vmatpush1.bf16.msra.mxu0 %v4357_v10 }
  0xb1   :  { %433 = vmatprep.subr.bf16.mxu0 %v4361_v11  ;;  %3215 = vmatpush3.bf16.msra.mxu1 %v4382_v18 }
  0xb2   :  { %3216 = vmatprep.subr.bf16.mxu1 %v4187_v0 }
  0xb4   :  { %434 = vmatpush1.bf16.msra.mxu0 %v4366_v13 }
  0xb5   :  { %435 = vmatprep.subr.bf16.mxu0 %v4373_v15  ;;  %3217 = vmatpush3.bf16.msra.mxu1 %v4388_v20 }
  0xb6   :  { %3218 = vmatprep.subr.bf16.mxu1 %v4187_v0 }
  0xb8   :  { %436 = vmatpush1.bf16.msra.mxu0 %v4377_v16 }
  0xb9   :  { %437 = vmatprep.subr.bf16.mxu0 %v4379_v17  ;;  %3219 = vmatpush3.bf16.msra.mxu1 %v4398_v23 }
  0xba   :  { %3220 = vmatprep.subr.bf16.mxu1 %v4187_v0 }
  0xbc   :  { %438 = vmatpush1.bf16.msra.mxu0 %v4386_v19 }
  0xbd   :  { %439 = vmatprep.subr.bf16.mxu0 %v4390_v21  ;;  %3221 = vmatpush3.bf16.msra.mxu1 %v4406_v25 }
  0xbe   :  { %3222 = vmatprep.subr.bf16.mxu1 %v4187_v0 }
  0xc0   :  { %440 = vmatpush1.bf16.msra.mxu0 %v4396_v22 }
  0xc1   :  { %512 = vmatprep.subr.bf16.mxu0 %v4335_v2  ;;  %3223 = vmatpush3.bf16.msra.mxu1 %v4412_v26 }
  0xc2   :  { %3228 = vmatprep.subr.bf16.mxu1 %v4187_v0 }
  0xc3   :  { %458 = vmatmul.mubr.bf16.vlgmr.msra.gmra.mrb[4].mxu0 %v424_v27 }
  0xc4   :  { %513 = vmatpush1.bf16.msra.mxu0 %v4337_v3  ;;  %544 = vmatprep.mubr.bf16.mxu0 %v4188_v1 }
  0xc5   :  { %514 = vmatprep.subr.bf16.mxu0 %v4340_v4  ;;  %3225 = vmatmul.mubr.bf16.vlgmr.msra.gmra.mrb[4].mxu1 %v424_v27 }
  0xc6   :  { %3229 = vmatpush3.bf16.msra.mxu1 %v4354_v9  ;;  %3244 = vmatprep.mubr.msk.bf16.mxu1 %vm4189_vm0, %v4187_v0 }
  0xc7   :  { %3230 = vmatprep.subr.bf16.mxu1 %v4187_v0 }
  0xc8   :  { %515 = vmatpush1.bf16.msra.mxu0 %v4343_v5 }
  0xc9   :  { %516 = vmatprep.subr.bf16.mxu0 %v4346_v6 }
  0xca   :  { %3231 = vmatpush3.bf16.msra.mxu1 %v4364_v12 }
  0xcb   :  { %3232 = vmatprep.subr.bf16.mxu1 %v4187_v0 }
  0xcc   :  { %517 = vmatpush1.bf16.msra.mxu0 %v4349_v7 }
  0xcd   :  { %518 = vmatprep.subr.bf16.mxu0 %v4352_v8 }
  0xce   :  { %3233 = vmatpush3.bf16.msra.mxu1 %v4370_v14 }
  0xcf   :  { %3234 = vmatprep.subr.bf16.mxu1 %v4187_v0 }
  0xd0   :  { %519 = vmatpush1.bf16.msra.mxu0 %v4357_v10 }
  0xd1   :  { %520 = vmatprep.subr.bf16.mxu0 %v4361_v11 }
  0xd2   :  { %3235 = vmatpush3.bf16.msra.mxu1 %v4382_v18 }
  0xd3   :  { %3236 = vmatprep.subr.bf16.mxu1 %v4187_v0 }
  0xd4   :  { %521 = vmatpush1.bf16.msra.mxu0 %v4366_v13 }
  0xd5   :  { %522 = vmatprep.subr.bf16.mxu0 %v4373_v15 }
  0xd6   :  { %3237 = vmatpush3.bf16.msra.mxu1 %v4388_v20 }
  0xd7   :  { %3238 = vmatprep.subr.bf16.mxu1 %v4187_v0 }
  0xd8   :  { %523 = vmatpush1.bf16.msra.mxu0 %v4377_v16 }
  0xd9   :  { %524 = vmatprep.subr.bf16.mxu0 %v4379_v17 }
  0xda   :  { %3239 = vmatpush3.bf16.msra.mxu1 %v4398_v23 }
  0xdb   :  { %3240 = vmatprep.subr.bf16.mxu1 %v4187_v0 }
  0xdc   :  { %525 = vmatpush1.bf16.msra.mxu0 %v4386_v19 }
  0xdd   :  { %526 = vmatprep.subr.bf16.mxu0 %v4390_v21 }
  0xde   :  { %3241 = vmatpush3.bf16.msra.mxu1 %v4406_v25 }
  0xdf   :  { %3242 = vmatprep.subr.bf16.mxu1 %v4187_v0 }
  0xe0   :  { %527 = vmatpush1.bf16.msra.mxu0 %v4396_v22 }
  0xe1   :  { %599 = vmatprep.subr.bf16.mxu0 %v4335_v2 }
  0xe2   :  { %3243 = vmatpush3.bf16.msra.mxu1 %v4412_v26 }
  0xe3   :  { %545 = vmatmul.mubr.bf16.vlgmr.msra.gmra.mrb[8].mxu0 %v511_v28  ;;  %3248 = vmatprep.subr.bf16.mxu1 %v4187_v0 }
  0xe4   :  { %600 = vmatpush1.bf16.msra.mxu0 %v4337_v3  ;;  %631 = vmatprep.mubr.bf16.mxu0 %v4188_v1 }
  0xe5   :  { %601 = vmatprep.subr.bf16.mxu0 %v4340_v4  ;;  %3245 = vmatmul.mubr.bf16.vlgmr.msra.gmra.mrb[8].mxu1 %v511_v28 }
  0xe6   :  { %3249 = vmatpush3.bf16.msra.mxu1 %v4354_v9  ;;  %3264 = vmatprep.mubr.msk.bf16.mxu1 %vm4189_vm0, %v4187_v0 }
  0xe7   :  { %3250 = vmatprep.subr.bf16.mxu1 %v4187_v0 }
  0xe8   :  { %602 = vmatpush1.bf16.msra.mxu0 %v4343_v5 }
  0xe9   :  { %603 = vmatprep.subr.bf16.mxu0 %v4346_v6 }
  0xea   :  { %3251 = vmatpush3.bf16.msra.mxu1 %v4364_v12 }
  0xeb   :  { %3252 = vmatprep.subr.bf16.mxu1 %v4187_v0 }
  0xec   :  { %604 = vmatpush1.bf16.msra.mxu0 %v4349_v7 }
  0xed   :  { %605 = vmatprep.subr.bf16.mxu0 %v4352_v8 }
  0xee   :  { %3253 = vmatpush3.bf16.msra.mxu1 %v4370_v14 }
  0xef   :  { %3254 = vmatprep.subr.bf16.mxu1 %v4187_v0 }
  0xf0   :  { %606 = vmatpush1.bf16.msra.mxu0 %v4357_v10 }
  0xf1   :  { %607 = vmatprep.subr.bf16.mxu0 %v4361_v11 }
  0xf2   :  { %3255 = vmatpush3.bf16.msra.mxu1 %v4382_v18 }
  0xf3   :  { %3256 = vmatprep.subr.bf16.mxu1 %v4187_v0 }
  0xf4   :  { %608 = vmatpush1.bf16.msra.mxu0 %v4366_v13 }
  0xf5   :  { %609 = vmatprep.subr.bf16.mxu0 %v4373_v15 }
  0xf6   :  { %3257 = vmatpush3.bf16.msra.mxu1 %v4388_v20 }
  0xf7   :  { %3258 = vmatprep.subr.bf16.mxu1 %v4187_v0 }
  0xf8   :  { %610 = vmatpush1.bf16.msra.mxu0 %v4377_v16 }
  0xf9   :  { %611 = vmatprep.subr.bf16.mxu0 %v4379_v17 }
  0xfa   :  { %3259 = vmatpush3.bf16.msra.mxu1 %v4398_v23 }
  0xfb   :  { %3260 = vmatprep.subr.bf16.mxu1 %v4187_v0 }
  0xfc   :  { %612 = vmatpush1.bf16.msra.mxu0 %v4386_v19 }
  0xfd   :  { %613 = vmatprep.subr.bf16.mxu0 %v4390_v21 }
  0xfe   :  { %3261 = vmatpush3.bf16.msra.mxu1 %v4406_v25 }
  0xff   :  { %3262 = vmatprep.subr.bf16.mxu1 %v4187_v0 }
 0x100   :  { %614 = vmatpush1.bf16.msra.mxu0 %v4396_v22 }
 0x101   :  { %686 = vmatprep.subr.bf16.mxu0 %v4335_v2 }
 0x102   :  { %3263 = vmatpush3.bf16.msra.mxu1 %v4412_v26 }
 0x103   :  { %632 = vmatmul.mubr.bf16.vlgmr.msra.gmra.mrb[12].mxu0 %v598_v29  ;;  %3268 = vmatprep.subr.bf16.mxu1 %v4187_v0 }
 0x104   :  { %687 = vmatpush1.bf16.msra.mxu0 %v4337_v3  ;;  %718 = vmatprep.mubr.bf16.mxu0 %v4188_v1 }
 0x105   :  { %688 = vmatprep.subr.bf16.mxu0 %v4340_v4  ;;  %3265 = vmatmul.mubr.bf16.vlgmr.msra.gmra.mrb[12].mxu1 %v598_v29 }
 0x106   :  { %3269 = vmatpush3.bf16.msra.mxu1 %v4354_v9  ;;  %3284 = vmatprep.mubr.msk.bf16.mxu1 %vm4189_vm0, %v4187_v0 }
 0x107   :  { %3270 = vmatprep.subr.bf16.mxu1 %v4187_v0 }
 0x108   :  { %689 = vmatpush1.bf16.msra.mxu0 %v4343_v5 }
 0x109   :  { %690 = vmatprep.subr.bf16.mxu0 %v4346_v6 }
 0x10a   :  { %3271 = vmatpush3.bf16.msra.mxu1 %v4364_v12 }
 0x10b   :  { %3272 = vmatprep.subr.bf16.mxu1 %v4187_v0 }
 0x10c   :  { %691 = vmatpush1.bf16.msra.mxu0 %v4349_v7 }
 0x10d   :  { %692 = vmatprep.subr.bf16.mxu0 %v4352_v8 }
 0x10e   :  { %3273 = vmatpush3.bf16.msra.mxu1 %v4370_v14 }
 0x10f   :  { %3274 = vmatprep.subr.bf16.mxu1 %v4187_v0 }
 0x110   :  { %693 = vmatpush1.bf16.msra.mxu0 %v4357_v10 }
 0x111   :  { %694 = vmatprep.subr.bf16.mxu0 %v4361_v11 }
 0x112   :  { %3275 = vmatpush3.bf16.msra.mxu1 %v4382_v18 }
 0x113   :  { %3276 = vmatprep.subr.bf16.mxu1 %v4187_v0 }
 0x114   :  { %695 = vmatpush1.bf16.msra.mxu0 %v4366_v13 }
 0x115   :  { %696 = vmatprep.subr.bf16.mxu0 %v4373_v15 }
 0x116   :  { %3277 = vmatpush3.bf16.msra.mxu1 %v4388_v20 }
 0x117   :  { %3278 = vmatprep.subr.bf16.mxu1 %v4187_v0 }
 0x118   :  { %697 = vmatpush1.bf16.msra.mxu0 %v4377_v16 }
 0x119   :  { %698 = vmatprep.subr.bf16.mxu0 %v4379_v17 }
 0x11a   :  { %3279 = vmatpush3.bf16.msra.mxu1 %v4398_v23 }
 0x11b   :  { %3280 = vmatprep.subr.bf16.mxu1 %v4187_v0 }
 0x11c   :  { %699 = vmatpush1.bf16.msra.mxu0 %v4386_v19 }
 0x11d   :  { %700 = vmatprep.subr.bf16.mxu0 %v4390_v21 }
 0x11e   :  { %3281 = vmatpush3.bf16.msra.mxu1 %v4406_v25 }
 0x11f   :  { %3282 = vmatprep.subr.bf16.mxu1 %v4187_v0 }
 0x120   :  { %701 = vmatpush1.bf16.msra.mxu0 %v4396_v22 }
 0x121   :  { %773 = vmatprep.subr.bf16.mxu0 %v4335_v2 }
 0x122   :  { %3283 = vmatpush3.bf16.msra.mxu1 %v4412_v26 }
 0x123   :  { %719 = vmatmul.mubr.bf16.vlgmr.msra.gmra.mrb[16].mxu0 %v685_v30  ;;  %3288 = vmatprep.subr.bf16.mxu1 %v4187_v0 }
 0x124   :  { %774 = vmatpush1.bf16.msra.mxu0 %v4337_v3  ;;  %805 = vmatprep.mubr.bf16.mxu0 %v4188_v1 }
 0x125   :  { %775 = vmatprep.subr.bf16.mxu0 %v4340_v4  ;;  %3285 = vmatmul.mubr.bf16.vlgmr.msra.gmra.mrb[16].mxu1 %v685_v30 }
 0x126   :  { %3289 = vmatpush3.bf16.msra.mxu1 %v4354_v9  ;;  %3304 = vmatprep.mubr.msk.bf16.mxu1 %vm4189_vm0, %v4187_v0 }
 0x127   :  { %3290 = vmatprep.subr.bf16.mxu1 %v4187_v0 }
 0x128   :  { %776 = vmatpush1.bf16.msra.mxu0 %v4343_v5 }
 0x129   :  { %777 = vmatprep.subr.bf16.mxu0 %v4346_v6 }
 0x12a   :  { %3291 = vmatpush3.bf16.msra.mxu1 %v4364_v12 }
 0x12b   :  { %3292 = vmatprep.subr.bf16.mxu1 %v4187_v0 }
 0x12c   :  { %778 = vmatpush1.bf16.msra.mxu0 %v4349_v7 }
 0x12d   :  { %779 = vmatprep.subr.bf16.mxu0 %v4352_v8 }
 0x12e   :  { %3293 = vmatpush3.bf16.msra.mxu1 %v4370_v14 }
 0x12f   :  { %3294 = vmatprep.subr.bf16.mxu1 %v4187_v0 }
 0x130   :  { %780 = vmatpush1.bf16.msra.mxu0 %v4357_v10 }
 0x131   :  { %781 = vmatprep.subr.bf16.mxu0 %v4361_v11 }
 0x132   :  { %3295 = vmatpush3.bf16.msra.mxu1 %v4382_v18 }
 0x133   :  { %3296 = vmatprep.subr.bf16.mxu1 %v4187_v0 }
 0x134   :  { %782 = vmatpush1.bf16.msra.mxu0 %v4366_v13 }
 0x135   :  { %783 = vmatprep.subr.bf16.mxu0 %v4373_v15 }
 0x136   :  { %3297 = vmatpush3.bf16.msra.mxu1 %v4388_v20 }
 0x137   :  { %3298 = vmatprep.subr.bf16.mxu1 %v4187_v0 }
 0x138   :  { %784 = vmatpush1.bf16.msra.mxu0 %v4377_v16 }
 0x139   :  { %785 = vmatprep.subr.bf16.mxu0 %v4379_v17 }
 0x13a   :  { %3299 = vmatpush3.bf16.msra.mxu1 %v4398_v23 }
 0x13b   :  { %3300 = vmatprep.subr.bf16.mxu1 %v4187_v0 }
 0x13c   :  { %786 = vmatpush1.bf16.msra.mxu0 %v4386_v19 }
 0x13d   :  { %787 = vmatprep.subr.bf16.mxu0 %v4390_v21 }
 0x13e   :  { %3301 = vmatpush3.bf16.msra.mxu1 %v4406_v25 }
 0x13f   :  { %3302 = vmatprep.subr.bf16.mxu1 %v4187_v0 }
 0x140   :  { %788 = vmatpush1.bf16.msra.mxu0 %v4396_v22 }
 0x141   :  { %860 = vmatprep.subr.bf16.mxu0 %v4335_v2 }
 0x142   :  { %3303 = vmatpush3.bf16.msra.mxu1 %v4412_v26 }
 0x143   :  { %806 = vmatmul.mubr.bf16.vlgmr.msra.gmra.mrb[20].mxu0 %v772_v31  ;;  %3308 = vmatprep.subr.bf16.mxu1 %v4187_v0 }
 0x144   :  { %861 = vmatpush1.bf16.msra.mxu0 %v4337_v3  ;;  %892 = vmatprep.mubr.bf16.mxu0 %v4188_v1 }
 0x145   :  { %862 = vmatprep.subr.bf16.mxu0 %v4340_v4  ;;  %3305 = vmatmul.mubr.bf16.vlgmr.msra.gmra.mrb[20].mxu1 %v772_v31 }
 0x146   :  { %3309 = vmatpush3.bf16.msra.mxu1 %v4354_v9  ;;  %3324 = vmatprep.mubr.msk.bf16.mxu1 %vm4189_vm0, %v4187_v0 }
 0x147   :  { %3310 = vmatprep.subr.bf16.mxu1 %v4187_v0 }
 0x148   :  { %863 = vmatpush1.bf16.msra.mxu0 %v4343_v5 }
 0x149   :  { %864 = vmatprep.subr.bf16.mxu0 %v4346_v6 }
 0x14a   :  { %3311 = vmatpush3.bf16.msra.mxu1 %v4364_v12 }
 0x14b   :  { %3312 = vmatprep.subr.bf16.mxu1 %v4187_v0 }
 0x14c   :  { %865 = vmatpush1.bf16.msra.mxu0 %v4349_v7 }
 0x14d   :  { %866 = vmatprep.subr.bf16.mxu0 %v4352_v8 }
 0x14e   :  { %3313 = vmatpush3.bf16.msra.mxu1 %v4370_v14 }
 0x14f   :  { %3314 = vmatprep.subr.bf16.mxu1 %v4187_v0 }
 0x150   :  { %867 = vmatpush1.bf16.msra.mxu0 %v4357_v10 }
 0x151   :  { %868 = vmatprep.subr.bf16.mxu0 %v4361_v11 }
 0x152   :  { %3315 = vmatpush3.bf16.msra.mxu1 %v4382_v18 }
 0x153   :  { %3316 = vmatprep.subr.bf16.mxu1 %v4187_v0 }
 0x154   :  { %869 = vmatpush1.bf16.msra.mxu0 %v4366_v13 }
 0x155   :  { %870 = vmatprep.subr.bf16.mxu0 %v4373_v15 }
 0x156   :  { %3317 = vmatpush3.bf16.msra.mxu1 %v4388_v20 }
 0x157   :  { %3318 = vmatprep.subr.bf16.mxu1 %v4187_v0 }
 0x158   :  { %871 = vmatpush1.bf16.msra.mxu0 %v4377_v16 }
 0x159   :  { %872 = vmatprep.subr.bf16.mxu0 %v4379_v17 }
 0x15a   :  { %3319 = vmatpush3.bf16.msra.mxu1 %v4398_v23 }
 0x15b   :  { %3320 = vmatprep.subr.bf16.mxu1 %v4187_v0 }
 0x15c   :  { %873 = vmatpush1.bf16.msra.mxu0 %v4386_v19 }
 0x15d   :  { %874 = vmatprep.subr.bf16.mxu0 %v4390_v21 }
 0x15e   :  { %3321 = vmatpush3.bf16.msra.mxu1 %v4406_v25 }
 0x15f   :  { %3322 = vmatprep.subr.bf16.mxu1 %v4187_v0 }
 0x160   :  { %875 = vmatpush1.bf16.msra.mxu0 %v4396_v22 }
 0x161   :  { %947 = vmatprep.subr.bf16.mxu0 %v4335_v2 }
 0x162   :  { %3323 = vmatpush3.bf16.msra.mxu1 %v4412_v26 }
 0x163   :  { %893 = vmatmul.mubr.bf16.vlgmr.msra.gmra.mrb[24].mxu0 %v859_v32  ;;  %3328 = vmatprep.subr.bf16.mxu1 %v4187_v0 }
 0x164   :  { %948 = vmatpush1.bf16.msra.mxu0 %v4337_v3  ;;  %979 = vmatprep.mubr.bf16.mxu0 %v4188_v1 }
 0x165   :  { %949 = vmatprep.subr.bf16.mxu0 %v4340_v4  ;;  %3325 = vmatmul.mubr.bf16.vlgmr.msra.gmra.mrb[24].mxu1 %v859_v32 }
 0x166   :  { %3329 = vmatpush3.bf16.msra.mxu1 %v4354_v9  ;;  %3344 = vmatprep.mubr.msk.bf16.mxu1 %vm4189_vm0, %v4187_v0 }
 0x167   :  { %3330 = vmatprep.subr.bf16.mxu1 %v4187_v0 }
 0x168   :  { %950 = vmatpush1.bf16.msra.mxu0 %v4343_v5 }
 0x169   :  { %951 = vmatprep.subr.bf16.mxu0 %v4346_v6 }
 0x16a   :  { %3331 = vmatpush3.bf16.msra.mxu1 %v4364_v12 }
 0x16b   :  { %3332 = vmatprep.subr.bf16.mxu1 %v4187_v0 }
 0x16c   :  { %952 = vmatpush1.bf16.msra.mxu0 %v4349_v7 }
 0x16d   :  { %953 = vmatprep.subr.bf16.mxu0 %v4352_v8 }
 0x16e   :  { %3333 = vmatpush3.bf16.msra.mxu1 %v4370_v14 }
 0x16f   :  { %3334 = vmatprep.subr.bf16.mxu1 %v4187_v0 }
 0x170   :  { %954 = vmatpush1.bf16.msra.mxu0 %v4357_v10 }
 0x171   :  { %955 = vmatprep.subr.bf16.mxu0 %v4361_v11 }
 0x172   :  { %3335 = vmatpush3.bf16.msra.mxu1 %v4382_v18 }
 0x173   :  { %3336 = vmatprep.subr.bf16.mxu1 %v4187_v0 }
 0x174   :  { %956 = vmatpush1.bf16.msra.mxu0 %v4366_v13 }
 0x175   :  { %957 = vmatprep.subr.bf16.mxu0 %v4373_v15 }
 0x176   :  { %3337 = vmatpush3.bf16.msra.mxu1 %v4388_v20  ;;  %v4653_v33 = vpop.f32.mrb[0].mxu1 }
 0x177   :  { %3338 = vmatprep.subr.bf16.mxu1 %v4187_v0  ;;  %v3206_v34 = vpop.f32.mrb[1].mxu1 }
 0x178   :  { %958 = vmatpush1.bf16.msra.mxu0 %v4377_v16  ;;  %v417_v36 = vpop.f32.mrb[2].mxu1 }
 0x179   :  { %959 = vmatprep.subr.bf16.mxu0 %v4379_v17  ;;  %v3207_v37 = vpop.f32.mrb[3].mxu1 }
 0x17a   :  { %3339 = vmatpush3.bf16.msra.mxu1 %v4398_v23 }
 0x17b   :  { %3340 = vmatprep.subr.bf16.mxu1 %v4187_v0 }
 0x17c   :  { %960 = vmatpush1.bf16.msra.mxu0 %v4386_v19 }
 0x17d   :  { %961 = vmatprep.subr.bf16.mxu0 %v4390_v21 }
 0x17e   :  { %3341 = vmatpush3.bf16.msra.mxu1 %v4406_v25 }
 0x17f   :  { %3342 = vmatprep.subr.bf16.mxu1 %v4187_v0 }
 0x180   :  { %962 = vmatpush1.bf16.msra.mxu0 %v4396_v22 }
 0x181   :  { %1034 = vmatprep.subr.bf16.mxu0 %v4335_v2 }
 0x182   :  { %3343 = vmatpush3.bf16.msra.mxu1 %v4412_v26 }
 0x183   :  { %980 = vmatmul.mubr.bf16.vlgmr.msra.gmra.mrb[28].mxu0 %v946_v35  ;;  %3348 = vmatprep.subr.bf16.mxu1 %v4187_v0 }
 0x184   :  { %1035 = vmatpush1.bf16.msra.mxu0 %v4337_v3  ;;  %1066 = vmatprep.mubr.bf16.mxu0 %v4188_v1 }
 0x185   :  { %1036 = vmatprep.subr.bf16.mxu0 %v4340_v4  ;;  %3345 = vmatmul.mubr.bf16.vlgmr.msra.gmra.mrb[28].mxu1 %v946_v35 }
 0x186   :  { %3349 = vmatpush3.bf16.msra.mxu1 %v4354_v9  ;;  %3364 = vmatprep.mubr.msk.bf16.mxu1 %vm4189_vm0, %v4187_v0 }
 0x187   :  { %3350 = vmatprep.subr.bf16.mxu1 %v4187_v0 }
 0x188   :  { %1037 = vmatpush1.bf16.msra.mxu0 %v4343_v5 }
 0x189   :  { %1038 = vmatprep.subr.bf16.mxu0 %v4346_v6 }
 0x18a   :  { %3351 = vmatpush3.bf16.msra.mxu1 %v4364_v12 }
 0x18b   :  { %3352 = vmatprep.subr.bf16.mxu1 %v4187_v0 }
 0x18c   :  { %1039 = vmatpush1.bf16.msra.mxu0 %v4349_v7 }
 0x18d   :  { %1040 = vmatprep.subr.bf16.mxu0 %v4352_v8 }
 0x18e   :  { %3353 = vmatpush3.bf16.msra.mxu1 %v4370_v14 }
 0x18f   :  { %3354 = vmatprep.subr.bf16.mxu1 %v4187_v0 }
 0x190   :  { %1041 = vmatpush1.bf16.msra.mxu0 %v4357_v10 }
 0x191   :  { %1042 = vmatprep.subr.bf16.mxu0 %v4361_v11 }
 0x192   :  { %3355 = vmatpush3.bf16.msra.mxu1 %v4382_v18 }
 0x193   :  { %3356 = vmatprep.subr.bf16.mxu1 %v4187_v0 }
 0x194   :  { %1043 = vmatpush1.bf16.msra.mxu0 %v4366_v13 }
 0x195   :  { %1044 = vmatprep.subr.bf16.mxu0 %v4373_v15 }
 0x196   :  { %3357 = vmatpush3.bf16.msra.mxu1 %v4388_v20 }
 0x197   :  { %3358 = vmatprep.subr.bf16.mxu1 %v4187_v0 }
 0x198   :  { %1045 = vmatpush1.bf16.msra.mxu0 %v4377_v16  ;;  %v4690_v38 = vpop.f32.mrb[4].mxu1 }
 0x199   :  { %1046 = vmatprep.subr.bf16.mxu0 %v4379_v17  ;;  %v3226_v39 = vpop.f32.mrb[5].mxu1 }
 0x19a   :  { %3359 = vmatpush3.bf16.msra.mxu1 %v4398_v23  ;;  %v503_v41 = vpop.f32.mrb[6].mxu1 }
 0x19b   :  { %v3227_v42 = vpop.f32.mrb[7].mxu1  ;;  %3360 = vmatprep.subr.bf16.mxu1 %v4187_v0 }
 0x19c   :  { %1047 = vmatpush1.bf16.msra.mxu0 %v4386_v19 }
 0x19d   :  { %1048 = vmatprep.subr.bf16.mxu0 %v4390_v21 }
 0x19e   :  { %3361 = vmatpush3.bf16.msra.mxu1 %v4406_v25 }
 0x19f   :  { %3362 = vmatprep.subr.bf16.mxu1 %v4187_v0 }
 0x1a0   :  { %1049 = vmatpush1.bf16.msra.mxu0 %v4396_v22 }
 0x1a1   :  { %1121 = vmatprep.subr.bf16.mxu0 %v4335_v2 }
 0x1a2   :  { %3363 = vmatpush3.bf16.msra.mxu1 %v4412_v26 }
 0x1a3   :  { %1067 = vmatmul.mubr.bf16.vlgmr.msra.gmra.mrb[32].mxu0 %v1033_v40  ;;  %3368 = vmatprep.subr.bf16.mxu1 %v4187_v0 }
 0x1a4   :  { %1122 = vmatpush1.bf16.msra.mxu0 %v4337_v3  ;;  %1153 = vmatprep.mubr.bf16.mxu0 %v4188_v1 }
 0x1a5   :  { %1123 = vmatprep.subr.bf16.mxu0 %v4340_v4  ;;  %3365 = vmatmul.mubr.bf16.vlgmr.msra.gmra.mrb[32].mxu1 %v1033_v40 }
 0x1a6   :  { %3369 = vmatpush3.bf16.msra.mxu1 %v4354_v9  ;;  %3384 = vmatprep.mubr.msk.bf16.mxu1 %vm4189_vm0, %v4187_v0 }
 0x1a7   :  { %3370 = vmatprep.subr.bf16.mxu1 %v4187_v0 }
 0x1a8   :  { %1124 = vmatpush1.bf16.msra.mxu0 %v4343_v5 }
 0x1a9   :  { %1125 = vmatprep.subr.bf16.mxu0 %v4346_v6 }
 0x1aa   :  { %3371 = vmatpush3.bf16.msra.mxu1 %v4364_v12 }
 0x1ab   :  { %3372 = vmatprep.subr.bf16.mxu1 %v4187_v0 }
 0x1ac   :  { %1126 = vmatpush1.bf16.msra.mxu0 %v4349_v7 }
 0x1ad   :  { %1127 = vmatprep.subr.bf16.mxu0 %v4352_v8 }
 0x1ae   :  { %3373 = vmatpush3.bf16.msra.mxu1 %v4370_v14 }
 0x1af   :  { %3374 = vmatprep.subr.bf16.mxu1 %v4187_v0 }
 0x1b0   :  { %1128 = vmatpush1.bf16.msra.mxu0 %v4357_v10 }
 0x1b1   :  { %1129 = vmatprep.subr.bf16.mxu0 %v4361_v11 }
 0x1b2   :  { %3375 = vmatpush3.bf16.msra.mxu1 %v4382_v18 }
 0x1b3   :  { %3376 = vmatprep.subr.bf16.mxu1 %v4187_v0 }
 0x1b4   :  { %1130 = vmatpush1.bf16.msra.mxu0 %v4366_v13 }
 0x1b5   :  { %1131 = vmatprep.subr.bf16.mxu0 %v4373_v15 }
 0x1b6   :  { %3377 = vmatpush3.bf16.msra.mxu1 %v4388_v20 }
 0x1b7   :  { %3378 = vmatprep.subr.bf16.mxu1 %v4187_v0 }
 0x1b8   :  { %1132 = vmatpush1.bf16.msra.mxu0 %v4377_v16  ;;  %v4727_v43 = vpop.f32.mrb[8].mxu1 }
 0x1b9   :  { %1133 = vmatprep.subr.bf16.mxu0 %v4379_v17  ;;  %v3246_v44 = vpop.f32.mrb[9].mxu1 }
 0x1ba   :  { %3379 = vmatpush3.bf16.msra.mxu1 %v4398_v23  ;;  %v590_v46 = vpop.f32.mrb[10].mxu1 }
 0x1bb   :  { %v3247_v47 = vpop.f32.mrb[11].mxu1  ;;  %3380 = vmatprep.subr.bf16.mxu1 %v4187_v0 }
 0x1bc   :  { %1134 = vmatpush1.bf16.msra.mxu0 %v4386_v19 }
 0x1bd   :  { %1135 = vmatprep.subr.bf16.mxu0 %v4390_v21 }
 0x1be   :  { %3381 = vmatpush3.bf16.msra.mxu1 %v4406_v25 }
 0x1bf   :  { %3382 = vmatprep.subr.bf16.mxu1 %v4187_v0 }
 0x1c0   :  { %1136 = vmatpush1.bf16.msra.mxu0 %v4396_v22 }
 0x1c1   :  { %1208 = vmatprep.subr.bf16.mxu0 %v4335_v2 }
 0x1c2   :  { %3383 = vmatpush3.bf16.msra.mxu1 %v4412_v26 }
 0x1c3   :  { %1154 = vmatmul.mubr.bf16.vlgmr.msra.gmra.mrb[36].mxu0 %v1120_v45  ;;  %3388 = vmatprep.subr.bf16.mxu1 %v4187_v0 }
 0x1c4   :  { %1209 = vmatpush1.bf16.msra.mxu0 %v4337_v3  ;;  %1240 = vmatprep.mubr.bf16.mxu0 %v4188_v1 }
 0x1c5   :  { %1210 = vmatprep.subr.bf16.mxu0 %v4340_v4  ;;  %3385 = vmatmul.mubr.bf16.vlgmr.msra.gmra.mrb[36].mxu1 %v1120_v45 }
 0x1c6   :  { %3389 = vmatpush3.bf16.msra.mxu1 %v4354_v9  ;;  %3404 = vmatprep.mubr.msk.bf16.mxu1 %vm4189_vm0, %v4187_v0 }
 0x1c7   :  { %3390 = vmatprep.subr.bf16.mxu1 %v4187_v0 }
 0x1c8   :  { %1211 = vmatpush1.bf16.msra.mxu0 %v4343_v5 }
 0x1c9   :  { %1212 = vmatprep.subr.bf16.mxu0 %v4346_v6 }
 0x1ca   :  { %3391 = vmatpush3.bf16.msra.mxu1 %v4364_v12 }
 0x1cb   :  { %3392 = vmatprep.subr.bf16.mxu1 %v4187_v0 }
 0x1cc   :  { %1213 = vmatpush1.bf16.msra.mxu0 %v4349_v7 }
 0x1cd   :  { %1214 = vmatprep.subr.bf16.mxu0 %v4352_v8 }
 0x1ce   :  { %3393 = vmatpush3.bf16.msra.mxu1 %v4370_v14 }
 0x1cf   :  { %3394 = vmatprep.subr.bf16.mxu1 %v4187_v0 }
 0x1d0   :  { %1215 = vmatpush1.bf16.msra.mxu0 %v4357_v10 }
 0x1d1   :  { %1216 = vmatprep.subr.bf16.mxu0 %v4361_v11 }
 0x1d2   :  { %3395 = vmatpush3.bf16.msra.mxu1 %v4382_v18 }
 0x1d3   :  { %3396 = vmatprep.subr.bf16.mxu1 %v4187_v0 }
 0x1d4   :  { %1217 = vmatpush1.bf16.msra.mxu0 %v4366_v13 }
 0x1d5   :  { %1218 = vmatprep.subr.bf16.mxu0 %v4373_v15 }
 0x1d6   :  { %3397 = vmatpush3.bf16.msra.mxu1 %v4388_v20 }
 0x1d7   :  { %3398 = vmatprep.subr.bf16.mxu1 %v4187_v0 }
 0x1d8   :  { %1219 = vmatpush1.bf16.msra.mxu0 %v4377_v16  ;;  %v4764_v48 = vpop.f32.mrb[12].mxu1 }
 0x1d9   :  { %1220 = vmatprep.subr.bf16.mxu0 %v4379_v17  ;;  %v3266_v49 = vpop.f32.mrb[13].mxu1 }
 0x1da   :  { %3399 = vmatpush3.bf16.msra.mxu1 %v4398_v23  ;;  %v677_v51 = vpop.f32.mrb[14].mxu1 }
 0x1db   :  { %v3267_v52 = vpop.f32.mrb[15].mxu1  ;;  %3400 = vmatprep.subr.bf16.mxu1 %v4187_v0 }
 0x1dc   :  { %1221 = vmatpush1.bf16.msra.mxu0 %v4386_v19 }
 0x1dd   :  { %1222 = vmatprep.subr.bf16.mxu0 %v4390_v21 }
 0x1de   :  { %3401 = vmatpush3.bf16.msra.mxu1 %v4406_v25 }
 0x1df   :  { %3402 = vmatprep.subr.bf16.mxu1 %v4187_v0 }
 0x1e0   :  { %1223 = vmatpush1.bf16.msra.mxu0 %v4396_v22 }
 0x1e1   :  { %1295 = vmatprep.subr.bf16.mxu0 %v4335_v2  ;;  %v4823_v2 = vld [vmem:[#allocation8 + $0x30] ss:$12 sps:$4 sm:$0xff]  }
 0x1e2   :  { %3403 = vmatpush3.bf16.msra.mxu1 %v4412_v26 }
 0x1e3   :  { %1241 = vmatmul.mubr.bf16.vlgmr.msra.gmra.mrb[40].mxu0 %v1207_v50  ;;  %3408 = vmatprep.subr.bf16.mxu1 %v4187_v0 }
 0x1e4   :  { %1296 = vmatpush1.bf16.msra.mxu0 %v4337_v3  ;;  %1327 = vmatprep.mubr.bf16.mxu0 %v4188_v1  ;;  %v4826_v3 = vld [vmem:[#allocation8 + $0x8] ss:$12 sps:$4 sm:$0xff]  }
 0x1e5   :  { %1297 = vmatprep.subr.bf16.mxu0 %v4340_v4  ;;  %3405 = vmatmul.mubr.bf16.vlgmr.msra.gmra.mrb[40].mxu1 %v1207_v50  ;;  %v4829_v4 = vld [vmem:[#allocation8 + $0x4c] ss:$12 sps:$4 sm:$0xff]  }
 0x1e6   :  { %3409 = vmatpush3.bf16.msra.mxu1 %v4354_v9  ;;  %3424 = vmatprep.mubr.msk.bf16.mxu1 %vm4189_vm0, %v4187_v0  ;;  %v4848_v9 = vld [vmem:[#allocation8 + $0x38] ss:$12 sps:$4 sm:$0xff]  }
 0x1e7   :  { %3410 = vmatprep.subr.bf16.mxu1 %v4187_v0 }
 0x1e8   :  { %1298 = vmatpush1.bf16.msra.mxu0 %v4343_v5  ;;  %v4833_v5 = vld [vmem:[#allocation8 + $0x48] ss:$12 sps:$4 sm:$0xff]  }
 0x1e9   :  { %1299 = vmatprep.subr.bf16.mxu0 %v4346_v6  ;;  %v4836_v6 = vld [vmem:[#allocation8 + $0x20] ss:$12 sps:$4 sm:$0xff]  }
 0x1ea   :  { %3411 = vmatpush3.bf16.msra.mxu1 %v4364_v12  ;;  %v4858_v12 = vld [vmem:[#allocation8 + $0x50] ss:$12 sps:$4 sm:$0xff]  }
 0x1eb   :  { %3412 = vmatprep.subr.bf16.mxu1 %v4187_v0 }
 0x1ec   :  { %1300 = vmatpush1.bf16.msra.mxu0 %v4349_v7  ;;  %v4839_v7 = vld [vmem:[#allocation8 + $0x64] ss:$12 sps:$4 sm:$0xff]  }
 0x1ed   :  { %1301 = vmatprep.subr.bf16.mxu0 %v4352_v8  ;;  %v4845_v8 = vld [vmem:[#allocation8 + $0x60] ss:$12 sps:$4 sm:$0xff]  }
 0x1ee   :  { %3413 = vmatpush3.bf16.msra.mxu1 %v4370_v14  ;;  %v4865_v14 = vld [vmem:[#allocation8 + $0x90] ss:$12 sps:$4 sm:$0xff]  }
 0x1ef   :  { %3414 = vmatprep.subr.bf16.mxu1 %v4187_v0 }
 0x1f0   :  { %1302 = vmatpush1.bf16.msra.mxu0 %v4357_v10  ;;  %v4851_v10 = vld [vmem:[#allocation8 + $0x7c] ss:$12 sps:$4 sm:$0xff]  }
 0x1f1   :  { %1303 = vmatprep.subr.bf16.mxu0 %v4361_v11  ;;  %v4855_v11 = vld [vmem:[#allocation8 + $0x78] ss:$12 sps:$4 sm:$0xff]  }
 0x1f2   :  { %3415 = vmatpush3.bf16.msra.mxu1 %v4382_v18  ;;  %v4877_v18 = vld [vmem:[#allocation12] sm:$0xff] }
 0x1f3   :  { %3416 = vmatprep.subr.bf16.mxu1 %v4187_v0 }
 0x1f4   :  { %1304 = vmatpush1.bf16.msra.mxu0 %v4366_v13  ;;  %v4861_v13 = vld [vmem:[#allocation8 + $0x94] ss:$12 sps:$4 sm:$0xff]  }
 0x1f5   :  { %1305 = vmatprep.subr.bf16.mxu0 %v4373_v15  ;;  %v4868_v15 = vld [vmem:[#allocation8 + $0x68] ss:$12 sps:$4 sm:$0xff]  }
 0x1f6   :  { %3417 = vmatpush3.bf16.msra.mxu1 %v4388_v20 }
 0x1f7   :  { %3418 = vmatprep.subr.bf16.mxu1 %v4187_v0 }
 0x1f8   :  { %1306 = vmatpush1.bf16.msra.mxu0 %v4377_v16  ;;  %v4803_v54 = vpop.f32.mrb[16].mxu1  ;;  %v4871_v16 = vld [vmem:[#allocation8 + $0xac] ss:$12 sps:$4 sm:$0xff]  }
 0x1f9   :  { %1307 = vmatprep.subr.bf16.mxu0 %v4379_v17  ;;  %v3286_v55 = vpop.f32.mrb[17].mxu1  ;;  %v4875_v17 = vld [vmem:[#allocation8 + $0xa8] ss:$12 sps:$4 sm:$0xff]  }
 0x1fa   :  { %3419 = vmatpush3.bf16.msra.mxu1 %v4398_v23  ;;  %v764_v58 = vpop.f32.mrb[18].mxu1 }
 0x1fb   :  { %v3287_v60 = vpop.f32.mrb[19].mxu1  ;;  %3420 = vmatprep.subr.bf16.mxu1 %v4187_v0  ;;  %v184_v58 = vlaneseq }
 0x1fc   :  { %1308 = vmatpush1.bf16.msra.mxu0 %v4386_v19  ;;  %v4880_v19 = vld [vmem:[#allocation8 + $0x80] ss:$12 sps:$4 sm:$0xff]  }
 0x1fd   :  { %1309 = vmatprep.subr.bf16.mxu0 %v4390_v21  ;;  %v1384_v21 = vpack.c.bf16 %v4877_v18, %v4877_v18  ;;  %v185_v60 = vshrl.u32 %v184_v58, 7 }
 0x1fe   :  { %3421 = vmatpush3.bf16.msra.mxu1 %v4406_v25 }
 0x1ff   :  { %3422 = vmatprep.subr.bf16.mxu1 %v4187_v0  ;;  %v186_v61 = vsub.s32 0, %v185_v60 }
 0x200   :  { %1310 = vmatpush1.bf16.msra.mxu0 %v4396_v22 }
 0x201   :  { %1513 = vmatprep.subr.bf16.mxu0 %v4800_v53 }
 0x202   :  { %3423 = vmatpush3.bf16.msra.mxu1 %v4412_v26  ;;  %v4895_v26 = vld [vmem:[#allocation8 + $0xb0] ss:$12 sps:$4 sm:$0xff]  }
 0x203   :  { %1328 = vmatmul.mubr.bf16.vlgmr.msra.gmra.mrb[44].mxu0 %v1294_v56  ;;  %3428 = vmatprep.subr.bf16.mxu1 %v4187_v0 }
 0x204   :  { %1514 = vmatpush1.bf16.msra.mxu0 %v4806_v57  ;;  %1545 = vmatprep.mubr.bf16.mxu0 %v4188_v1 }
 0x205   :  { %1515 = vmatprep.subr.bf16.mxu0 %v4810_v59  ;;  %3425 = vmatmul.mubr.bf16.vlgmr.msra.gmra.mrb[44].mxu1 %v1294_v56 }
 0x206   :  { %3429 = vmatpush3.bf16.msra.mxu1 %v4826_v3  ;;  %3444 = vmatprep.mubr.msk.bf16.mxu1 %vm4189_vm0, %v4187_v0 }
 0x207   :  { %3430 = vmatprep.subr.bf16.mxu1 %v4187_v0 }
 0x208   :  { %1516 = vmatpush1.bf16.msra.mxu0 %v4814_v62 }
 0x209   :  { %1517 = vmatprep.subr.bf16.mxu0 %v4818_v63 }
 0x20a   :  { %3431 = vmatpush3.bf16.msra.mxu1 %v4836_v6 }
 0x20b   :  { %3432 = vmatprep.subr.bf16.mxu1 %v4187_v0 }
 0x20c   :  { %1518 = vmatpush1.bf16.msra.mxu0 %v4823_v2 }
 0x20d   :  { %1519 = vmatprep.subr.bf16.mxu0 %v4829_v4 }
 0x20e   :  { %3433 = vmatpush3.bf16.msra.mxu1 %v4848_v9 }
 0x20f   :  { %3434 = vmatprep.subr.bf16.mxu1 %v4187_v0 }
 0x210   :  { %1520 = vmatpush1.bf16.msra.mxu0 %v4833_v5 }
 0x211   :  { %1521 = vmatprep.subr.bf16.mxu0 %v4839_v7 }
 0x212   :  { %3435 = vmatpush3.bf16.msra.mxu1 %v4858_v12 }
 0x213   :  { %3436 = vmatprep.subr.bf16.mxu1 %v4187_v0 }
 0x214   :  { %1522 = vmatpush1.bf16.msra.mxu0 %v4845_v8 }
 0x215   :  { %1523 = vmatprep.subr.bf16.mxu0 %v4851_v10 }
 0x216   :  { %3437 = vmatpush3.bf16.msra.mxu1 %v4868_v15 }
 0x217   :  { %3438 = vmatprep.subr.bf16.mxu1 %v4187_v0 }
 0x218   :  { %1524 = vmatpush1.bf16.msra.mxu0 %v4855_v11  ;;  %v4884_v20 = vpop.f32.mrb[20].mxu1 }
 0x219   :  { %1525 = vmatprep.subr.bf16.mxu0 %v4861_v13  ;;  %v3306_v22 = vpop.f32.mrb[21].mxu1 }
 0x21a   :  { %3439 = vmatpush3.bf16.msra.mxu1 %v4880_v19  ;;  %v851_v23 = vpop.f32.mrb[22].mxu1  ;;  %v190_v22 = vsub.s32 1, %v185_v60 }
 0x21b   :  { %v3307_v25 = vpop.f32.mrb[23].mxu1  ;;  %3440 = vmatprep.subr.bf16.mxu1 %v4187_v0 }
 0x21c   :  { %1526 = vmatpush1.bf16.msra.mxu0 %v4865_v14 }
 0x21d   :  { %1527 = vmatprep.subr.bf16.mxu0 %v4871_v16 }
 0x21e   :  { %3441 = vmatpush3.bf16.msra.mxu1 %v4890_v24 }
 0x21f   :  { %3442 = vmatprep.subr.bf16.mxu1 %v4187_v0 }
 0x220   :  { %1528 = vmatpush1.bf16.msra.mxu0 %v4875_v17 }
 0x221   :  { %1625 = vmatprep.subr.bf16.mxu0 %v4800_v53 }
 0x222   :  { %3443 = vmatpush3.bf16.msra.mxu1 %v4895_v26 }
 0x223   :  { %1546 = vmatmul.mubr.bf16.vlgmr.msra.gmra.mrb[0].mxu0 %v1384_v21  ;;  %3448 = vmatprep.subr.bf16.mxu1 %v4187_v0 }
 0x224   :  { %1626 = vmatpush1.bf16.msra.mxu0 %v4806_v57  ;;  %1657 = vmatprep.mubr.bf16.mxu0 %v4188_v1 }
 0x225   :  { %1627 = vmatprep.subr.bf16.mxu0 %v4810_v59  ;;  %3445 = vmatmul.mubr.bf16.vlgmr.msra.gmra.mrb[48].mxu1 %v1384_v21  ;;  %v182_v21 = vld [vmem:[#allocation9] sm:$0x7] }
 0x226   :  { %3449 = vmatpush3.bf16.msra.mxu1 %v4826_v3  ;;  %3464 = vmatprep.mubr.msk.bf16.mxu1 %vm4189_vm0, %v4187_v0  ;;  %v4947_v23 = vrot.slane %v182_v21, %v186_v61 }
 0x227   :  { %3450 = vmatprep.subr.bf16.mxu1 %v4187_v0 }
 0x228   :  { %1628 = vmatpush1.bf16.msra.mxu0 %v4814_v62 }
 0x229   :  { %1629 = vmatprep.subr.bf16.mxu0 %v4818_v63 }
 0x22a   :  { %3451 = vmatpush3.bf16.msra.mxu1 %v4836_v6 }
 0x22b   :  { %3452 = vmatprep.subr.bf16.mxu1 %v4187_v0 }
 0x22c   :  { %1630 = vmatpush1.bf16.msra.mxu0 %v4823_v2 }
 0x22d   :  { %1631 = vmatprep.subr.bf16.mxu0 %v4829_v4 }
 0x22e   :  { %3453 = vmatpush3.bf16.msra.mxu1 %v4848_v9 }
 0x22f   :  { %3454 = vmatprep.subr.bf16.mxu1 %v4187_v0 }
 0x230   :  { %1632 = vmatpush1.bf16.msra.mxu0 %v4833_v5 }
 0x231   :  { %1633 = vmatprep.subr.bf16.mxu0 %v4839_v7 }
 0x232   :  { %3455 = vmatpush3.bf16.msra.mxu1 %v4858_v12 }
 0x233   :  { %3456 = vmatprep.subr.bf16.mxu1 %v4187_v0 }
 0x234   :  { %1634 = vmatpush1.bf16.msra.mxu0 %v4845_v8 }
 0x235   :  { %1635 = vmatprep.subr.bf16.mxu0 %v4851_v10 }
 0x236   :  { %3457 = vmatpush3.bf16.msra.mxu1 %v4868_v15 }
 0x237   :  { %3458 = vmatprep.subr.bf16.mxu1 %v4187_v0 }
 0x238   :  { %1636 = vmatpush1.bf16.msra.mxu0 %v4855_v11  ;;  %v4927_v27 = vpop.f32.mrb[24].mxu1 }
 0x239   :  { %1637 = vmatprep.subr.bf16.mxu0 %v4861_v13  ;;  %v3326_v28 = vpop.f32.mrb[25].mxu1 }
 0x23a   :  { %v938_v29 = vpop.f32.mrb[26].mxu1  ;;  %3459 = vmatpush3.bf16.msra.mxu1 %v4880_v19  ;;  %v4949_v28 = vrot.slane %v182_v21, %v190_v22 }
 0x23b   :  { %v3327_v30 = vpop.f32.mrb[27].mxu1  ;;  %3460 = vmatprep.subr.bf16.mxu1 %v4187_v0 }
 0x23c   :  { %1638 = vmatpush1.bf16.msra.mxu0 %v4865_v14 }
 0x23d   :  { %1639 = vmatprep.subr.bf16.mxu0 %v4871_v16 }
 0x23e   :  { %3461 = vmatpush3.bf16.msra.mxu1 %v4890_v24 }
 0x23f   :  { %3462 = vmatprep.subr.bf16.mxu1 %v4187_v0 }
 0x240   :  { %1640 = vmatpush1.bf16.msra.mxu0 %v4875_v17 }
 0x241   :  { %1738 = vmatprep.subr.bf16.mxu0 %v4800_v53 }
 0x242   :  { %3463 = vmatpush3.bf16.msra.mxu1 %v4895_v26 }
 0x243   :  { %3468 = vmatprep.subr.bf16.mxu1 %v4187_v0 }
 0x258   :  { %v4937_v31 = vpop.f32.mrb[28].mxu1 }
 0x259   :  { %v3346_v32 = vpop.f32.mrb[29].mxu1 }
 0x25a   :  { %v1025_v34 = vpop.f32.mrb[30].mxu1 }
 0x25b   :  { %v3347_v35 = vpop.f32.mrb[31].mxu1 }
 0x278   :  { %v4939_v36 = vpop.f32.mrb[32].mxu1 }
 0x279   :  { %v3366_v37 = vpop.f32.mrb[33].mxu1 }
 0x27a   :  { %v1112_v39 = vpop.f32.mrb[34].mxu1 }
 0x27b   :  { %v3367_v40 = vpop.f32.mrb[35].mxu1 }
 0x298   :  { %v4941_v41 = vpop.f32.mrb[36].mxu1 }
 0x299   :  { %v3386_v42 = vpop.f32.mrb[37].mxu1 }
 0x29a   :  { %v1199_v44 = vpop.f32.mrb[38].mxu1 }
 0x29b   :  { %v3387_v45 = vpop.f32.mrb[39].mxu1 }
 0x2b8   :  { %v4943_v46 = vpop.f32.mrb[40].mxu1 }
 0x2b9   :  { %v3406_v47 = vpop.f32.mrb[41].mxu1 }
 0x2ba   :  { %v1286_v49 = vpop.f32.mrb[42].mxu1 }
 0x2bb   :  { %v3407_v50 = vpop.f32.mrb[43].mxu1 }
 0x2bc   :  { %v194_v50 = vsub.s32 2, %v185_v60 }
 0x2d8   :  { %v4945_v51 = vpop.f32.mrb[44].mxu1 }
 0x2d9   :  { %v3426_v52 = vpop.f32.mrb[45].mxu1 }
 0x2da   :  { %v1373_v55 = vpop.f32.mrb[46].mxu1 }
 0x2db   :  { %v3427_v56 = vpop.f32.mrb[47].mxu1  ;;  %v4953_v55 = vld [vmem:[#allocation11] ss:$0 sm:$0xff] }
 0x2dc   :  { %v4955_v56 = vrot.slane %v182_v21, %v194_v50 }
 0x2f6   :  { %v1547_v25 = vpop.f32.mrb[0].mxu0 }
 0x2f7   :  { %v3668_v29 = vadd.f32 %v1547_v25, %v4947_v23  ;;  %v1549_v30 = vpop.f32.mrb[1].mxu0  ;;  %v415_v25 = vadd.f32 %v4653_v33, %v4955_v56 }
 0x2f8   :  { %v1551_v32 = vpop.f32.mrb[2].mxu0  ;;  %v3669_v37 = vadd.f32 %v1549_v30, %v4949_v28  ;;  %v1588_v40 = vpop.f32.mrb[48].mxu1 }
 0x2f9   :  { %v2948_v34 = vmul.f32 -1.442695, %v3668_v29  ;;  %v1552_v35 = vpop.f32.mrb[3].mxu0  ;;  %v3446_v42 = vpop.f32.mrb[49].mxu1  ;;  %v1608_v61 = vadd.f32 %v4953_v55, %v1588_v40 }
 0x2fa   :  { %v2949_v39 = vmul.f32 -1.442695, %v3669_v37  ;;  %v1591_v44 = vpop.f32.mrb[50].mxu1  ;;  %v4960_v35 = vpop.permute.xlu0 %208 }
 0x2fb   :  { %3821 = vpow2.f32 %v2948_v34  ;;  %v3447_v45 = vpop.f32.mrb[51].mxu1  ;;  %vm1616_vm1 = vcmp.gt.s32.totalorder %v4960_v35, 0  ;;  %vm1728_vm2 = vcmp.gt.s32.totalorder %v4960_v35, 1  ;;  %vm1841_vm3 = vcmp.gt.s32.totalorder %v4960_v35, 2 }
 0x2fc   :  { %3823 = vpow2.f32 %v2949_v39  ;;  %vm1954_vm4 = vcmp.gt.s32.totalorder %v4960_v35, 3  ;;  %vm2067_vm5 = vcmp.gt.s32.totalorder %v4960_v35, 4  ;;  %vm2180_vm6 = vcmp.gt.s32.totalorder %v4960_v35, 5 }
 0x2fd   :  { %vm2293_vm7 = vcmp.gt.s32.totalorder %v4960_v35, 6  ;;  %vm2406_vm8 = vcmp.gt.s32.totalorder %v4960_v35, 7  ;;  %vm2519_vm9 = vcmp.gt.s32.totalorder %v4960_v35, 8  ;;  %vm2632_vm10 = vcmp.gt.s32.totalorder %v4960_v35, 9 }
 0x2fe   :  { %vm2745_vm11 = vcmp.gt.s32.totalorder %v4960_v35, 10  ;;  %vm2858_vm12 = vcmp.gt.s32.totalorder %v4960_v35, 11 }
 0x305   :  { %v3822_v47 = vpop.eup %3821 }
 0x306   :  { %v1598_v49 = vadd.f32 1.0, %v3822_v47  ;;  %v3824_v52 = vpop.eup %3823 }
 0x307   :  { %v1605_v58 = vadd.f32 1.0, %v3824_v52 }
 0x308   :  { %3825 = vrcp.f32 %v1598_v49 }
 0x309   :  { %3827 = vrcp.f32 %v1605_v58 }
 0x312   :  { %v3826_v22 = vpop.eup %3825 }
 0x313   :  { %v1609_v29 = vmul.f32 %v3826_v22, %v1608_v61  ;;  %v3828_v32 = vpop.eup %3827 }
 0x314   :  { %v1612_v34 = vsub.f32 1.0, %v3828_v32  ;;  %v1614_v37 = vmul.f32 %v3828_v32, %v4877_v18 }
 0x315   :  { %v1610_v30 = vadd.f32 %v1609_v29, %v415_v25 }
 0x317   :  { %3829 = vtanh.f32 %v1610_v30 }
 0x321   :  { %v3830_v60 = vpop.eup %3829 }
 0x322   :  { %v1613_v21 = vmul.f32 %v3830_v60, %v1612_v34 }
 0x324   :  { %v1615_v39 = vadd.f32 %v1614_v37, %v1613_v21 }
 0x326   :  { %v1617_v40 = vsel %vm1616_vm1, %v1615_v39, 0.0  ;;  %v4965_v42 = vsel %vm1616_vm1, %v1615_v39, %v4877_v18 }
 0x327   :  { %v1618_v33 = vpack.c.bf16 %v1617_v40, %v1617_v40  ;;  %v1624_v44 = vpack.c.bf16 %v4965_v42, %v4965_v42  ;;  %v501_v40 = vadd.f32 %v4690_v38, %v4955_v56 }
 0x329   :  { %1619 = vst [vmem:[#allocation15] sm:$0xf] %v1618_v33  ;;  %1658 = vmatmul.mubr.bf16.vlgmr.msra.gmra.mrb[4].mxu0 %v1624_v44  ;;  %3465 = vmatmul.mubr.bf16.vlgmr.msra.gmra.mrb[52].mxu1 %v1624_v44 }
 0x32a   :  { %1739 = vmatpush1.bf16.msra.mxu0 %v4806_v57  ;;  %3469 = vmatpush3.bf16.msra.mxu1 %v4826_v3 }
 0x32b   :  { %1740 = vmatprep.subr.bf16.mxu0 %v4810_v59  ;;  %3470 = vmatprep.subr.bf16.mxu1 %v4187_v0 }
 0x32c   :  { %1770 = vmatprep.mubr.bf16.mxu0 %v4188_v1  ;;  %3484 = vmatprep.mubr.msk.bf16.mxu1 %vm4189_vm0, %v4187_v0 }
 0x32e   :  { %1741 = vmatpush1.bf16.msra.mxu0 %v4814_v62  ;;  %3471 = vmatpush3.bf16.msra.mxu1 %v4836_v6 }
 0x32f   :  { %1742 = vmatprep.subr.bf16.mxu0 %v4818_v63  ;;  %3472 = vmatprep.subr.bf16.mxu1 %v4187_v0 }
 0x332   :  { %1743 = vmatpush1.bf16.msra.mxu0 %v4823_v2  ;;  %3473 = vmatpush3.bf16.msra.mxu1 %v4848_v9 }
 0x333   :  { %1744 = vmatprep.subr.bf16.mxu0 %v4829_v4  ;;  %3474 = vmatprep.subr.bf16.mxu1 %v4187_v0 }
 0x336   :  { %1745 = vmatpush1.bf16.msra.mxu0 %v4833_v5  ;;  %3475 = vmatpush3.bf16.msra.mxu1 %v4858_v12 }
 0x337   :  { %1746 = vmatprep.subr.bf16.mxu0 %v4839_v7  ;;  %3476 = vmatprep.subr.bf16.mxu1 %v4187_v0 }
 0x33a   :  { %1747 = vmatpush1.bf16.msra.mxu0 %v4845_v8  ;;  %3477 = vmatpush3.bf16.msra.mxu1 %v4868_v15 }
 0x33b   :  { %1748 = vmatprep.subr.bf16.mxu0 %v4851_v10  ;;  %3478 = vmatprep.subr.bf16.mxu1 %v4187_v0 }
 0x33e   :  { %1749 = vmatpush1.bf16.msra.mxu0 %v4855_v11  ;;  %3479 = vmatpush3.bf16.msra.mxu1 %v4880_v19 }
 0x33f   :  { %1750 = vmatprep.subr.bf16.mxu0 %v4861_v13  ;;  %3480 = vmatprep.subr.bf16.mxu1 %v4187_v0 }
 0x342   :  { %1751 = vmatpush1.bf16.msra.mxu0 %v4865_v14  ;;  %3481 = vmatpush3.bf16.msra.mxu1 %v4890_v24 }
 0x343   :  { %1752 = vmatprep.subr.bf16.mxu0 %v4871_v16  ;;  %3482 = vmatprep.subr.bf16.mxu1 %v4187_v0 }
 0x346   :  { %1753 = vmatpush1.bf16.msra.mxu0 %v4875_v17  ;;  %3483 = vmatpush3.bf16.msra.mxu1 %v4895_v26 }
 0x347   :  { %1851 = vmatprep.subr.bf16.mxu0 %v4800_v53  ;;  %3488 = vmatprep.subr.bf16.mxu1 %v4187_v0 }
 0x3fc   :  { %v1659_v18 = vpop.f32.mrb[4].mxu0  ;;  %v1700_v45 = vpop.f32.mrb[52].mxu1 }
 0x3fd   :  { %v3670_v47 = vadd.f32 %v1659_v18, %v4947_v23  ;;  %v1661_v49 = vpop.f32.mrb[5].mxu0  ;;  %v3466_v50 = vpop.f32.mrb[53].mxu1  ;;  %v1720_v21 = vadd.f32 %v4953_v55, %v1700_v45 }
 0x3fe   :  { %v1663_v52 = vpop.f32.mrb[6].mxu0  ;;  %v1703_v58 = vpop.f32.mrb[54].mxu1  ;;  %v3671_v29 = vadd.f32 %v1661_v49, %v4949_v28 }
 0x3ff   :  { %v2950_v61 = vmul.f32 -1.442695, %v3670_v47  ;;  %v1664_v22 = vpop.f32.mrb[7].mxu0  ;;  %v3467_v25 = vpop.f32.mrb[55].mxu1 }
 0x400   :  { %v2951_v30 = vmul.f32 -1.442695, %v3671_v29 }
 0x401   :  { %3831 = vpow2.f32 %v2950_v61 }
 0x402   :  { %3833 = vpow2.f32 %v2951_v30 }
 0x40b   :  { %v3832_v32 = vpop.eup %3831 }
 0x40c   :  { %v1710_v34 = vadd.f32 1.0, %v3832_v32  ;;  %v3834_v60 = vpop.eup %3833 }
 0x40d   :  { %v1717_v37 = vadd.f32 1.0, %v3834_v60 }
 0x40e   :  { %3835 = vrcp.f32 %v1710_v34 }
 0x40f   :  { %3837 = vrcp.f32 %v1717_v37 }
 0x418   :  { %v3836_v39 = vpop.eup %3835 }
 0x419   :  { %v1721_v33 = vmul.f32 %v3836_v39, %v1720_v21  ;;  %v3838_v18 = vpop.eup %3837 }
 0x41a   :  { %v1724_v47 = vsub.f32 1.0, %v3838_v18  ;;  %v1726_v50 = vmul.f32 %v3838_v18, %v4965_v42 }
 0x41b   :  { %v1722_v44 = vadd.f32 %v1721_v33, %v501_v40 }
 0x41d   :  { %3839 = vtanh.f32 %v1722_v44 }
 0x427   :  { %v3840_v49 = vpop.eup %3839 }
 0x428   :  { %v1725_v52 = vmul.f32 %v3840_v49, %v1724_v47 }
 0x42a   :  { %v1727_v58 = vadd.f32 %v1726_v50, %v1725_v52 }
 0x42c   :  { %v1729_v61 = vsel %vm1728_vm2, %v1727_v58, 0.0  ;;  %v5012_v45 = vsel %vm1728_vm2, %v1727_v58, %v4965_v42  ;;  %v588_v58 = vadd.f32 %v4727_v43, %v4955_v56 }
 0x42d   :  { %v1730_v22 = vpack.c.bf16 %v1729_v61, %v1729_v61  ;;  %v1737_v38 = vpack.c.bf16 %v5012_v45, %v5012_v45 }
 0x42f   :  { %1732 = vst [vmem:[#allocation15 + $0x4] sm:$0xf] %v1730_v22  ;;  %1771 = vmatmul.mubr.bf16.vlgmr.msra.gmra.mrb[8].mxu0 %v1737_v38  ;;  %3485 = vmatmul.mubr.bf16.vlgmr.msra.gmra.mrb[56].mxu1 %v1737_v38 }
 0x430   :  { %1852 = vmatpush1.bf16.msra.mxu0 %v4806_v57  ;;  %3489 = vmatpush3.bf16.msra.mxu1 %v4826_v3 }
 0x431   :  { %1853 = vmatprep.subr.bf16.mxu0 %v4810_v59  ;;  %3490 = vmatprep.subr.bf16.mxu1 %v4187_v0 }
 0x432   :  { %1883 = vmatprep.mubr.bf16.mxu0 %v4188_v1  ;;  %3504 = vmatprep.mubr.msk.bf16.mxu1 %vm4189_vm0, %v4187_v0 }
 0x434   :  { %1854 = vmatpush1.bf16.msra.mxu0 %v4814_v62  ;;  %3491 = vmatpush3.bf16.msra.mxu1 %v4836_v6 }
 0x435   :  { %1855 = vmatprep.subr.bf16.mxu0 %v4818_v63  ;;  %3492 = vmatprep.subr.bf16.mxu1 %v4187_v0 }
 0x438   :  { %1856 = vmatpush1.bf16.msra.mxu0 %v4823_v2  ;;  %3493 = vmatpush3.bf16.msra.mxu1 %v4848_v9 }
 0x439   :  { %1857 = vmatprep.subr.bf16.mxu0 %v4829_v4  ;;  %3494 = vmatprep.subr.bf16.mxu1 %v4187_v0 }
 0x43c   :  { %1858 = vmatpush1.bf16.msra.mxu0 %v4833_v5  ;;  %3495 = vmatpush3.bf16.msra.mxu1 %v4858_v12 }
 0x43d   :  { %1859 = vmatprep.subr.bf16.mxu0 %v4839_v7  ;;  %3496 = vmatprep.subr.bf16.mxu1 %v4187_v0 }
 0x440   :  { %1860 = vmatpush1.bf16.msra.mxu0 %v4845_v8  ;;  %3497 = vmatpush3.bf16.msra.mxu1 %v4868_v15 }
 0x441   :  { %1861 = vmatprep.subr.bf16.mxu0 %v4851_v10  ;;  %3498 = vmatprep.subr.bf16.mxu1 %v4187_v0 }
 0x444   :  { %1862 = vmatpush1.bf16.msra.mxu0 %v4855_v11  ;;  %3499 = vmatpush3.bf16.msra.mxu1 %v4880_v19 }
 0x445   :  { %1863 = vmatprep.subr.bf16.mxu0 %v4861_v13  ;;  %3500 = vmatprep.subr.bf16.mxu1 %v4187_v0 }
 0x448   :  { %1864 = vmatpush1.bf16.msra.mxu0 %v4865_v14  ;;  %3501 = vmatpush3.bf16.msra.mxu1 %v4890_v24 }
 0x449   :  { %1865 = vmatprep.subr.bf16.mxu0 %v4871_v16  ;;  %3502 = vmatprep.subr.bf16.mxu1 %v4187_v0 }
 0x44c   :  { %1866 = vmatpush1.bf16.msra.mxu0 %v4875_v17  ;;  %3503 = vmatpush3.bf16.msra.mxu1 %v4895_v26 }
 0x44d   :  { %1964 = vmatprep.subr.bf16.mxu0 %v4800_v53  ;;  %3508 = vmatprep.subr.bf16.mxu1 %v4187_v0 }
 0x502   :  { %v1772_v42 = vpop.f32.mrb[8].mxu0  ;;  %v1813_v25 = vpop.f32.mrb[56].mxu1 }
 0x503   :  { %v3672_v29 = vadd.f32 %v1772_v42, %v4947_v23  ;;  %v1774_v30 = vpop.f32.mrb[9].mxu0  ;;  %v3486_v32 = vpop.f32.mrb[57].mxu1  ;;  %v1833_v50 = vadd.f32 %v4953_v55, %v1813_v25 }
 0x504   :  { %v1776_v34 = vpop.f32.mrb[10].mxu0  ;;  %v1816_v60 = vpop.f32.mrb[58].mxu1  ;;  %v3673_v40 = vadd.f32 %v1774_v30, %v4949_v28 }
 0x505   :  { %v2952_v37 = vmul.f32 -1.442695, %v3672_v29  ;;  %v1777_v21 = vpop.f32.mrb[11].mxu0  ;;  %v3487_v39 = vpop.f32.mrb[59].mxu1 }
 0x506   :  { %v2953_v33 = vmul.f32 -1.442695, %v3673_v40 }
 0x507   :  { %3841 = vpow2.f32 %v2952_v37 }
 0x508   :  { %3843 = vpow2.f32 %v2953_v33 }
 0x511   :  { %v3842_v44 = vpop.eup %3841 }
 0x512   :  { %v1823_v18 = vadd.f32 1.0, %v3842_v44  ;;  %v3844_v47 = vpop.eup %3843 }
 0x513   :  { %v1830_v49 = vadd.f32 1.0, %v3844_v47 }
 0x514   :  { %3845 = vrcp.f32 %v1823_v18 }
 0x515   :  { %3847 = vrcp.f32 %v1830_v49 }
 0x51e   :  { %v3846_v52 = vpop.eup %3845 }
 0x51f   :  { %v1834_v61 = vmul.f32 %v3846_v52, %v1833_v50  ;;  %v3848_v38 = vpop.eup %3847 }
 0x520   :  { %v1837_v42 = vsub.f32 1.0, %v3848_v38  ;;  %v1839_v30 = vmul.f32 %v3848_v38, %v5012_v45 }
 0x521   :  { %v1835_v22 = vadd.f32 %v1834_v61, %v588_v58 }
 0x523   :  { %3849 = vtanh.f32 %v1835_v22 }
 0x52d   :  { %v3850_v29 = vpop.eup %3849 }
 0x52e   :  { %v1838_v32 = vmul.f32 %v3850_v29, %v1837_v42 }
 0x530   :  { %v1840_v34 = vadd.f32 %v1839_v30, %v1838_v32  ;;  %v675_v32 = vadd.f32 %v4764_v48, %v4955_v56 }
 0x532   :  { %v1842_v60 = vsel %vm1841_vm3, %v1840_v34, 0.0  ;;  %v5059_v25 = vsel %vm1841_vm3, %v1840_v34, %v5012_v45 }
 0x533   :  { %v1843_v37 = vpack.c.bf16 %v1842_v60, %v1842_v60  ;;  %v1850_v43 = vpack.c.bf16 %v5059_v25, %v5059_v25 }
 0x535   :  { %1845 = vst [vmem:[#allocation15 + $0x8] sm:$0xf] %v1843_v37  ;;  %1884 = vmatmul.mubr.bf16.vlgmr.msra.gmra.mrb[12].mxu0 %v1850_v43  ;;  %3505 = vmatmul.mubr.bf16.vlgmr.msra.gmra.mrb[60].mxu1 %v1850_v43 }
 0x536   :  { %1965 = vmatpush1.bf16.msra.mxu0 %v4806_v57  ;;  %3509 = vmatpush3.bf16.msra.mxu1 %v4826_v3 }
 0x537   :  { %1966 = vmatprep.subr.bf16.mxu0 %v4810_v59  ;;  %3510 = vmatprep.subr.bf16.mxu1 %v4187_v0 }
 0x538   :  { %1996 = vmatprep.mubr.bf16.mxu0 %v4188_v1  ;;  %3524 = vmatprep.mubr.msk.bf16.mxu1 %vm4189_vm0, %v4187_v0 }
 0x53a   :  { %1967 = vmatpush1.bf16.msra.mxu0 %v4814_v62  ;;  %3511 = vmatpush3.bf16.msra.mxu1 %v4836_v6 }
 0x53b   :  { %1968 = vmatprep.subr.bf16.mxu0 %v4818_v63  ;;  %3512 = vmatprep.subr.bf16.mxu1 %v4187_v0 }
 0x53e   :  { %1969 = vmatpush1.bf16.msra.mxu0 %v4823_v2  ;;  %3513 = vmatpush3.bf16.msra.mxu1 %v4848_v9 }
 0x53f   :  { %1970 = vmatprep.subr.bf16.mxu0 %v4829_v4  ;;  %3514 = vmatprep.subr.bf16.mxu1 %v4187_v0 }
 0x542   :  { %1971 = vmatpush1.bf16.msra.mxu0 %v4833_v5  ;;  %3515 = vmatpush3.bf16.msra.mxu1 %v4858_v12 }
 0x543   :  { %1972 = vmatprep.subr.bf16.mxu0 %v4839_v7  ;;  %3516 = vmatprep.subr.bf16.mxu1 %v4187_v0 }
 0x546   :  { %1973 = vmatpush1.bf16.msra.mxu0 %v4845_v8  ;;  %3517 = vmatpush3.bf16.msra.mxu1 %v4868_v15 }
 0x547   :  { %1974 = vmatprep.subr.bf16.mxu0 %v4851_v10  ;;  %3518 = vmatprep.subr.bf16.mxu1 %v4187_v0 }
 0x54a   :  { %1975 = vmatpush1.bf16.msra.mxu0 %v4855_v11  ;;  %3519 = vmatpush3.bf16.msra.mxu1 %v4880_v19 }
 0x54b   :  { %1976 = vmatprep.subr.bf16.mxu0 %v4861_v13  ;;  %3520 = vmatprep.subr.bf16.mxu1 %v4187_v0 }
 0x54e   :  { %1977 = vmatpush1.bf16.msra.mxu0 %v4865_v14  ;;  %3521 = vmatpush3.bf16.msra.mxu1 %v4890_v24 }
 0x54f   :  { %1978 = vmatprep.subr.bf16.mxu0 %v4871_v16  ;;  %3522 = vmatprep.subr.bf16.mxu1 %v4187_v0 }
 0x552   :  { %1979 = vmatpush1.bf16.msra.mxu0 %v4875_v17  ;;  %3523 = vmatpush3.bf16.msra.mxu1 %v4895_v26 }
 0x553   :  { %2077 = vmatprep.subr.bf16.mxu0 %v4800_v53  ;;  %3528 = vmatprep.subr.bf16.mxu1 %v4187_v0 }
 0x608   :  { %v1885_v45 = vpop.f32.mrb[12].mxu0  ;;  %v1926_v21 = vpop.f32.mrb[60].mxu1 }
 0x609   :  { %v3674_v39 = vadd.f32 %v1885_v45, %v4947_v23  ;;  %v1887_v40 = vpop.f32.mrb[13].mxu0  ;;  %v3506_v33 = vpop.f32.mrb[61].mxu1  ;;  %v1946_v29 = vadd.f32 %v4953_v55, %v1926_v21 }
 0x60a   :  { %v1889_v44 = vpop.f32.mrb[14].mxu0  ;;  %v1929_v18 = vpop.f32.mrb[62].mxu1  ;;  %v3675_v52 = vadd.f32 %v1887_v40, %v4949_v28 }
 0x60b   :  { %v2954_v47 = vmul.f32 -1.442695, %v3674_v39  ;;  %v1890_v49 = vpop.f32.mrb[15].mxu0  ;;  %v3507_v50 = vpop.f32.mrb[63].mxu1 }
 0x60c   :  { %v2955_v58 = vmul.f32 -1.442695, %v3675_v52 }
 0x60d   :  { %3851 = vpow2.f32 %v2954_v47 }
 0x60e   :  { %3853 = vpow2.f32 %v2955_v58 }
 0x617   :  { %v3852_v61 = vpop.eup %3851 }
 0x618   :  { %v1936_v22 = vadd.f32 1.0, %v3852_v61  ;;  %v3854_v38 = vpop.eup %3853 }
 0x619   :  { %v1943_v42 = vadd.f32 1.0, %v3854_v38 }
 0x61a   :  { %3855 = vrcp.f32 %v1936_v22 }
 0x61b   :  { %3857 = vrcp.f32 %v1943_v42 }
 0x624   :  { %v3856_v30 = vpop.eup %3855 }
 0x625   :  { %v1947_v34 = vmul.f32 %v3856_v30, %v1946_v29  ;;  %v3858_v37 = vpop.eup %3857 }
 0x626   :  { %v1950_v43 = vsub.f32 1.0, %v3858_v37  ;;  %v1952_v39 = vmul.f32 %v3858_v37, %v5059_v25 }
 0x627   :  { %v1948_v60 = vadd.f32 %v1947_v34, %v675_v32 }
 0x629   :  { %3859 = vtanh.f32 %v1948_v60 }
 0x633   :  { %v3860_v45 = vpop.eup %3859 }
 0x634   :  { %v1951_v40 = vmul.f32 %v3860_v45, %v1950_v43  ;;  %v762_v45 = vadd.f32 %v4803_v54, %v4955_v56 }
 0x636   :  { %v1953_v33 = vadd.f32 %v1952_v39, %v1951_v40 }
 0x638   :  { %v1955_v44 = vsel %vm1954_vm4, %v1953_v33, 0.0  ;;  %v5106_v21 = vsel %vm1954_vm4, %v1953_v33, %v5059_v25 }
 0x639   :  { %v1956_v18 = vpack.c.bf16 %v1955_v44, %v1955_v44  ;;  %v1963_v48 = vpack.c.bf16 %v5106_v21, %v5106_v21 }
 0x63b   :  { %1958 = vst [vmem:[#allocation15 + $0xc] sm:$0xf] %v1956_v18  ;;  %1997 = vmatmul.mubr.bf16.vlgmr.msra.gmra.mrb[16].mxu0 %v1963_v48  ;;  %3525 = vmatmul.mubr.bf16.vlgmr.msra.gmra.mrb[64].mxu1 %v1963_v48 }
 0x63c   :  { %2078 = vmatpush1.bf16.msra.mxu0 %v4806_v57  ;;  %3529 = vmatpush3.bf16.msra.mxu1 %v4826_v3 }
 0x63d   :  { %2079 = vmatprep.subr.bf16.mxu0 %v4810_v59  ;;  %3530 = vmatprep.subr.bf16.mxu1 %v4187_v0 }
 0x63e   :  { %2109 = vmatprep.mubr.bf16.mxu0 %v4188_v1  ;;  %3544 = vmatprep.mubr.msk.bf16.mxu1 %vm4189_vm0, %v4187_v0 }
 0x640   :  { %2080 = vmatpush1.bf16.msra.mxu0 %v4814_v62  ;;  %3531 = vmatpush3.bf16.msra.mxu1 %v4836_v6 }
 0x641   :  { %2081 = vmatprep.subr.bf16.mxu0 %v4818_v63  ;;  %3532 = vmatprep.subr.bf16.mxu1 %v4187_v0 }
 0x644   :  { %2082 = vmatpush1.bf16.msra.mxu0 %v4823_v2  ;;  %3533 = vmatpush3.bf16.msra.mxu1 %v4848_v9 }
 0x645   :  { %2083 = vmatprep.subr.bf16.mxu0 %v4829_v4  ;;  %3534 = vmatprep.subr.bf16.mxu1 %v4187_v0 }
 0x648   :  { %2084 = vmatpush1.bf16.msra.mxu0 %v4833_v5  ;;  %3535 = vmatpush3.bf16.msra.mxu1 %v4858_v12 }
 0x649   :  { %2085 = vmatprep.subr.bf16.mxu0 %v4839_v7  ;;  %3536 = vmatprep.subr.bf16.mxu1 %v4187_v0 }
 0x64c   :  { %2086 = vmatpush1.bf16.msra.mxu0 %v4845_v8  ;;  %3537 = vmatpush3.bf16.msra.mxu1 %v4868_v15 }
 0x64d   :  { %2087 = vmatprep.subr.bf16.mxu0 %v4851_v10  ;;  %3538 = vmatprep.subr.bf16.mxu1 %v4187_v0 }
 0x650   :  { %2088 = vmatpush1.bf16.msra.mxu0 %v4855_v11  ;;  %3539 = vmatpush3.bf16.msra.mxu1 %v4880_v19 }
 0x651   :  { %2089 = vmatprep.subr.bf16.mxu0 %v4861_v13  ;;  %3540 = vmatprep.subr.bf16.mxu1 %v4187_v0 }
 0x654   :  { %2090 = vmatpush1.bf16.msra.mxu0 %v4865_v14  ;;  %3541 = vmatpush3.bf16.msra.mxu1 %v4890_v24 }
 0x655   :  { %2091 = vmatprep.subr.bf16.mxu0 %v4871_v16  ;;  %3542 = vmatprep.subr.bf16.mxu1 %v4187_v0 }
 0x658   :  { %2092 = vmatpush1.bf16.msra.mxu0 %v4875_v17  ;;  %3543 = vmatpush3.bf16.msra.mxu1 %v4895_v26 }
 0x659   :  { %2190 = vmatprep.subr.bf16.mxu0 %v4800_v53  ;;  %3548 = vmatprep.subr.bf16.mxu1 %v4187_v0 }
 0x70e   :  { %v1998_v25 = vpop.f32.mrb[16].mxu0  ;;  %v2039_v47 = vpop.f32.mrb[64].mxu1 }
 0x70f   :  { %v3676_v49 = vadd.f32 %v1998_v25, %v4947_v23  ;;  %v2000_v50 = vpop.f32.mrb[17].mxu0  ;;  %v3526_v52 = vpop.f32.mrb[65].mxu1  ;;  %v2059_v37 = vadd.f32 %v4953_v55, %v2039_v47 }
 0x710   :  { %v2002_v58 = vpop.f32.mrb[18].mxu0  ;;  %v2042_v61 = vpop.f32.mrb[66].mxu1  ;;  %v3677_v29 = vadd.f32 %v2000_v50, %v4949_v28 }
 0x711   :  { %v2956_v22 = vmul.f32 -1.442695, %v3676_v49  ;;  %v2003_v38 = vpop.f32.mrb[19].mxu0  ;;  %v3527_v42 = vpop.f32.mrb[67].mxu1 }
 0x712   :  { %v2957_v30 = vmul.f32 -1.442695, %v3677_v29 }
 0x713   :  { %3861 = vpow2.f32 %v2956_v22 }
 0x714   :  { %3863 = vpow2.f32 %v2957_v30 }
 0x71d   :  { %v3862_v32 = vpop.eup %3861 }
 0x71e   :  { %v2049_v53 = vadd.f32 1.0, %v3862_v32  ;;  %v3864_v34 = vpop.eup %3863  ;;  %v5206_v32 = vld [vmem:[#allocation8] ss:$12 sps:$4 sm:$0xff]  }
 0x71f   :  { %v2056_v60 = vadd.f32 1.0, %v3864_v34  ;;  %v5212_v34 = vld [vmem:[#allocation8 + $0x1c] ss:$12 sps:$4 sm:$0xff]  }
 0x720   :  { %3865 = vrcp.f32 %v2049_v53  ;;  %v5209_v53 = vld [vmem:[#allocation8 + $0x8] ss:$12 sps:$4 sm:$0xff]  }
 0x721   :  { %3867 = vrcp.f32 %v2056_v60  ;;  %v5219_v60 = vld [vmem:[#allocation8 + $0x18] ss:$12 sps:$4 sm:$0xff]  }
 0x72a   :  { %v3866_v43 = vpop.eup %3865 }
 0x72b   :  { %v2060_v39 = vmul.f32 %v3866_v43, %v2059_v37  ;;  %v3868_v33 = vpop.eup %3867  ;;  %v5222_v37 = vld [vmem:[#allocation8 + $0x20] ss:$12 sps:$4 sm:$0xff]  }
 0x72c   :  { %v2063_v44 = vsub.f32 1.0, %v3868_v33  ;;  %v2065_v48 = vmul.f32 %v3868_v33, %v5106_v21  ;;  %v5225_v43 = vld [vmem:[#allocation8 + $0x34] ss:$12 sps:$4 sm:$0xff]  }
 0x72d   :  { %v2061_v40 = vadd.f32 %v2060_v39, %v762_v45  ;;  %v5229_v45 = vld [vmem:[#allocation8 + $0x30] ss:$12 sps:$4 sm:$0xff]   ;;  %v5232_v39 = vld [vmem:[#allocation8 + $0x38] ss:$12 sps:$4 sm:$0xff]   ;;  %v5239_v33 = vld [vmem:[#allocation8 + $0x48] ss:$12 sps:$4 sm:$0xff]  }
 0x72f   :  { %3869 = vtanh.f32 %v2061_v40  ;;  %v5235_v40 = vld [vmem:[#allocation8 + $0x4c] ss:$12 sps:$4 sm:$0xff]  }
 0x739   :  { %v3870_v18 = vpop.eup %3869 }
 0x73a   :  { %v2064_v25 = vmul.f32 %v3870_v18, %v2063_v44  ;;  %v5242_v44 = vld [vmem:[#allocation8 + $0x50] ss:$12 sps:$4 sm:$0xff]  }
 0x73b   :  { %v5245_v18 = vld [vmem:[#allocation8 + $0x64] ss:$12 sps:$4 sm:$0xff]  }
 0x73c   :  { %v2066_v49 = vadd.f32 %v2065_v48, %v2064_v25  ;;  %v5249_v48 = vld [vmem:[#allocation8 + $0x60] ss:$12 sps:$4 sm:$0xff]   ;;  %v5252_v25 = vld [vmem:[#allocation8 + $0x68] ss:$12 sps:$4 sm:$0xff]  }
 0x73e   :  { %v2068_v50 = vsel %vm2067_vm5, %v2066_v49, 0.0  ;;  %v5153_v47 = vsel %vm2067_vm5, %v2066_v49, %v5106_v21  ;;  %v5255_v49 = vld [vmem:[#allocation8 + $0x7c] ss:$12 sps:$4 sm:$0xff]  }
 0x73f   :  { %v2069_v52 = vpack.c.bf16 %v2068_v50, %v2068_v50  ;;  %v2076_v54 = vpack.c.bf16 %v5153_v47, %v5153_v47  ;;  %v5259_v50 = vld [vmem:[#allocation8 + $0x78] ss:$12 sps:$4 sm:$0xff]  }
 0x741   :  { %2071 = vst [vmem:[#allocation15 + $0x10] sm:$0xf] %v2069_v52  ;;  %2110 = vmatmul.mubr.bf16.vlgmr.msra.gmra.mrb[20].mxu0 %v2076_v54  ;;  %3545 = vmatmul.mubr.bf16.vlgmr.msra.gmra.mrb[68].mxu1 %v2076_v54  ;;  %v5265_v52 = vld [vmem:[#allocation8 + $0x94] ss:$12 sps:$4 sm:$0xff]   ;;  %v5269_v54 = vld [vmem:[#allocation8 + $0x90] ss:$12 sps:$4 sm:$0xff]  }
 0x742   :  { %2191 = vmatpush1.bf16.msra.mxu0 %v4806_v57  ;;  %3549 = vmatpush3.bf16.msra.mxu1 %v4826_v3  ;;  %v5190_v57 = vld [vmem:[#allocation8 + $0x4] ss:$12 sps:$4 sm:$0xff]  }
 0x743   :  { %2192 = vmatprep.subr.bf16.mxu0 %v4810_v59  ;;  %3550 = vmatprep.subr.bf16.mxu1 %v4187_v0 }
 0x744   :  { %2222 = vmatprep.mubr.bf16.mxu0 %v4188_v1  ;;  %3564 = vmatprep.mubr.msk.bf16.mxu1 %vm4189_vm0, %v4187_v0 }
 0x746   :  { %2193 = vmatpush1.bf16.msra.mxu0 %v4814_v62  ;;  %3551 = vmatpush3.bf16.msra.mxu1 %v4836_v6 }
 0x747   :  { %2194 = vmatprep.subr.bf16.mxu0 %v4818_v63  ;;  %3552 = vmatprep.subr.bf16.mxu1 %v4187_v0 }
 0x74a   :  { %2195 = vmatpush1.bf16.msra.mxu0 %v4823_v2  ;;  %3553 = vmatpush3.bf16.msra.mxu1 %v4848_v9 }
 0x74b   :  { %2196 = vmatprep.subr.bf16.mxu0 %v4829_v4  ;;  %3554 = vmatprep.subr.bf16.mxu1 %v4187_v0 }
 0x74e   :  { %2197 = vmatpush1.bf16.msra.mxu0 %v4833_v5  ;;  %3555 = vmatpush3.bf16.msra.mxu1 %v4858_v12 }
 0x74f   :  { %2198 = vmatprep.subr.bf16.mxu0 %v4839_v7  ;;  %3556 = vmatprep.subr.bf16.mxu1 %v4187_v0 }
 0x752   :  { %2199 = vmatpush1.bf16.msra.mxu0 %v4845_v8  ;;  %3557 = vmatpush3.bf16.msra.mxu1 %v4868_v15 }
 0x753   :  { %2200 = vmatprep.subr.bf16.mxu0 %v4851_v10  ;;  %3558 = vmatprep.subr.bf16.mxu1 %v4187_v0 }
 0x756   :  { %2201 = vmatpush1.bf16.msra.mxu0 %v4855_v11  ;;  %3559 = vmatpush3.bf16.msra.mxu1 %v4880_v19 }
 0x757   :  { %2202 = vmatprep.subr.bf16.mxu0 %v4861_v13  ;;  %3560 = vmatprep.subr.bf16.mxu1 %v4187_v0 }
 0x75a   :  { %2203 = vmatpush1.bf16.msra.mxu0 %v4865_v14  ;;  %3561 = vmatpush3.bf16.msra.mxu1 %v4890_v24 }
 0x75b   :  { %2204 = vmatprep.subr.bf16.mxu0 %v4871_v16  ;;  %3562 = vmatprep.subr.bf16.mxu1 %v4187_v0 }
 0x75e   :  { %2205 = vmatpush1.bf16.msra.mxu0 %v4875_v17  ;;  %3563 = vmatpush3.bf16.msra.mxu1 %v4895_v26  ;;  %v849_v17 = vadd.f32 %v4884_v20, %v4955_v56 }
 0x75f   :  { %2303 = vmatprep.subr.bf16.mxu0 %v5190_v57  ;;  %3568 = vmatprep.subr.bf16.mxu1 %v4187_v0 }
 0x814   :  { %v2111_v59 = vpop.f32.mrb[20].mxu0  ;;  %v2152_v62 = vpop.f32.mrb[68].mxu1 }
 0x815   :  { %v3678_v63 = vadd.f32 %v2111_v59, %v4947_v23  ;;  %v2113_v2 = vpop.f32.mrb[21].mxu0  ;;  %v3546_v3 = vpop.f32.mrb[69].mxu1  ;;  %v2172_v15 = vadd.f32 %v4953_v55, %v2152_v62  ;;  %v5272_v59 = vld [vmem:[#allocation8 + $0x98] ss:$12 sps:$4 sm:$0xff]  }
 0x816   :  { %v2115_v4 = vpop.f32.mrb[22].mxu0  ;;  %v2155_v5 = vpop.f32.mrb[70].mxu1  ;;  %v3679_v9 = vadd.f32 %v2113_v2, %v4949_v28  ;;  %v5275_v62 = vld [vmem:[#allocation8 + $0xac] ss:$12 sps:$4 sm:$0xff]   ;;  %v5282_v2 = vld [vmem:[#allocation8 + $0xb0] ss:$12 sps:$4 sm:$0xff]  }
 0x817   :  { %v2958_v6 = vmul.f32 -1.442695, %v3678_v63  ;;  %v2116_v7 = vpop.f32.mrb[23].mxu0  ;;  %v3547_v8 = vpop.f32.mrb[71].mxu1  ;;  %v5279_v63 = vld [vmem:[#allocation8 + $0xa8] ss:$12 sps:$4 sm:$0xff]  }
 0x818   :  { %v2959_v10 = vmul.f32 -1.442695, %v3679_v9 }
 0x819   :  { %3871 = vpow2.f32 %v2958_v6 }
 0x81a   :  { %3873 = vpow2.f32 %v2959_v10 }
 0x823   :  { %v3872_v11 = vpop.eup %3871 }
 0x824   :  { %v2162_v12 = vadd.f32 1.0, %v3872_v11  ;;  %v3874_v13 = vpop.eup %3873 }
 0x825   :  { %v2169_v14 = vadd.f32 1.0, %v3874_v13 }
 0x826   :  { %3875 = vrcp.f32 %v2162_v12 }
 0x827   :  { %3877 = vrcp.f32 %v2169_v14 }
 0x830   :  { %v3876_v16 = vpop.eup %3875 }
 0x831   :  { %v2173_v19 = vmul.f32 %v3876_v16, %v2172_v15  ;;  %v3878_v26 = vpop.eup %3877 }
 0x832   :  { %v2176_v21 = vsub.f32 1.0, %v3878_v26  ;;  %v2178_v61 = vmul.f32 %v3878_v26, %v5153_v47 }
 0x833   :  { %v2174_v24 = vadd.f32 %v2173_v19, %v849_v17 }
 0x835   :  { %3879 = vtanh.f32 %v2174_v24 }
 0x83f   :  { %v3880_v58 = vpop.eup %3879 }
 0x840   :  { %v2177_v22 = vmul.f32 %v3880_v58, %v2176_v21  ;;  %v936_v21 = vadd.f32 %v4927_v27, %v4955_v56 }
 0x842   :  { %v2179_v38 = vadd.f32 %v2178_v61, %v2177_v22 }
 0x844   :  { %v2181_v42 = vsel %vm2180_vm6, %v2179_v38, 0.0  ;;  %v5202_v29 = vsel %vm2180_vm6, %v2179_v38, %v5153_v47  ;;  %v5262_v47 = vld [vmem:[#allocation8 + $0x80] ss:$12 sps:$4 sm:$0xff]  }
 0x845   :  { %v2182_v30 = vpack.c.bf16 %v2181_v42, %v2181_v42  ;;  %v2189_v20 = vpack.c.bf16 %v5202_v29, %v5202_v29 }
 0x847   :  { %2184 = vst [vmem:[#allocation15 + $0x14] sm:$0xf] %v2182_v30  ;;  %2223 = vmatmul.mubr.bf16.vlgmr.msra.gmra.mrb[24].mxu0 %v2189_v20  ;;  %3565 = vmatmul.mubr.bf16.vlgmr.msra.gmra.mrb[72].mxu1 %v2189_v20 }
 0x848   :  { %2304 = vmatpush1.bf16.msra.mxu0 %v5206_v32  ;;  %3569 = vmatpush3.bf16.msra.mxu1 %v5209_v53 }
 0x849   :  { %2305 = vmatprep.subr.bf16.mxu0 %v5212_v34  ;;  %3570 = vmatprep.subr.bf16.mxu1 %v4187_v0 }
 0x84a   :  { %2335 = vmatprep.mubr.bf16.mxu0 %v4188_v1  ;;  %3584 = vmatprep.mubr.msk.bf16.mxu1 %vm4189_vm0, %v4187_v0 }
 0x84c   :  { %2306 = vmatpush1.bf16.msra.mxu0 %v5219_v60  ;;  %3571 = vmatpush3.bf16.msra.mxu1 %v5222_v37 }
 0x84d   :  { %2307 = vmatprep.subr.bf16.mxu0 %v5225_v43  ;;  %3572 = vmatprep.subr.bf16.mxu1 %v4187_v0 }
 0x850   :  { %2308 = vmatpush1.bf16.msra.mxu0 %v5229_v45  ;;  %3573 = vmatpush3.bf16.msra.mxu1 %v5232_v39 }
 0x851   :  { %2309 = vmatprep.subr.bf16.mxu0 %v5235_v40  ;;  %3574 = vmatprep.subr.bf16.mxu1 %v4187_v0 }
 0x854   :  { %2310 = vmatpush1.bf16.msra.mxu0 %v5239_v33  ;;  %3575 = vmatpush3.bf16.msra.mxu1 %v5242_v44 }
 0x855   :  { %2311 = vmatprep.subr.bf16.mxu0 %v5245_v18  ;;  %3576 = vmatprep.subr.bf16.mxu1 %v4187_v0 }
 0x858   :  { %2312 = vmatpush1.bf16.msra.mxu0 %v5249_v48  ;;  %3577 = vmatpush3.bf16.msra.mxu1 %v5252_v25 }
 0x859   :  { %2313 = vmatprep.subr.bf16.mxu0 %v5255_v49  ;;  %3578 = vmatprep.subr.bf16.mxu1 %v4187_v0 }
 0x85c   :  { %2314 = vmatpush1.bf16.msra.mxu0 %v5259_v50  ;;  %3579 = vmatpush3.bf16.msra.mxu1 %v5262_v47 }
 0x85d   :  { %2315 = vmatprep.subr.bf16.mxu0 %v5265_v52  ;;  %3580 = vmatprep.subr.bf16.mxu1 %v4187_v0 }
 0x860   :  { %2316 = vmatpush1.bf16.msra.mxu0 %v5269_v54  ;;  %3581 = vmatpush3.bf16.msra.mxu1 %v5272_v59 }
 0x861   :  { %2317 = vmatprep.subr.bf16.mxu0 %v5275_v62  ;;  %3582 = vmatprep.subr.bf16.mxu1 %v4187_v0 }
 0x864   :  { %2318 = vmatpush1.bf16.msra.mxu0 %v5279_v63  ;;  %3583 = vmatpush3.bf16.msra.mxu1 %v5282_v2 }
 0x865   :  { %2416 = vmatprep.subr.bf16.mxu0 %v5190_v57  ;;  %3588 = vmatprep.subr.bf16.mxu1 %v4187_v0 }
 0x91a   :  { %v2224_v3 = vpop.f32.mrb[24].mxu0  ;;  %v2265_v4 = vpop.f32.mrb[72].mxu1 }
 0x91b   :  { %v3680_v5 = vadd.f32 %v2224_v3, %v4947_v23  ;;  %v2226_v6 = vpop.f32.mrb[25].mxu0  ;;  %v3566_v7 = vpop.f32.mrb[73].mxu1  ;;  %v2285_v24 = vadd.f32 %v4953_v55, %v2265_v4 }
 0x91c   :  { %v2228_v8 = vpop.f32.mrb[26].mxu0  ;;  %v2268_v9 = vpop.f32.mrb[74].mxu1  ;;  %v3681_v13 = vadd.f32 %v2226_v6, %v4949_v28 }
 0x91d   :  { %v2960_v10 = vmul.f32 -1.442695, %v3680_v5  ;;  %v2229_v11 = vpop.f32.mrb[27].mxu0  ;;  %v3567_v12 = vpop.f32.mrb[75].mxu1 }
 0x91e   :  { %v2961_v14 = vmul.f32 -1.442695, %v3681_v13 }
 0x91f   :  { %3881 = vpow2.f32 %v2960_v10 }
 0x920   :  { %3883 = vpow2.f32 %v2961_v14 }
 0x929   :  { %v3882_v15 = vpop.eup %3881 }
 0x92a   :  { %v2275_v16 = vadd.f32 1.0, %v3882_v15  ;;  %v3884_v17 = vpop.eup %3883 }
 0x92b   :  { %v2282_v19 = vadd.f32 1.0, %v3884_v17 }
 0x92c   :  { %3885 = vrcp.f32 %v2275_v16 }
 0x92d   :  { %3887 = vrcp.f32 %v2282_v19 }
 0x936   :  { %v3886_v26 = vpop.eup %3885 }
 0x937   :  { %v2286_v58 = vmul.f32 %v3886_v26, %v2285_v24  ;;  %v3888_v22 = vpop.eup %3887 }
 0x938   :  { %v2289_v38 = vsub.f32 1.0, %v3888_v22  ;;  %v2291_v30 = vmul.f32 %v3888_v22, %v5202_v29  ;;  %v1023_v22 = vadd.f32 %v4937_v31, %v4955_v56 }
 0x939   :  { %v2287_v61 = vadd.f32 %v2286_v58, %v936_v21  ;;  %v5336_v21 = vld [vmem:[#allocation11] ss:$0 sm:$0xff] }
 0x93b   :  { %3889 = vtanh.f32 %v2287_v61 }
 0x945   :  { %v3890_v42 = vpop.eup %3889 }
 0x946   :  { %v2290_v20 = vmul.f32 %v3890_v42, %v2289_v38 }
 0x948   :  { %v2292_v3 = vadd.f32 %v2291_v30, %v2290_v20 }
 0x94a   :  { %v2294_v5 = vsel %vm2293_vm7, %v2292_v3, 0.0  ;;  %v5295_v55 = vsel %vm2293_vm7, %v2292_v3, %v5202_v29 }
 0x94b   :  { %v2295_v4 = vpack.c.bf16 %v2294_v5, %v2294_v5  ;;  %v2302_v27 = vpack.c.bf16 %v5295_v55, %v5295_v55 }
 0x94d   :  { %2297 = vst [vmem:[#allocation15 + $0x18] sm:$0xf] %v2295_v4  ;;  %2336 = vmatmul.mubr.bf16.vlgmr.msra.gmra.mrb[28].mxu0 %v2302_v27  ;;  %3585 = vmatmul.mubr.bf16.vlgmr.msra.gmra.mrb[76].mxu1 %v2302_v27 }
 0x94e   :  { %2417 = vmatpush1.bf16.msra.mxu0 %v5206_v32  ;;  %3589 = vmatpush3.bf16.msra.mxu1 %v5209_v53 }
 0x94f   :  { %2418 = vmatprep.subr.bf16.mxu0 %v5212_v34  ;;  %3590 = vmatprep.subr.bf16.mxu1 %v4187_v0 }
 0x950   :  { %2448 = vmatprep.mubr.bf16.mxu0 %v4188_v1  ;;  %3604 = vmatprep.mubr.msk.bf16.mxu1 %vm4189_vm0, %v4187_v0 }
 0x952   :  { %2419 = vmatpush1.bf16.msra.mxu0 %v5219_v60  ;;  %3591 = vmatpush3.bf16.msra.mxu1 %v5222_v37 }
 0x953   :  { %2420 = vmatprep.subr.bf16.mxu0 %v5225_v43  ;;  %3592 = vmatprep.subr.bf16.mxu1 %v4187_v0 }
 0x956   :  { %2421 = vmatpush1.bf16.msra.mxu0 %v5229_v45  ;;  %3593 = vmatpush3.bf16.msra.mxu1 %v5232_v39 }
 0x957   :  { %2422 = vmatprep.subr.bf16.mxu0 %v5235_v40  ;;  %3594 = vmatprep.subr.bf16.mxu1 %v4187_v0 }
 0x95a   :  { %2423 = vmatpush1.bf16.msra.mxu0 %v5239_v33  ;;  %3595 = vmatpush3.bf16.msra.mxu1 %v5242_v44 }
 0x95b   :  { %2424 = vmatprep.subr.bf16.mxu0 %v5245_v18  ;;  %3596 = vmatprep.subr.bf16.mxu1 %v4187_v0 }
 0x95e   :  { %2425 = vmatpush1.bf16.msra.mxu0 %v5249_v48  ;;  %3597 = vmatpush3.bf16.msra.mxu1 %v5252_v25 }
 0x95f   :  { %2426 = vmatprep.subr.bf16.mxu0 %v5255_v49  ;;  %3598 = vmatprep.subr.bf16.mxu1 %v4187_v0 }
 0x962   :  { %2427 = vmatpush1.bf16.msra.mxu0 %v5259_v50  ;;  %3599 = vmatpush3.bf16.msra.mxu1 %v5262_v47 }
 0x963   :  { %2428 = vmatprep.subr.bf16.mxu0 %v5265_v52  ;;  %3600 = vmatprep.subr.bf16.mxu1 %v4187_v0 }
 0x966   :  { %2429 = vmatpush1.bf16.msra.mxu0 %v5269_v54  ;;  %3601 = vmatpush3.bf16.msra.mxu1 %v5272_v59 }
 0x967   :  { %2430 = vmatprep.subr.bf16.mxu0 %v5275_v62  ;;  %3602 = vmatprep.subr.bf16.mxu1 %v4187_v0 }
 0x96a   :  { %2431 = vmatpush1.bf16.msra.mxu0 %v5279_v63  ;;  %3603 = vmatpush3.bf16.msra.mxu1 %v5282_v2 }
 0x96b   :  { %2529 = vmatprep.subr.bf16.mxu0 %v5190_v57  ;;  %3608 = vmatprep.subr.bf16.mxu1 %v4187_v0 }
 0xa20   :  { %v2337_v29 = vpop.f32.mrb[28].mxu0  ;;  %v2378_v6 = vpop.f32.mrb[76].mxu1 }
 0xa21   :  { %v3682_v7 = vadd.f32 %v2337_v29, %v4947_v23  ;;  %v2339_v8 = vpop.f32.mrb[29].mxu0  ;;  %v3586_v9 = vpop.f32.mrb[77].mxu1  ;;  %v2398_v58 = vadd.f32 %v5336_v21, %v2378_v6 }
 0xa22   :  { %v2341_v10 = vpop.f32.mrb[30].mxu0  ;;  %v2381_v11 = vpop.f32.mrb[78].mxu1  ;;  %v3683_v15 = vadd.f32 %v2339_v8, %v4949_v28 }
 0xa23   :  { %v2962_v12 = vmul.f32 -1.442695, %v3682_v7  ;;  %v2342_v13 = vpop.f32.mrb[31].mxu0  ;;  %v3587_v14 = vpop.f32.mrb[79].mxu1 }
 0xa24   :  { %v2963_v16 = vmul.f32 -1.442695, %v3683_v15 }
 0xa25   :  { %3891 = vpow2.f32 %v2962_v12 }
 0xa26   :  { %3893 = vpow2.f32 %v2963_v16 }
 0xa2f   :  { %v3892_v17 = vpop.eup %3891 }
 0xa30   :  { %v2388_v19 = vadd.f32 1.0, %v3892_v17  ;;  %v3894_v24 = vpop.eup %3893 }
 0xa31   :  { %v2395_v26 = vadd.f32 1.0, %v3894_v24 }
 0xa32   :  { %3895 = vrcp.f32 %v2388_v19 }
 0xa33   :  { %3897 = vrcp.f32 %v2395_v26 }
 0xa3c   :  { %v3896_v61 = vpop.eup %3895 }
 0xa3d   :  { %v2399_v38 = vmul.f32 %v3896_v61, %v2398_v58  ;;  %v3898_v30 = vpop.eup %3897 }
 0xa3e   :  { %v2402_v20 = vsub.f32 1.0, %v3898_v30  ;;  %v2404_v5 = vmul.f32 %v3898_v30, %v5295_v55 }
 0xa3f   :  { %v2400_v42 = vadd.f32 %v2399_v38, %v1023_v22 }
 0xa41   :  { %3899 = vtanh.f32 %v2400_v42  ;;  %v1110_v42 = vadd.f32 %v4939_v36, %v4955_v56 }
 0xa4b   :  { %v3900_v3 = vpop.eup %3899 }
 0xa4c   :  { %v2403_v4 = vmul.f32 %v3900_v3, %v2402_v20 }
 0xa4e   :  { %v2405_v27 = vadd.f32 %v2404_v5, %v2403_v4 }
 0xa50   :  { %v2407_v29 = vsel %vm2406_vm8, %v2405_v27, 0.0  ;;  %v5344_v6 = vsel %vm2406_vm8, %v2405_v27, %v5295_v55 }
 0xa51   :  { %v2408_v7 = vpack.c.bf16 %v2407_v29, %v2407_v29  ;;  %v2415_v31 = vpack.c.bf16 %v5344_v6, %v5344_v6 }
 0xa53   :  { %2410 = vst [vmem:[#allocation15 + $0x1c] sm:$0xf] %v2408_v7  ;;  %2449 = vmatmul.mubr.bf16.vlgmr.msra.gmra.mrb[32].mxu0 %v2415_v31  ;;  %3605 = vmatmul.mubr.bf16.vlgmr.msra.gmra.mrb[80].mxu1 %v2415_v31 }
 0xa54   :  { %2530 = vmatpush1.bf16.msra.mxu0 %v5206_v32  ;;  %3609 = vmatpush3.bf16.msra.mxu1 %v5209_v53 }
 0xa55   :  { %2531 = vmatprep.subr.bf16.mxu0 %v5212_v34  ;;  %3610 = vmatprep.subr.bf16.mxu1 %v4187_v0 }
 0xa56   :  { %2561 = vmatprep.mubr.bf16.mxu0 %v4188_v1  ;;  %3624 = vmatprep.mubr.msk.bf16.mxu1 %vm4189_vm0, %v4187_v0 }
 0xa58   :  { %2532 = vmatpush1.bf16.msra.mxu0 %v5219_v60  ;;  %3611 = vmatpush3.bf16.msra.mxu1 %v5222_v37 }
 0xa59   :  { %2533 = vmatprep.subr.bf16.mxu0 %v5225_v43  ;;  %3612 = vmatprep.subr.bf16.mxu1 %v4187_v0 }
 0xa5c   :  { %2534 = vmatpush1.bf16.msra.mxu0 %v5229_v45  ;;  %3613 = vmatpush3.bf16.msra.mxu1 %v5232_v39 }
 0xa5d   :  { %2535 = vmatprep.subr.bf16.mxu0 %v5235_v40  ;;  %3614 = vmatprep.subr.bf16.mxu1 %v4187_v0 }
 0xa60   :  { %2536 = vmatpush1.bf16.msra.mxu0 %v5239_v33  ;;  %3615 = vmatpush3.bf16.msra.mxu1 %v5242_v44 }
 0xa61   :  { %2537 = vmatprep.subr.bf16.mxu0 %v5245_v18  ;;  %3616 = vmatprep.subr.bf16.mxu1 %v4187_v0 }
 0xa64   :  { %2538 = vmatpush1.bf16.msra.mxu0 %v5249_v48  ;;  %3617 = vmatpush3.bf16.msra.mxu1 %v5252_v25 }
 0xa65   :  { %2539 = vmatprep.subr.bf16.mxu0 %v5255_v49  ;;  %3618 = vmatprep.subr.bf16.mxu1 %v4187_v0 }
 0xa68   :  { %2540 = vmatpush1.bf16.msra.mxu0 %v5259_v50  ;;  %3619 = vmatpush3.bf16.msra.mxu1 %v5262_v47 }
 0xa69   :  { %2541 = vmatprep.subr.bf16.mxu0 %v5265_v52  ;;  %3620 = vmatprep.subr.bf16.mxu1 %v4187_v0 }
 0xa6c   :  { %2542 = vmatpush1.bf16.msra.mxu0 %v5269_v54  ;;  %3621 = vmatpush3.bf16.msra.mxu1 %v5272_v59 }
 0xa6d   :  { %2543 = vmatprep.subr.bf16.mxu0 %v5275_v62  ;;  %3622 = vmatprep.subr.bf16.mxu1 %v4187_v0 }
 0xa70   :  { %2544 = vmatpush1.bf16.msra.mxu0 %v5279_v63  ;;  %3623 = vmatpush3.bf16.msra.mxu1 %v5282_v2 }
 0xa71   :  { %2642 = vmatprep.subr.bf16.mxu0 %v5190_v57  ;;  %3628 = vmatprep.subr.bf16.mxu1 %v4187_v0 }
 0xb26   :  { %v2450_v55 = vpop.f32.mrb[32].mxu0  ;;  %v2491_v8 = vpop.f32.mrb[80].mxu1 }
 0xb27   :  { %v3684_v9 = vadd.f32 %v2450_v55, %v4947_v23  ;;  %v2452_v10 = vpop.f32.mrb[33].mxu0  ;;  %v3606_v11 = vpop.f32.mrb[81].mxu1  ;;  %v2511_v22 = vadd.f32 %v5336_v21, %v2491_v8 }
 0xb28   :  { %v2454_v12 = vpop.f32.mrb[34].mxu0  ;;  %v2494_v13 = vpop.f32.mrb[82].mxu1  ;;  %v3685_v17 = vadd.f32 %v2452_v10, %v4949_v28 }
 0xb29   :  { %v2964_v14 = vmul.f32 -1.442695, %v3684_v9  ;;  %v2455_v15 = vpop.f32.mrb[35].mxu0  ;;  %v3607_v16 = vpop.f32.mrb[83].mxu1 }
 0xb2a   :  { %v2965_v19 = vmul.f32 -1.442695, %v3685_v17 }
 0xb2b   :  { %3901 = vpow2.f32 %v2964_v14 }
 0xb2c   :  { %3903 = vpow2.f32 %v2965_v19 }
 0xb35   :  { %v3902_v24 = vpop.eup %3901 }
 0xb36   :  { %v2501_v26 = vadd.f32 1.0, %v3902_v24  ;;  %v3904_v58 = vpop.eup %3903 }
 0xb37   :  { %v2508_v61 = vadd.f32 1.0, %v3904_v58 }
 0xb38   :  { %3905 = vrcp.f32 %v2501_v26 }
 0xb39   :  { %3907 = vrcp.f32 %v2508_v61 }
 0xb42   :  { %v3906_v38 = vpop.eup %3905 }
 0xb43   :  { %v2512_v30 = vmul.f32 %v3906_v38, %v2511_v22  ;;  %v3908_v3 = vpop.eup %3907 }
 0xb44   :  { %v2515_v5 = vsub.f32 1.0, %v3908_v3  ;;  %v2517_v27 = vmul.f32 %v3908_v3, %v5344_v6 }
 0xb45   :  { %v2513_v20 = vadd.f32 %v2512_v30, %v1110_v42  ;;  %v1197_v42 = vadd.f32 %v4941_v41, %v4955_v56 }
 0xb47   :  { %3909 = vtanh.f32 %v2513_v20 }
 0xb51   :  { %v3910_v4 = vpop.eup %3909 }
 0xb52   :  { %v2516_v29 = vmul.f32 %v3910_v4, %v2515_v5 }
 0xb54   :  { %v2518_v7 = vadd.f32 %v2517_v27, %v2516_v29 }
 0xb56   :  { %v2520_v31 = vsel %vm2519_vm9, %v2518_v7, 0.0  ;;  %v5391_v55 = vsel %vm2519_vm9, %v2518_v7, %v5344_v6 }
 0xb57   :  { %v2521_v8 = vpack.c.bf16 %v2520_v31, %v2520_v31  ;;  %v2528_v36 = vpack.c.bf16 %v5391_v55, %v5391_v55 }
 0xb59   :  { %2523 = vst [vmem:[#allocation15 + $0x20] sm:$0xf] %v2521_v8  ;;  %2562 = vmatmul.mubr.bf16.vlgmr.msra.gmra.mrb[36].mxu0 %v2528_v36  ;;  %3625 = vmatmul.mubr.bf16.vlgmr.msra.gmra.mrb[84].mxu1 %v2528_v36 }
 0xb5a   :  { %2643 = vmatpush1.bf16.msra.mxu0 %v5206_v32  ;;  %3629 = vmatpush3.bf16.msra.mxu1 %v5209_v53 }
 0xb5b   :  { %2644 = vmatprep.subr.bf16.mxu0 %v5212_v34  ;;  %3630 = vmatprep.subr.bf16.mxu1 %v4187_v0 }
 0xb5c   :  { %2674 = vmatprep.mubr.bf16.mxu0 %v4188_v1  ;;  %3644 = vmatprep.mubr.msk.bf16.mxu1 %vm4189_vm0, %v4187_v0 }
 0xb5e   :  { %2645 = vmatpush1.bf16.msra.mxu0 %v5219_v60  ;;  %3631 = vmatpush3.bf16.msra.mxu1 %v5222_v37 }
 0xb5f   :  { %2646 = vmatprep.subr.bf16.mxu0 %v5225_v43  ;;  %3632 = vmatprep.subr.bf16.mxu1 %v4187_v0 }
 0xb62   :  { %2647 = vmatpush1.bf16.msra.mxu0 %v5229_v45  ;;  %3633 = vmatpush3.bf16.msra.mxu1 %v5232_v39 }
 0xb63   :  { %2648 = vmatprep.subr.bf16.mxu0 %v5235_v40  ;;  %3634 = vmatprep.subr.bf16.mxu1 %v4187_v0 }
 0xb66   :  { %2649 = vmatpush1.bf16.msra.mxu0 %v5239_v33  ;;  %3635 = vmatpush3.bf16.msra.mxu1 %v5242_v44 }
 0xb67   :  { %2650 = vmatprep.subr.bf16.mxu0 %v5245_v18  ;;  %3636 = vmatprep.subr.bf16.mxu1 %v4187_v0 }
 0xb6a   :  { %2651 = vmatpush1.bf16.msra.mxu0 %v5249_v48  ;;  %3637 = vmatpush3.bf16.msra.mxu1 %v5252_v25 }
 0xb6b   :  { %2652 = vmatprep.subr.bf16.mxu0 %v5255_v49  ;;  %3638 = vmatprep.subr.bf16.mxu1 %v4187_v0 }
 0xb6e   :  { %2653 = vmatpush1.bf16.msra.mxu0 %v5259_v50  ;;  %3639 = vmatpush3.bf16.msra.mxu1 %v5262_v47 }
 0xb6f   :  { %2654 = vmatprep.subr.bf16.mxu0 %v5265_v52  ;;  %3640 = vmatprep.subr.bf16.mxu1 %v4187_v0 }
 0xb72   :  { %2655 = vmatpush1.bf16.msra.mxu0 %v5269_v54  ;;  %3641 = vmatpush3.bf16.msra.mxu1 %v5272_v59 }
 0xb73   :  { %2656 = vmatprep.subr.bf16.mxu0 %v5275_v62  ;;  %3642 = vmatprep.subr.bf16.mxu1 %v4187_v0 }
 0xb76   :  { %2657 = vmatpush1.bf16.msra.mxu0 %v5279_v63  ;;  %3643 = vmatpush3.bf16.msra.mxu1 %v5282_v2 }
 0xb77   :  { %2755 = vmatprep.subr.bf16.mxu0 %v5190_v57  ;;  %3648 = vmatprep.subr.bf16.mxu1 %v4187_v0 }
 0xc2c   :  { %v2563_v6 = vpop.f32.mrb[36].mxu0  ;;  %v2604_v9 = vpop.f32.mrb[84].mxu1 }
 0xc2d   :  { %v3686_v10 = vadd.f32 %v2563_v6, %v4947_v23  ;;  %v2565_v11 = vpop.f32.mrb[37].mxu0  ;;  %v3626_v12 = vpop.f32.mrb[85].mxu1  ;;  %v2624_v22 = vadd.f32 %v5336_v21, %v2604_v9 }
 0xc2e   :  { %v2567_v13 = vpop.f32.mrb[38].mxu0  ;;  %v2607_v14 = vpop.f32.mrb[86].mxu1  ;;  %v3687_v19 = vadd.f32 %v2565_v11, %v4949_v28 }
 0xc2f   :  { %v2966_v15 = vmul.f32 -1.442695, %v3686_v10  ;;  %v2568_v16 = vpop.f32.mrb[39].mxu0  ;;  %v3627_v17 = vpop.f32.mrb[87].mxu1 }
 0xc30   :  { %v2967_v24 = vmul.f32 -1.442695, %v3687_v19 }
 0xc31   :  { %3911 = vpow2.f32 %v2966_v15 }
 0xc32   :  { %3913 = vpow2.f32 %v2967_v24 }
 0xc3b   :  { %v3912_v26 = vpop.eup %3911 }
 0xc3c   :  { %v2614_v57 = vadd.f32 1.0, %v3912_v26  ;;  %v3914_v58 = vpop.eup %3913 }
 0xc3d   :  { %v2621_v61 = vadd.f32 1.0, %v3914_v58 }
 0xc3e   :  { %3915 = vrcp.f32 %v2614_v57 }
 0xc3f   :  { %3917 = vrcp.f32 %v2621_v61 }
 0xc48   :  { %v3916_v38 = vpop.eup %3915 }
 0xc49   :  { %v2625_v30 = vmul.f32 %v3916_v38, %v2624_v22  ;;  %v3918_v3 = vpop.eup %3917 }
 0xc4a   :  { %v2628_v5 = vsub.f32 1.0, %v3918_v3  ;;  %v2630_v27 = vmul.f32 %v3918_v3, %v5391_v55  ;;  %v1371_v3 = vadd.f32 %v4945_v51, %v4955_v56 }
 0xc4b   :  { %v2626_v20 = vadd.f32 %v2625_v30, %v1197_v42 }
 0xc4d   :  { %3919 = vtanh.f32 %v2626_v20 }
 0xc57   :  { %v3920_v4 = vpop.eup %3919 }
 0xc58   :  { %v2629_v29 = vmul.f32 %v3920_v4, %v2628_v5 }
 0xc5a   :  { %v2631_v7 = vadd.f32 %v2630_v27, %v2629_v29 }
 0xc5c   :  { %v2633_v31 = vsel %vm2632_vm10, %v2631_v7, 0.0  ;;  %v5438_v8 = vsel %vm2632_vm10, %v2631_v7, %v5391_v55 }
 0xc5d   :  { %v2634_v36 = vpack.c.bf16 %v2633_v31, %v2633_v31  ;;  %v2641_v41 = vpack.c.bf16 %v5438_v8, %v5438_v8 }
 0xc5f   :  { %2636 = vst [vmem:[#allocation15 + $0x24] sm:$0xf] %v2634_v36  ;;  %2675 = vmatmul.mubr.bf16.vlgmr.msra.gmra.mrb[40].mxu0 %v2641_v41  ;;  %3645 = vmatmul.mubr.bf16.vlgmr.msra.gmra.mrb[88].mxu1 %v2641_v41 }
 0xc60   :  { %2756 = vmatpush1.bf16.msra.mxu0 %v5206_v32  ;;  %3649 = vmatpush3.bf16.msra.mxu1 %v5209_v53 }
 0xc61   :  { %2757 = vmatprep.subr.bf16.mxu0 %v5212_v34  ;;  %3650 = vmatprep.subr.bf16.mxu1 %v4187_v0 }
 0xc62   :  { %2787 = vmatprep.mubr.bf16.mxu0 %v4188_v1  ;;  %3664 = vmatprep.mubr.msk.bf16.mxu1 %vm4189_vm0, %v4187_v0 }
 0xc64   :  { %2758 = vmatpush1.bf16.msra.mxu0 %v5219_v60  ;;  %3651 = vmatpush3.bf16.msra.mxu1 %v5222_v37 }
 0xc65   :  { %2759 = vmatprep.subr.bf16.mxu0 %v5225_v43  ;;  %3652 = vmatprep.subr.bf16.mxu1 %v4187_v0 }
 0xc68   :  { %2760 = vmatpush1.bf16.msra.mxu0 %v5229_v45  ;;  %3653 = vmatpush3.bf16.msra.mxu1 %v5232_v39 }
 0xc69   :  { %2761 = vmatprep.subr.bf16.mxu0 %v5235_v40  ;;  %3654 = vmatprep.subr.bf16.mxu1 %v4187_v0 }
 0xc6c   :  { %2762 = vmatpush1.bf16.msra.mxu0 %v5239_v33  ;;  %3655 = vmatpush3.bf16.msra.mxu1 %v5242_v44 }
 0xc6d   :  { %2763 = vmatprep.subr.bf16.mxu0 %v5245_v18  ;;  %3656 = vmatprep.subr.bf16.mxu1 %v4187_v0 }
 0xc70   :  { %2764 = vmatpush1.bf16.msra.mxu0 %v5249_v48  ;;  %3657 = vmatpush3.bf16.msra.mxu1 %v5252_v25 }
 0xc71   :  { %2765 = vmatprep.subr.bf16.mxu0 %v5255_v49  ;;  %3658 = vmatprep.subr.bf16.mxu1 %v4187_v0 }
 0xc74   :  { %2766 = vmatpush1.bf16.msra.mxu0 %v5259_v50  ;;  %3659 = vmatpush3.bf16.msra.mxu1 %v5262_v47  ;;  %v1284_v47 = vadd.f32 %v4943_v46, %v4955_v56 }
 0xc75   :  { %2767 = vmatprep.subr.bf16.mxu0 %v5265_v52  ;;  %3660 = vmatprep.subr.bf16.mxu1 %v4187_v0 }
 0xc78   :  { %2768 = vmatpush1.bf16.msra.mxu0 %v5269_v54  ;;  %3661 = vmatpush3.bf16.msra.mxu1 %v5272_v59 }
 0xc79   :  { %2769 = vmatprep.subr.bf16.mxu0 %v5275_v62  ;;  %3662 = vmatprep.subr.bf16.mxu1 %v4187_v0 }
 0xc7c   :  { %2770 = vmatpush1.bf16.msra.mxu0 %v5279_v63  ;;  %3663 = vmatpush3.bf16.msra.mxu1 %v5282_v2 }
 0xd32   :  { %v2676_v1 = vpop.f32.mrb[40].mxu0  ;;  %v2717_v32 = vpop.f32.mrb[88].mxu1 }
 0xd33   :  { %v3688_v53 = vadd.f32 %v2676_v1, %v4947_v23  ;;  %v2678_v34 = vpop.f32.mrb[41].mxu0  ;;  %v3646_v60 = vpop.f32.mrb[89].mxu1  ;;  %v2737_v49 = vadd.f32 %v5336_v21, %v2717_v32 }
 0xd34   :  { %v2680_v37 = vpop.f32.mrb[42].mxu0  ;;  %v2720_v43 = vpop.f32.mrb[90].mxu1  ;;  %v3689_v33 = vadd.f32 %v2678_v34, %v4949_v28 }
 0xd35   :  { %v2968_v45 = vmul.f32 -1.442695, %v3688_v53  ;;  %v2681_v39 = vpop.f32.mrb[43].mxu0  ;;  %v3647_v40 = vpop.f32.mrb[91].mxu1 }
 0xd36   :  { %v2969_v44 = vmul.f32 -1.442695, %v3689_v33 }
 0xd37   :  { %3921 = vpow2.f32 %v2968_v45 }
 0xd38   :  { %3923 = vpow2.f32 %v2969_v44 }
 0xd41   :  { %v3922_v0 = vpop.eup %3921 }
 0xd42   :  { %v2727_v18 = vadd.f32 1.0, %v3922_v0  ;;  %v3924_v48 = vpop.eup %3923 }
 0xd43   :  { %v2734_v25 = vadd.f32 1.0, %v3924_v48 }
 0xd44   :  { %3925 = vrcp.f32 %v2727_v18 }
 0xd45   :  { %3927 = vrcp.f32 %v2734_v25 }
 0xd4e   :  { %v3926_v50 = vpop.eup %3925 }
 0xd4f   :  { %v2738_v52 = vmul.f32 %v3926_v50, %v2737_v49  ;;  %v3928_v59 = vpop.eup %3927 }
 0xd50   :  { %v2741_v62 = vsub.f32 1.0, %v3928_v59  ;;  %v2743_v2 = vmul.f32 %v3928_v59, %v5438_v8 }
 0xd51   :  { %v2739_v54 = vadd.f32 %v2738_v52, %v1284_v47 }
 0xd53   :  { %3929 = vtanh.f32 %v2739_v54 }
 0xd5d   :  { %v3930_v63 = vpop.eup %3929 }
 0xd5e   :  { %v2742_v55 = vmul.f32 %v3930_v63, %v2741_v62 }
 0xd60   :  { %v2744_v6 = vadd.f32 %v2743_v2, %v2742_v55 }
 0xd62   :  { %v2746_v9 = vsel %vm2745_vm11, %v2744_v6, 0.0  ;;  %v2750_v10 = vsel %vm2745_vm11, %v2744_v6, %v5438_v8 }
 0xd63   :  { %v2747_v11 = vpack.c.bf16 %v2746_v9, %v2746_v9  ;;  %v2754_v12 = vpack.c.bf16 %v2750_v10, %v2750_v10 }
 0xd65   :  { %2749 = vst [vmem:[#allocation15 + $0x28] sm:$0xf] %v2747_v11  ;;  %2788 = vmatmul.mubr.bf16.vlgmr.msra.gmra.mrb[44].mxu0 %v2754_v12  ;;  %3665 = vmatmul.mubr.bf16.vlgmr.msra.gmra.mrb[92].mxu1 %v2754_v12 }
 0xe38   :  { %v2789_v46 = vpop.f32.mrb[44].mxu0  ;;  %v2830_v13 = vpop.f32.mrb[92].mxu1 }
 0xe39   :  { %v3690_v14 = vadd.f32 %v2789_v46, %v4947_v23  ;;  %v2791_v15 = vpop.f32.mrb[45].mxu0  ;;  %v3666_v16 = vpop.f32.mrb[93].mxu1  ;;  %v2850_v20 = vadd.f32 %v5336_v21, %v2830_v13 }
 0xe3a   :  { %v2793_v17 = vpop.f32.mrb[46].mxu0  ;;  %v2833_v19 = vpop.f32.mrb[94].mxu1  ;;  %v3691_v58 = vadd.f32 %v2791_v15, %v4949_v28 }
 0xe3b   :  { %v2970_v24 = vmul.f32 -1.442695, %v3690_v14  ;;  %v2794_v26 = vpop.f32.mrb[47].mxu0  ;;  %v3667_v57 = vpop.f32.mrb[95].mxu1 }
 0xe3c   :  { %v2971_v61 = vmul.f32 -1.442695, %v3691_v58 }
 0xe3d   :  { %3931 = vpow2.f32 %v2970_v24 }
 0xe3e   :  { %3933 = vpow2.f32 %v2971_v61 }
 0xe47   :  { %v3932_v22 = vpop.eup %3931 }
 0xe48   :  { %v2840_v38 = vadd.f32 1.0, %v3932_v22  ;;  %v3934_v42 = vpop.eup %3933 }
 0xe49   :  { %v2847_v30 = vadd.f32 1.0, %v3934_v42 }
 0xe4a   :  { %3935 = vrcp.f32 %v2840_v38 }
 0xe4b   :  { %3937 = vrcp.f32 %v2847_v30 }
 0xe54   :  { %v3936_v23 = vpop.eup %3935 }
 0xe55   :  { %v2851_v5 = vmul.f32 %v3936_v23, %v2850_v20  ;;  %v3938_v27 = vpop.eup %3937 }
 0xe56   :  { %v2854_v28 = vsub.f32 1.0, %v3938_v27  ;;  %v2856_v31 = vmul.f32 %v3938_v27, %v2750_v10 }
 0xe57   :  { %v2852_v4 = vadd.f32 %v2851_v5, %v1371_v3 }
 0xe59   :  { %3939 = vtanh.f32 %v2852_v4 }
 0xe63   :  { %v3940_v29 = vpop.eup %3939 }
 0xe64   :  { %v2855_v7 = vmul.f32 %v3940_v29, %v2854_v28 }
 0xe66   :  { %v2857_v8 = vadd.f32 %v2856_v31, %v2855_v7 }
 0xe68   :  { %v2859_v21 = vsel %vm2858_vm12, %v2857_v8, 0.0  ;;  %v2863_v36 = vsel %vm2858_vm12, %v2857_v8, %v2750_v10 }
 0xe69   :  { %v2860_v51 = vpack.c.bf16 %v2859_v21, %v2859_v21  ;;  %2864 = vst [vmem:[#allocation16] sm:$0xff] %v2863_v36 }
 0xe6a   :  { %4131 = shalt.err (!%p4128_p4)
}
 0xe6b   :  { %s4132_s1 = scalar_lea.hbm %s5531_s8, 128 }
 0xe6c   :  { %p4133_p5 = scmp.ne.s32.totalorder %s5531_s8, %s4132_s1  ;;  %p4136_p6 = scmp.lt.u32.totalorder %s4132_s1, %s5531_s8 }
 0xe6e   :  { %p4138_p7 = pnand %p4136_p6, %p4133_p5 }
 0xe70   :  { %4141 = shalt.err (!%p4138_p7)
}
 0xe71   :  { %2886 = dma.vmem_to_hbm [thread:$0]  %s2884_s0, 128, %s5531_s8, [#allocation17]   ;;  %2862 = vst [vmem:[#allocation15 + $0x2c] sm:$0xf] %v2860_v51 }
 0xe72   :  { %s4142_s15 = scalar_lea.vmem %s5489_s26, 768  ;;  %p4147_p9 = scmp.lt.s32.totalorder %s5489_s26, %s5489_s26 }
 0xe73   :  { %p4143_p8 = scmp.ne.s32.totalorder %s5489_s26, %s4142_s15  ;;  %p4148_p10 = scmp.lt.s32.totalorder %s4142_s15, %s4142_s15 }
 0xe75   :  { %p4149_p11 = por %p4148_p10, %p4147_p9 }
 0xe77   :  { %p4150_p12 = pnand %p4149_p11, %p4143_p8 }
 0xe79   :  { %4153 = shalt.err (!%p4150_p12)
}
 0xe7a   :  { %s4154_s14 = scalar_lea.hbm %s5530_s7, 768 }
 0xe7b   :  { %p4155_p13 = scmp.ne.s32.totalorder %s5530_s7, %s4154_s14  ;;  %p4158_p0 = scmp.lt.u32.totalorder %s4154_s14, %s5530_s7 }
 0xe7d   :  { %p4160_p1 = pnand %p4158_p0, %p4155_p13 }
 0xe7f   :  { %4163 = shalt.err (!%p4160_p1)
}
 0xe80   :  { %2876 = dma.vmem_to_hbm [thread:$0]  %s5489_s26, 768, %s5530_s7, [#allocation5], %s4182_s5, %s4182_s5, %s4183_s22  }
 0xe81   :  { %4172 = dma.done.wait [#allocation5], 768  }
 0xe82   :  { %4173 = vsyncadd [#allocation5], 4294966528 }
 0xe83   :  { %4174 = dma.done.wait [#allocation17], 128  }
 0xe84   :  { %4175 = vsyncadd [#allocation17], 4294967168 }
 0xe85   :  { %2893 = vsyncpa [#allocation4], 1 }
 0xe86   :  { %2894 = vsyncpa [#allocation7], 1 }
 0xe87   :  { %2895 = vsyncpa [#allocation10], 1 }
 0xe88   :  { %2896 = vsyncpa [#allocation13], 1 }
 0xe89   :  { %2897 = vsyncpa [#allocation5], 1 }
 0xe8a   :  { %2898 = vsyncpa [#allocation17], 1 }

</bundles_post_ra>
